<compile_context>
chip_gen: v6e
topology: v6e:2x2x1
jax: 0.10.0
libtpu: 0.0.40
codegen_flags: <defaults>
</compile_context>

<pallas_src>
import functools

import jax
import jax.numpy as jnp
from jax import lax
from jax.experimental import pallas as pl
from jax.experimental.pallas import tpu as pltpu

IN_FEATURES = 196608   # fixed by the module definition (K)
OUT_FEATURES = 10      # fixed by the module definition (N)


def _linear_kernel(x_ref, w_ref, o_ref, acc_ref):
    """One K-tile of the partial matmul y_s = x_s @ w_s.T, accumulated in f32.

    x_ref:   (B, tk) activation tile
    w_ref:   (N, tk) weight tile (PyTorch layout, lane-dense along K)
    o_ref:   (B, N)  partial output for this K-split (split dim squeezed)
    acc_ref: (B, N)  f32 accumulator scratch
    """
    k = pl.program_id(1)

    @pl.when(k == 0)
    def _():
        acc_ref[...] = jnp.zeros_like(acc_ref)

    # (B, tk) x (N, tk) contracted over the tk axes -> (B, N)
    acc_ref[...] += lax.dot_general(
        x_ref[...],
        w_ref[...],
        dimension_numbers=(((1,), (1,)), ((), ())),
        preferred_element_type=jnp.float32,
    )

    @pl.when(k == pl.num_programs(1) - 1)
    def _():
        o_ref[...] = acc_ref[...].astype(o_ref.dtype)


@functools.partial(jax.jit, static_argnames=("tk", "num_splits"))
def linear_pallas(x, w, b, *, tk=32768, num_splits=2):
    """y = x @ w.T + b  with x:(B, K), w:(N, K) (PyTorch layout), b:(N,).

    The K reduction is split into `num_splits` partial sums (leading "parallel"
    grid axis -> megacore on v7x) of K // (num_splits * tk) tiles each; the
    partials and the bias are summed in the wrapper.
    Valid tk: multiple of 128 that divides K / num_splits
    (K = 196608 = 1536 * 128, so e.g. 32768 or 49152 work with num_splits=2).
    """
    B, K = x.shape
    N, K_w = w.shape
    assert K == K_w, (K, K_w)
    assert K % (num_splits * tk) == 0, "K must be divisible by num_splits * tk"
    steps = K // (num_splits * tk)

    partials = pl.pallas_call(
        _linear_kernel,
        out_shape=jax.ShapeDtypeStruct((num_splits, B, N), jnp.float32),
        grid_spec=pltpu.PrefetchScalarGridSpec(
            num_scalar_prefetch=0,
            grid=(num_splits, steps),
            in_specs=[
                # x tile: (B, tk). B equals the full array dim, tk % 128 == 0.
                pl.BlockSpec((B, tk), lambda s, k: (0, s * steps + k)),
                # w tile: (N, tk). N equals the full array dim (no N padding).
                pl.BlockSpec((N, tk), lambda s, k: (0, s * steps + k)),
            ],
            # One (B, N) partial per K-split; the split dim is squeezed.
            out_specs=pl.BlockSpec((None, B, N), lambda s, k: (s, 0, 0)),
            scratch_shapes=[pltpu.VMEM((B, N), jnp.float32)],
        ),
        compiler_params=pltpu.CompilerParams(
            # Split axis is independent work (2 TCs on v7x); K tiles are a
            # reduction into the resident accumulator.
            dimension_semantics=("parallel", "arbitrary"),
        ),
    )(x, w)

    # Tiny epilogue: sum the per-split partials and add the bias.
    return partials.sum(axis=0).astype(x.dtype) + b


def init_params(key):
    """Deterministic PyTorch-style init: U(-1/sqrt(K), 1/sqrt(K))."""
    kw, kb = jax.random.split(key)
    bound = 1.0 / (IN_FEATURES ** 0.5)
    # Weight stored in PyTorch Linear layout: (out_features, in_features).
    w = jax.random.uniform(
        kw, (OUT_FEATURES, IN_FEATURES), jnp.float32, -bound, bound
    )
    b = jax.random.uniform(kb, (OUT_FEATURES,), jnp.float32, -bound, bound)
    return w, b


if __name__ == "__main__":
    key = jax.random.PRNGKey(0)
    k_x, k_p = jax.random.split(key)

    batch = 2
    x = jax.random.normal(k_x, (batch, IN_FEATURES), jnp.float32)
    w, b = init_params(k_p)

    y = linear_pallas(x, w, b)
    jax.block_until_ready(y)

    # Reference check against plain JAX (same math as torch.nn.Linear).
    y_ref = x @ w.T + b
    assert y.shape == (batch, OUT_FEATURES), y.shape
    assert jnp.allclose(y, y_ref, atol=1e-3, rtol=1e-3), float(
        jnp.max(jnp.abs(y - y_ref))
    )

    print("KERNEL_OK")
</pallas_src>

<mosaic_0001>
module attributes {stable_mosaic.version = 11 : i64} {
  func.func @_linear_kernel(%arg0: i32, %arg1: i32, %arg2: memref<2x32768xf32, #tpu.memory_space<vmem>>, %arg3: memref<10x32768xf32, #tpu.memory_space<vmem>>, %arg4: memref<1x2x10xf32, #tpu.memory_space<vmem>>, %arg5: memref<2x10xf32, #tpu.memory_space<vmem>>) attributes {dimension_semantics = [#tpu.dimension_semantics<parallel>, #tpu.dimension_semantics<arbitrary>], iteration_bounds = array<i64: 2, 3>, scalar_prefetch = 0 : i64, scratch_operands = 1 : i64, tpu.core_type = #tpu.core_type<tc>, window_params = [{transform_indices = @transform_0, window_bounds = array<i64: 2, 32768>}, {transform_indices = @transform_1, window_bounds = array<i64: 10, 32768>}, {transform_indices = @transform_2, window_bounds = array<i64: 1, 2, 10>}]} {
    %c0_i32 = arith.constant 0 : i32
    %0 = arith.cmpi eq, %arg1, %c0_i32 : i32
    %1 = arith.extui %0 : i1 to i32
    %c0_i32_0 = arith.constant 0 : i32
    %2 = arith.cmpi ne, %1, %c0_i32_0 : i32
    scf.if %2 {
      %cst_9 = arith.constant 0.000000e+00 : f32
      %12 = vector.broadcast %cst_9 : f32 to vector<2x10xf32>
      %c0_10 = arith.constant 0 : index
      %c0_11 = arith.constant 0 : index
      %13 = vector.load %arg5[%c0_10, %c0_11] : memref<2x10xf32, #tpu.memory_space<vmem>>, vector<2x10xf32>
      tpu.vector_store %arg5[%c0_10, %c0_11], %12 {strides = array<i32>} : memref<2x10xf32, #tpu.memory_space<vmem>>, vector<2x10xf32>,
    } else {
    }
    %c0 = arith.constant 0 : index
    %c0_1 = arith.constant 0 : index
    %3 = vector.load %arg5[%c0, %c0_1] : memref<2x10xf32, #tpu.memory_space<vmem>>, vector<2x10xf32>
    %c0_2 = arith.constant 0 : index
    %c0_3 = arith.constant 0 : index
    %4 = vector.load %arg2[%c0_2, %c0_3] : memref<2x32768xf32, #tpu.memory_space<vmem>>, vector<2x32768xf32>
    %c0_4 = arith.constant 0 : index
    %c0_5 = arith.constant 0 : index
    %5 = vector.load %arg3[%c0_4, %c0_5] : memref<10x32768xf32, #tpu.memory_space<vmem>>, vector<10x32768xf32>
    %cst = arith.constant dense<0.000000e+00> : vector<2x10xf32>
    %6 = tpu.matmul %4, %5, %cst {dimension_numbers = #tpu.dot_dimension_numbers<[1], [1], [0], [0], [0, 0, 1, 0], [], []>} : vector<2x32768xf32>, vector<10x32768xf32>, vector<2x10xf32> -> vector<2x10xf32>
    %7 = arith.addf %3, %6 : vector<2x10xf32>
    %c0_6 = arith.constant 0 : index
    %c0_7 = arith.constant 0 : index
    %8 = vector.load %arg5[%c0_6, %c0_7] : memref<2x10xf32, #tpu.memory_space<vmem>>, vector<2x10xf32>
    tpu.vector_store %arg5[%c0_6, %c0_7], %7 {strides = array<i32>} : memref<2x10xf32, #tpu.memory_space<vmem>>, vector<2x10xf32>,
    %c2_i32 = arith.constant 2 : i32
    %9 = arith.cmpi eq, %arg1, %c2_i32 : i32
    %10 = arith.extui %9 : i1 to i32
    %c0_i32_8 = arith.constant 0 : i32
    %11 = arith.cmpi ne, %10, %c0_i32_8 : i32
    scf.if %11 {
      %c0_9 = arith.constant 0 : index
      %c0_10 = arith.constant 0 : index
      %12 = vector.load %arg5[%c0_9, %c0_10] : memref<2x10xf32, #tpu.memory_space<vmem>>, vector<2x10xf32>
      %c0_11 = arith.constant 0 : index
      %c0_12 = arith.constant 0 : index
      %c0_13 = arith.constant 0 : index
      %13 = vector.load %arg4[%c0_11, %c0_12, %c0_13] : memref<1x2x10xf32, #tpu.memory_space<vmem>>, vector<1x2x10xf32>
      %14 = vector.shape_cast %13 : vector<1x2x10xf32> to vector<2x10xf32>
      %15 = vector.shape_cast %12 : vector<2x10xf32> to vector<1x2x10xf32>
      tpu.vector_store %arg4[%c0_11, %c0_12, %c0_13], %15 {strides = array<i32>} : memref<1x2x10xf32, #tpu.memory_space<vmem>>, vector<1x2x10xf32>,
    } else {
    }
    return
  }
  func.func @transform_0(%arg0: i32, %arg1: i32) -> (i32, i32) {
    %c3_i32 = arith.constant 3 : i32
    %0 = arith.muli %arg0, %c3_i32 : i32
    %1 = arith.addi %0, %arg1 : i32
    %c0_i32 = arith.constant 0 : i32
    %c0_i32_0 = arith.constant 0 : i32
    return %c0_i32, %1 : i32, i32
  }
  func.func @transform_1(%arg0: i32, %arg1: i32) -> (i32, i32) {
    %c3_i32 = arith.constant 3 : i32
    %0 = arith.muli %arg0, %c3_i32 : i32
    %1 = arith.addi %0, %arg1 : i32
    %c0_i32 = arith.constant 0 : i32
    %c0_i32_0 = arith.constant 0 : i32
    return %c0_i32, %1 : i32, i32
  }
  func.func @transform_2(%arg0: i32, %arg1: i32) -> (i32, i32, i32) {
    %c0_i32 = arith.constant 0 : i32
    %c0_i32_0 = arith.constant 0 : i32
    %c0_i32_1 = arith.constant 0 : i32
    return %arg0, %c0_i32, %c0_i32_0 : i32, i32, i32
  }
}

</mosaic_0001>

<bundles_post_ra>
// kernel: linear_pallas.1
= control target key start
LH: loop header
LB: loop body
LE: loop exit
PB: predicated region body
PF: predicated region fallthrough
CT: control target
= control target key end

     0   :  { %7 = vsyncpa [#allocation4], 0  ;;  %s12472_s0 = inlined_call_operand.hbm [shape: f32[2,196608], index: 0, kind: input, shape index: {}]   ;;  %s12473_s1 = inlined_call_operand.hbm [shape: f32[10,196608], index: 1, kind: input, shape index: {}]   ;;  %s12474_s2 = inlined_call_operand.vmem [shape: f32[2,2,10], index: 2, kind: output, shape index: {}]  }
   0x1   :  { %9 = vsyncpa [#allocation4 + $0x1], 0 }
   0x2   :  { %10 = vsyncpa [#allocation6], 0 }
   0x3   :  { %12 = vsyncpa [#allocation6 + $0x1], 0  ;;  %s11608_s9 = smov 0   ;;  %s11610_s10 = smov 0  }
   0x4   :  { %s11612_s11 = smov 0   ;;  %s11614_s12 = smov 0  }
   0x5   :  { %s11616_s13 = smov 0   ;;  %s11618_s14 = smov 0  }
   0x6   :  { %s11620_s15 = smov 0   ;;  %s11622_s16 = smov 0  }
   0x7 LB: > { %s11293_s17 = sadd.s32 4294967295, %s11584_s16   ;;  %s27_s18 = sadd.s32 1, %s11576_s14  ;;  %s11584_s16 = sphi %s11622_s16, %s18_s16   ;;  %s11580_s15 = sphi %s11620_s15, %s12485_s15   ;;  %s11576_s14 = sphi %s11618_s14, %s12484_s14   ;;  %s11572_s13 = sphi %s11616_s13, %s12483_s13   ;;  %s11568_s12 = sphi %s11614_s12, %s12482_s12   ;;  %s11564_s11 = sphi %s11612_s11, %s12481_s11   ;;  %s11560_s10 = sphi %s11610_s10, %s12480_s10   ;;  %s11556_s9 = sphi %s11608_s9, %s12479_s9  }
   0x8   : > { %p28_p0 = scmp.ge.s32.totalorder %s27_s18, 3  ;;  %s30_s19 = sadd.s32 1, %s11580_s15 }
   0x9   : > { %s34_s20 = smul.u32 3, %s11580_s15  ;;  %s41_s21 = sadd.s32 1, %s11564_s11 }
   0xa   : > { %s12487_s18 = smov (%p28_p0, %s27_s18), 0  ;;  %s12489_s19 = smov (!%p28_p0, %s30_s19), %s11580_s15 }
   0xb   : > { %s11655_s22 = sadd.s32 %s11576_s14, %s34_s20  ;;  %p48_p1 = scmp.ne.s32.totalorder %s11564_s11, %s11560_s10 }
   0xc   : > { %p32_p2 = scmp.ge.s32.totalorder %s12489_s19, 2  ;;  %p49_p3 = scmp.eq.s32.totalorder %s11584_s16, 0 }
   0xd   : > { %p54_p4 = scmp.ne.s32.totalorder %s11560_s10, %s11556_s9  ;;  %p55_p5 = scmp.eq.s32.totalorder %s11293_s17, 0 }
   0xe   : > { %s12491_s19 = smov (%p32_p2, %s12489_s19), 0  ;;  %p11663_p6 = por %p49_p3, %p48_p1 }
   0xf   : > { %p11667_p7 = por %p55_p5, %p54_p4  ;;  %s36_s25 = smul.u32 3, %s12491_s19 }
  0x10   : > { %p11324_p8 = scmp.lt.s32.totalorder %s11584_s16, 6  ;;  %s11674_s26 = sand.u32 1, %s11564_s11  }
  0x11   : > { %s37_s27 = sadd.s32 %s36_s25, %s12487_s18  ;;  %s11297_s29 = sshll.u32 %s11674_s26, 9 }
  0x12   : > { %s38_s28 = ssub.s32 %s11655_s22, %s37_s27  ;;  %s11311_s30 = sshll.u32 %s11655_s22, 13 }
  0x13   : > { %p39_p9 = scmp.eq.s32.totalorder %s38_s28, 0  ;;  %s138_s3 = scalar_lea.vmem [#allocation3], %s11297_s29 }
  0x14   : > { %s148_s4 = sshll.u32 %s138_s3, 4  ;;  %s146_s8 = scalar_lea.hbm %s12472_s0, %s11311_s30  ;;  %s149_s4 = int_to_ptr.vmem [resolvable:$true] %s148_s4 }
  0x15   : > { %s11681_s5 = scalar_select %p39_p9, %s11564_s11, %s41_s21  }
  0x16   : > { %p11688_p10 = pnand %p11324_p8, %p11663_p6  ;;  %s11300_s17 = sshll.u32 %s11674_s26, 12 }
  0x17   : > { %s11312_s20 = sshll.u32 %s11655_s22, 15  ;;  %s135_s25 = scalar_lea.sflag [#allocation4], %s11674_s26 }
  0x18   : > { %p11460_p11 = pneg %p11688_p10  ;;  %s11471_s27 = scalar_lea.vmem %s149_s4, 8192 }
  0x19   : > { %p11472_p12 = scmp.ne.s32.totalorder %s149_s4, %s11471_s27  ;;  %s11586_s21 = smov [#allocation3]  }
  0x1a   : > { %s11476_s28 = sshll.u32 %s11586_s21, 4  ;;  %s11477_s28 = int_to_ptr.vmem [resolvable:$false] %s11476_s28 }
  0x1b   : > { %p11474_p13 = pnand %p11472_p12, %p11460_p11  ;;  %s11478_s23 = scalar_lea.vmem %s11477_s28, 16384 }
  0x1c   : > { %p11479_p1 = scmp.lt.s32.totalorder %s149_s4, %s11477_s28  ;;  %p11480_p2 = scmp.lt.s32.totalorder %s11478_s23, %s11471_s27 }
  0x1d   : > { %p11475_p0 = pneg %p11474_p13 }
  0x1e   : > { %p11481_p3 = por %p11480_p2, %p11479_p1 }
  0x20   : > { %p11482_p4 = pnand %p11481_p3, %p11475_p0 }
  0x22   : > { %11485 = shalt.err (!%p11482_p4)
}
  0x23   : > { %11320 = dma.hbm_to_vmem [thread:$0]  (!%p11688_p10), %s146_s8, 8192, %s149_s4, %s135_s25  }
  0x24   : > { %s167_s30 = scalar_lea.hbm %s12473_s1, %s11312_s20  ;;  %p11303_p5 = scmp.ge.s32.totalorder %s11584_s16, 1 }
  0x25   : > { %p176_p6 = scmp.lt.s32.totalorder %s11584_s16, 7  ;;  %s159_s3 = scalar_lea.vmem [#allocation5], %s11300_s17 }
  0x26   : > { %s168_s6 = sshll.u32 %s159_s3, 4  ;;  %s156_s27 = scalar_lea.sflag [#allocation6], %s11674_s26  ;;  %s169_s6 = int_to_ptr.vmem [resolvable:$true] %s168_s6 }
  0x27   : > { %p11707_p8 = pnand %p11303_p5, %p176_p6  ;;  %s11499_s21 = scalar_lea.vmem %s169_s6, 65536 }
  0x28   : > { %p11500_p9 = scmp.ne.s32.totalorder %s169_s6, %s11499_s21  ;;  %s11587_s4 = smov [#allocation5]  }
  0x29   : > { %s11504_s8 = sshll.u32 %s11587_s4, 4  ;;  %s11505_s8 = int_to_ptr.vmem [resolvable:$false] %s11504_s8 }
  0x2a   : > { %p11502_p12 = pnand %p11500_p9, %p11460_p11  ;;  %s11506_s20 = scalar_lea.vmem %s11505_s8, 131072 }
  0x2b   : > { %p11507_p0 = scmp.lt.s32.totalorder %s169_s6, %s11505_s8  ;;  %p11508_p1 = scmp.lt.s32.totalorder %s11506_s20, %s11499_s21 }
  0x2c   : > { %p11503_p13 = pneg %p11502_p12 }
  0x2d   : > { %p11509_p2 = por %p11508_p1, %p11507_p0 }
  0x2f   : > { %p11510_p3 = pnand %p11509_p2, %p11503_p13 }
  0x31   : > { %11513 = shalt.err (!%p11510_p3)
}
  0x32   : > { %s11588_s17 = smov 196608   ;;  %s11589_s25 = smov 32768  }
  0x33   : > { %s11590_s28 = smov 2048   ;;  %180 = sbr.rel (%p11707_p8) target bundleno = 794 (0x31a), region = 28 }
  0x34   : > { %11323 = dma.hbm_to_vmem [thread:$0]  (!%p11688_p10), %s167_s30, 65536, %s169_s6, %s156_s27, %s11588_s17, %s11589_s25, %s11590_s28  }
  0x35   : > { %s182_s26 = sand.u32 (!%p11707_p8), 1, %s11560_s10  }
  0x36   : > { %s11304_s23 = sshll.u32 (!%p11707_p8), %s182_s26, 9  ;;  %s183_s22 = scalar_lea.sflag (!%p11707_p8), [#allocation4], %s182_s26 }
  0x37   : > { %s11720_s29 = scalar_lea.vmem (!%p11707_p8), [#allocation3], %s11304_s23 }
  0x38   : > { %11547 = dma.done.wait (%p11667_p7), %s183_s22, 8192  }
  0x39   : > { %11549 = vsyncadd (%p11667_p7), %s183_s22, 4294959104  ;;  %s11305_s3 = sshll.u32 %s182_s26, 12  ;;  %s192_s21 = scalar_lea.sflag [#allocation6], %s182_s26 }
  0x3a   : > { %s11726_s9 = scalar_lea.vmem [#allocation5], %s11305_s3 }
  0x3b   : > { %11551 = dma.done.wait (%p11667_p7), %s192_s21, 65536  }
  0x3c   : > { %11553 = vsyncadd (%p11667_p7), %s192_s21, 4294901760  ;;  %p226_p10 = scmp.lt.s32.totalorder %s11572_s13, 1  ;;  %p11307_p11 = scmp.ne.s32.totalorder %s11568_s12, 0 }
  0x3e   : > { %s12493_s13 = smov (!%p226_p10, %s11572_s13), 1  ;;  %233 = sbr.rel (%p11307_p11) target bundleno = 69 (0x45), region = 40 }
  0x3f   : > { %s11306_s30 = sshll.u32 %s12493_s13, 1 }
  0x40   : > { %s11737_s27 = scalar_lea.vmem %s12474_s2, %s11306_s30 }
  0x43   : > { %vm234_vm0 = vcmask 74752   ;;  %v11591_v0 = vmov 0.0  }
  0x44   : > { %235 = vst.msk [vmem:[#allocation2] sm:$0x3] %vm234_vm0, %v11591_v0 }
  0x45 PF: > { %v558_v1 = vld [vmem:[%s11726_s9 + $0x808] sm:$0x3]  ;;  %v560_v2 = vld [vmem:[%s11726_s9 + $0x818] sm:$0x3]  ;;  %v557_v3 = vld [vmem:[%s11726_s9 + $0x800] sm:$0x3]  ;;  %v881_v4 = vlaneseq }
  0x46   : > { %2249 = vmatprep.subr.mxu0 %v558_v1  ;;  %2319 = vmatprep.subr.mxu1 %v560_v2  ;;  %v559_v5 = vld [vmem:[%s11726_s9 + $0x810] sm:$0x3]  ;;  %v302_v6 = vld [vmem:[%s11726_s9 + $0x8] sm:$0xff]  ;;  %v304_v7 = vld [vmem:[%s11726_s9 + $0x18] sm:$0xff]  ;;  %v11592_v9 = vmov 1983009808  }
  0x47   : > { %2250 = vmatpush1.xpose.msra.mxu0 %v557_v3  ;;  %2320 = vmatpush1.xpose.msra.mxu1 %v559_v5  ;;  %v237_v8 = vld [vmem:[%s11720_s29] sm:$0xff]  ;;  %v879_v10 = vunpack.c.l.s4 %v11592_v9  ;;  %v882_v11 = vshrl.u32 %v881_v4, 7  ;;  %v303_v13 = vld [vmem:[%s11726_s9 + $0x10] sm:$0xff]  ;;  %v562_v16 = vld [vmem:[%s11726_s9 + $0x828] sm:$0x3]  ;;  %vm11182_vm1 = vcmask 74752  }
  0x48   : > { %2251 = vmatprep.subr.mxu0 %v302_v6  ;;  %2321 = vmatprep.subr.mxu1 %v304_v7  ;;  %v301_v12 = vld [vmem:[%s11726_s9] sm:$0xff]  ;;  %v877_v15 = vcombine.high %v237_v8, %v237_v8  ;;  %v564_v17 = vld [vmem:[%s11726_s9 + $0x838] sm:$0x3]  ;;  %v238_v18 = vld [vmem:[%s11720_s29 + $0x8] sm:$0xff]  ;;  %p11308_p7 = scmp.ne.s32.totalorder %s11568_s12, 2 }
  0x49   : > { %v880_v14 = vunpack.c.0.s8 %v879_v10  ;;  %v894_v20 = vcombine.high %v238_v18, %v238_v18  ;;  %v239_v25 = vld [vmem:[%s11720_s29 + $0x10] sm:$0xff]  ;;  %v561_v28 = vld [vmem:[%s11726_s9 + $0x820] sm:$0x3]  ;;  %v306_v30 = vld [vmem:[%s11726_s9 + $0x28] sm:$0xff] }
  0x4a   : > { %v563_v29 = vld [vmem:[%s11726_s9 + $0x830] sm:$0x3]  ;;  %v308_v31 = vld [vmem:[%s11726_s9 + $0x38] sm:$0xff]  ;;  %v911_v34 = vcombine.high %v239_v25, %v239_v25  ;;  %v305_v35 = vld [vmem:[%s11726_s9 + $0x20] sm:$0xff] }
  0x4b   : > { %2252 = vmatpush1.xpose.msra.mxu0 %v301_v12  ;;  %2322 = vmatpush1.xpose.msra.mxu1 %v303_v13  ;;  %v11752_v19 = vsub.s32 %v880_v14, %v882_v11  ;;  %v307_v36 = vld [vmem:[%s11726_s9 + $0x30] sm:$0xff]  ;;  %v566_v37 = vld [vmem:[%s11726_s9 + $0x848] sm:$0x3]  ;;  %v568_v38 = vld [vmem:[%s11726_s9 + $0x858] sm:$0x3] }
  0x4c   : > { %2389 = vmatprep.subr.mxu0 %v562_v16  ;;  %2459 = vmatprep.subr.mxu1 %v564_v17  ;;  %v240_v41 = vld [vmem:[%s11720_s29 + $0x18] sm:$0xff]  ;;  %v565_v42 = vld [vmem:[%s11726_s9 + $0x840] sm:$0x3]  ;;  %v567_v43 = vld [vmem:[%s11726_s9 + $0x850] sm:$0x3] }
  0x4d   : > { %v884_v21 = vrot.slane %v237_v8, %v11752_v19  ;;  %v891_v22 = vrot.slane %v877_v15, %v11752_v19  ;;  %v901_v23 = vrot.slane %v238_v18, %v11752_v19  ;;  %v908_v24 = vrot.slane %v894_v20, %v11752_v19  ;;  %v310_v44 = vld [vmem:[%s11726_s9 + $0x48] sm:$0xff]  ;;  %v312_v45 = vld [vmem:[%s11726_s9 + $0x58] sm:$0xff]  ;;  %v309_v49 = vld [vmem:[%s11726_s9 + $0x40] sm:$0xff] }
  0x4e   : > { %v918_v39 = vrot.slane %v239_v25, %v11752_v19  ;;  %v925_v40 = vrot.slane %v911_v34, %v11752_v19  ;;  %v928_v48 = vcombine.high %v240_v41, %v240_v41  ;;  %v311_v50 = vld [vmem:[%s11726_s9 + $0x50] sm:$0xff]  ;;  %v570_v51 = vld [vmem:[%s11726_s9 + $0x868] sm:$0x3]  ;;  %v572_v52 = vld [vmem:[%s11726_s9 + $0x878] sm:$0x3]  ;;  %v935_v53 = vrot.slane %v240_v41, %v11752_v19 }
  0x4f   : > { %v892_v26 = vcombine.high %v884_v21, %v884_v21  ;;  %v893_v27 = vcombine.high %v891_v22, %v891_v22  ;;  %v909_v32 = vcombine.high %v901_v23, %v901_v23  ;;  %v910_v33 = vcombine.high %v908_v24, %v908_v24  ;;  %v241_v55 = vld [vmem:[%s11720_s29 + $0x20] sm:$0xff]  ;;  %v571_v57 = vld [vmem:[%s11726_s9 + $0x870] sm:$0x3]  ;;  %v314_v58 = vld [vmem:[%s11726_s9 + $0x68] sm:$0xff] }
  0x50   : > { %v926_v46 = vcombine.high %v918_v39, %v918_v39  ;;  %v927_v47 = vcombine.high %v925_v40, %v925_v40  ;;  %v942_v54 = vrot.slane %v928_v48, %v11752_v19  ;;  %v569_v56 = vld [vmem:[%s11726_s9 + $0x860] sm:$0x3]  ;;  %v316_v59 = vld [vmem:[%s11726_s9 + $0x78] sm:$0xff]  ;;  %v943_v60 = vcombine.high %v935_v53, %v935_v53  ;;  %v315_v0 = vld [vmem:[%s11726_s9 + $0x70] sm:$0xff] }
  0x51   : > { %2285 = vmatprep.mubr.f32.mxu0 %v892_v26  ;;  %2355 = vmatprep.mubr.f32.mxu1 %v893_v27  ;;  %v945_v62 = vcombine.high %v241_v55, %v241_v55  ;;  %v313_v63 = vld [vmem:[%s11726_s9 + $0x60] sm:$0xff]  ;;  %v574_v1 = vld [vmem:[%s11726_s9 + $0x888] sm:$0x3]  ;;  %v576_v2 = vld [vmem:[%s11726_s9 + $0x898] sm:$0x3]  ;;  %v952_v3 = vrot.slane %v241_v55, %v11752_v19 }
  0x52   : > { %2286 = vmatmul.mubr.f32.vlgmr.msra.gmra.mxu0 %v884_v21  ;;  %2356 = vmatmul.mubr.f32.vlgmr.msra.gmra.mxu1 %v891_v22  ;;  %v944_v61 = vcombine.high %v942_v54, %v942_v54  ;;  %v242_v5 = vld [vmem:[%s11720_s29 + $0x28] sm:$0xff]  ;;  %v573_v6 = vld [vmem:[%s11726_s9 + $0x880] sm:$0x3]  ;;  %v575_v7 = vld [vmem:[%s11726_s9 + $0x890] sm:$0x3] }
  0x53   : > { %2390 = vmatpush1.xpose.msra.mxu0 %v561_v28  ;;  %2460 = vmatpush1.xpose.msra.mxu1 %v563_v29  ;;  %v959_v4 = vrot.slane %v945_v62, %v11752_v19  ;;  %v318_v8 = vld [vmem:[%s11726_s9 + $0x88] sm:$0xff]  ;;  %v320_v9 = vld [vmem:[%s11726_s9 + $0x98] sm:$0xff]  ;;  %v960_v10 = vcombine.high %v952_v3, %v952_v3  ;;  %v962_v12 = vcombine.high %v242_v5, %v242_v5  ;;  %v317_v13 = vld [vmem:[%s11726_s9 + $0x80] sm:$0xff] }
  0x54   : > { %2391 = vmatprep.subr.mxu0 %v306_v30  ;;  %2461 = vmatprep.subr.mxu1 %v308_v31  ;;  %v319_v14 = vld [vmem:[%s11726_s9 + $0x90] sm:$0xff]  ;;  %v578_v15 = vld [vmem:[%s11726_s9 + $0x8a8] sm:$0x3]  ;;  %v580_v16 = vld [vmem:[%s11726_s9 + $0x8b8] sm:$0x3]  ;;  %v969_v17 = vrot.slane %v242_v5, %v11752_v19 }
  0x55   : > { %2425 = vmatprep.mubr.f32.mxu0 %v909_v32  ;;  %2495 = vmatprep.mubr.f32.mxu1 %v910_v33  ;;  %v961_v11 = vcombine.high %v959_v4, %v959_v4  ;;  %v976_v18 = vrot.slane %v962_v12, %v11752_v19  ;;  %v243_v20 = vld [vmem:[%s11720_s29 + $0x30] sm:$0xff]  ;;  %v577_v21 = vld [vmem:[%s11726_s9 + $0x8a0] sm:$0x3]  ;;  %v582_v30 = vld [vmem:[%s11726_s9 + $0x8c8] sm:$0x3] }
  0x56   : > { %v579_v22 = vld [vmem:[%s11726_s9 + $0x8b0] sm:$0x3]  ;;  %v977_v25 = vcombine.high %v969_v17, %v969_v17  ;;  %v979_v27 = vcombine.high %v243_v20, %v243_v20  ;;  %v321_v28 = vld [vmem:[%s11726_s9 + $0xa0] sm:$0xff]  ;;  %v584_v31 = vld [vmem:[%s11726_s9 + $0x8d8] sm:$0x3]  ;;  %v986_v32 = vrot.slane %v243_v20, %v11752_v19 }
  0x57   : > { %2392 = vmatpush1.xpose.msra.mxu0 %v305_v35  ;;  %2462 = vmatpush1.xpose.msra.mxu1 %v307_v36  ;;  %v978_v26 = vcombine.high %v976_v18, %v976_v18  ;;  %v323_v29 = vld [vmem:[%s11726_s9 + $0xb0] sm:$0xff]  ;;  %v244_v34 = vld [vmem:[%s11720_s29 + $0x38] sm:$0xff]  ;;  %v581_v35 = vld [vmem:[%s11726_s9 + $0x8c0] sm:$0x3] }
  0x58   : > { %2529 = vmatprep.subr.mxu0 %v566_v37  ;;  %2599 = vmatprep.subr.mxu1 %v568_v38  ;;  %v993_v33 = vrot.slane %v979_v27, %v11752_v19  ;;  %v583_v36 = vld [vmem:[%s11726_s9 + $0x8d0] sm:$0x3]  ;;  %v326_v37 = vld [vmem:[%s11726_s9 + $0xc8] sm:$0xff]  ;;  %v328_v38 = vld [vmem:[%s11726_s9 + $0xd8] sm:$0xff]  ;;  %v996_v41 = vcombine.high %v244_v34, %v244_v34 }
  0x59   : > { %v245_v48 = vld [vmem:[%s11720_s29 + $0x40] sm:$0xff]  ;;  %v246_v62 = vld [vmem:[%s11720_s29 + $0x48] sm:$0xff]  ;;  %v247_v12 = vld [vmem:[%s11720_s29 + $0x50] sm:$0xff] }
  0x5a   : > { %2426 = vmatmul.mubr.f32.vlgmr.msra.gmra.mxu0 %v901_v23  ;;  %2496 = vmatmul.mubr.f32.vlgmr.msra.gmra.mxu1 %v908_v24  ;;  %v322_v23 = vld [vmem:[%s11726_s9 + $0xa8] sm:$0xff]  ;;  %v324_v24 = vld [vmem:[%s11726_s9 + $0xb8] sm:$0xff]  ;;  %v1013_v55 = vcombine.high %v245_v48, %v245_v48  ;;  %v1030_v5 = vcombine.high %v246_v62, %v246_v62  ;;  %v1047_v20 = vcombine.high %v247_v12, %v247_v12 }
  0x5b   : > { %2530 = vmatpush1.xpose.msra.mxu0 %v565_v42  ;;  %2600 = vmatpush1.xpose.msra.mxu1 %v567_v43  ;;  %v325_v42 = vld [vmem:[%s11726_s9 + $0xc0] sm:$0xff]  ;;  %v327_v43 = vld [vmem:[%s11726_s9 + $0xd0] sm:$0xff]  ;;  %v248_v27 = vld [vmem:[%s11720_s29 + $0x58] sm:$0xff] }
  0x5c   : > { %2531 = vmatprep.subr.mxu0 %v310_v44  ;;  %2601 = vmatprep.subr.mxu1 %v312_v45  ;;  %v586_v44 = vld [vmem:[%s11726_s9 + $0x8e8] sm:$0x3]  ;;  %v588_v45 = vld [vmem:[%s11726_s9 + $0x8f8] sm:$0x3] }
  0x5d   : > { %2565 = vmatprep.mubr.f32.mxu0 %v926_v46  ;;  %2635 = vmatprep.mubr.f32.mxu1 %v927_v47  ;;  %v1003_v46 = vrot.slane %v244_v34, %v11752_v19  ;;  %v1010_v47 = vrot.slane %v996_v41, %v11752_v19  ;;  %v1064_v34 = vcombine.high %v248_v27, %v248_v27  ;;  %v249_v41 = vld [vmem:[%s11720_s29 + $0x60] sm:$0xff] }
  0x5f   : > { %2532 = vmatpush1.xpose.msra.mxu0 %v309_v49  ;;  %2602 = vmatpush1.xpose.msra.mxu1 %v311_v50  ;;  %v585_v49 = vld [vmem:[%s11726_s9 + $0x8e0] sm:$0x3]  ;;  %v587_v50 = vld [vmem:[%s11726_s9 + $0x8f0] sm:$0x3] }
  0x60   : > { %2669 = vmatprep.subr.mxu0 %v570_v51  ;;  %2739 = vmatprep.subr.mxu1 %v572_v52  ;;  %v330_v51 = vld [vmem:[%s11726_s9 + $0xe8] sm:$0xff]  ;;  %v332_v52 = vld [vmem:[%s11726_s9 + $0xf8] sm:$0xff] }
  0x62   : > { %2566 = vmatmul.mubr.f32.vlgmr.msra.gmra.mxu0 %v918_v39  ;;  %2636 = vmatmul.mubr.f32.vlgmr.msra.gmra.mxu1 %v925_v40  ;;  %v994_v39 = vcombine.high %v986_v32, %v986_v32  ;;  %v995_v40 = vcombine.high %v993_v33, %v993_v33 }
  0x63   : > { %2670 = vmatpush1.xpose.msra.mxu0 %v569_v56  ;;  %2740 = vmatpush1.xpose.msra.mxu1 %v571_v57  ;;  %v329_v56 = vld [vmem:[%s11726_s9 + $0xe0] sm:$0xff]  ;;  %v331_v57 = vld [vmem:[%s11726_s9 + $0xf0] sm:$0xff] }
  0x64   : > { %2671 = vmatprep.subr.mxu0 %v314_v58  ;;  %2741 = vmatprep.subr.mxu1 %v316_v59  ;;  %v590_v58 = vld [vmem:[%s11726_s9 + $0x908] sm:$0x3]  ;;  %v592_v59 = vld [vmem:[%s11726_s9 + $0x918] sm:$0x3] }
  0x65   : > { %2705 = vmatprep.mubr.f32.mxu0 %v943_v60  ;;  %2775 = vmatprep.mubr.f32.mxu1 %v944_v61  ;;  %v1020_v60 = vrot.slane %v245_v48, %v11752_v19  ;;  %v1027_v61 = vrot.slane %v1013_v55, %v11752_v19  ;;  %v1081_v48 = vcombine.high %v249_v41, %v249_v41  ;;  %v250_v55 = vld [vmem:[%s11720_s29 + $0x68] sm:$0xff] }
  0x67   : > { %2672 = vmatpush1.xpose.msra.mxu0 %v313_v63  ;;  %2742 = vmatpush1.xpose.msra.mxu1 %v315_v0  ;;  %v589_v63 = vld [vmem:[%s11726_s9 + $0x900] sm:$0x3]  ;;  %v591_v0 = vld [vmem:[%s11726_s9 + $0x910] sm:$0x3] }
  0x68   : > { %2809 = vmatprep.subr.mxu0 %v574_v1  ;;  %2879 = vmatprep.subr.mxu1 %v576_v2  ;;  %v334_v1 = vld [vmem:[%s11726_s9 + $0x108] sm:$0xff]  ;;  %v336_v2 = vld [vmem:[%s11726_s9 + $0x118] sm:$0xff] }
  0x6a   : > { %2706 = vmatmul.mubr.f32.vlgmr.msra.gmra.mxu0 %v935_v53  ;;  %2776 = vmatmul.mubr.f32.vlgmr.msra.gmra.mxu1 %v942_v54  ;;  %v1011_v53 = vcombine.high %v1003_v46, %v1003_v46  ;;  %v1012_v54 = vcombine.high %v1010_v47, %v1010_v47 }
  0x6b   : > { %2810 = vmatpush1.xpose.msra.mxu0 %v573_v6  ;;  %2880 = vmatpush1.xpose.msra.mxu1 %v575_v7  ;;  %v333_v6 = vld [vmem:[%s11726_s9 + $0x100] sm:$0xff]  ;;  %v335_v7 = vld [vmem:[%s11726_s9 + $0x110] sm:$0xff] }
  0x6c   : > { %2811 = vmatprep.subr.mxu0 %v318_v8  ;;  %2881 = vmatprep.subr.mxu1 %v320_v9  ;;  %v594_v8 = vld [vmem:[%s11726_s9 + $0x928] sm:$0x3]  ;;  %v596_v9 = vld [vmem:[%s11726_s9 + $0x938] sm:$0x3] }
  0x6d   : > { %2845 = vmatprep.mubr.f32.mxu0 %v960_v10  ;;  %2915 = vmatprep.mubr.f32.mxu1 %v961_v11  ;;  %v1037_v10 = vrot.slane %v246_v62, %v11752_v19  ;;  %v1044_v11 = vrot.slane %v1030_v5, %v11752_v19  ;;  %v1098_v62 = vcombine.high %v250_v55, %v250_v55  ;;  %v251_v5 = vld [vmem:[%s11720_s29 + $0x70] sm:$0xff] }
  0x6f   : > { %2812 = vmatpush1.xpose.msra.mxu0 %v317_v13  ;;  %2882 = vmatpush1.xpose.msra.mxu1 %v319_v14  ;;  %v593_v13 = vld [vmem:[%s11726_s9 + $0x920] sm:$0x3]  ;;  %v595_v14 = vld [vmem:[%s11726_s9 + $0x930] sm:$0x3] }
  0x70   : > { %2949 = vmatprep.subr.mxu0 %v578_v15  ;;  %3019 = vmatprep.subr.mxu1 %v580_v16  ;;  %v338_v15 = vld [vmem:[%s11726_s9 + $0x128] sm:$0xff]  ;;  %v340_v16 = vld [vmem:[%s11726_s9 + $0x138] sm:$0xff] }
  0x72   : > { %2846 = vmatmul.mubr.f32.vlgmr.msra.gmra.mxu0 %v952_v3  ;;  %2916 = vmatmul.mubr.f32.vlgmr.msra.gmra.mxu1 %v959_v4  ;;  %v1028_v3 = vcombine.high %v1020_v60, %v1020_v60  ;;  %v1029_v4 = vcombine.high %v1027_v61, %v1027_v61 }
  0x73   : > { %2950 = vmatpush1.xpose.msra.mxu0 %v577_v21  ;;  %3020 = vmatpush1.xpose.msra.mxu1 %v579_v22  ;;  %v337_v21 = vld [vmem:[%s11726_s9 + $0x120] sm:$0xff]  ;;  %v339_v22 = vld [vmem:[%s11726_s9 + $0x130] sm:$0xff] }
  0x74   : > { %2951 = vmatprep.subr.mxu0 %v322_v23  ;;  %3021 = vmatprep.subr.mxu1 %v324_v24  ;;  %v598_v23 = vld [vmem:[%s11726_s9 + $0x948] sm:$0x3]  ;;  %v600_v24 = vld [vmem:[%s11726_s9 + $0x958] sm:$0x3] }
  0x75   : > { %2985 = vmatprep.mubr.f32.mxu0 %v977_v25  ;;  %3055 = vmatprep.mubr.f32.mxu1 %v978_v26  ;;  %v1054_v25 = vrot.slane %v247_v12, %v11752_v19  ;;  %v1061_v26 = vrot.slane %v1047_v20, %v11752_v19  ;;  %v1115_v12 = vcombine.high %v251_v5, %v251_v5  ;;  %v252_v20 = vld [vmem:[%s11720_s29 + $0x78] sm:$0xff] }
  0x77   : > { %2952 = vmatpush1.xpose.msra.mxu0 %v321_v28  ;;  %3022 = vmatpush1.xpose.msra.mxu1 %v323_v29  ;;  %v597_v28 = vld [vmem:[%s11726_s9 + $0x940] sm:$0x3]  ;;  %v599_v29 = vld [vmem:[%s11726_s9 + $0x950] sm:$0x3] }
  0x78   : > { %3089 = vmatprep.subr.mxu0 %v582_v30  ;;  %3159 = vmatprep.subr.mxu1 %v584_v31  ;;  %v342_v30 = vld [vmem:[%s11726_s9 + $0x148] sm:$0xff]  ;;  %v344_v31 = vld [vmem:[%s11726_s9 + $0x158] sm:$0xff] }
  0x7a   : > { %2986 = vmatmul.mubr.f32.vlgmr.msra.gmra.mxu0 %v969_v17  ;;  %3056 = vmatmul.mubr.f32.vlgmr.msra.gmra.mxu1 %v976_v18  ;;  %v1045_v17 = vcombine.high %v1037_v10, %v1037_v10  ;;  %v1046_v18 = vcombine.high %v1044_v11, %v1044_v11 }
  0x7b   : > { %3090 = vmatpush1.xpose.msra.mxu0 %v581_v35  ;;  %3160 = vmatpush1.xpose.msra.mxu1 %v583_v36  ;;  %v341_v35 = vld [vmem:[%s11726_s9 + $0x140] sm:$0xff]  ;;  %v343_v36 = vld [vmem:[%s11726_s9 + $0x150] sm:$0xff] }
  0x7c   : > { %3091 = vmatprep.subr.mxu0 %v326_v37  ;;  %3161 = vmatprep.subr.mxu1 %v328_v38  ;;  %v602_v37 = vld [vmem:[%s11726_s9 + $0x968] sm:$0x3]  ;;  %v604_v38 = vld [vmem:[%s11726_s9 + $0x978] sm:$0x3] }
  0x7d   : > { %3125 = vmatprep.mubr.f32.mxu0 %v994_v39  ;;  %3195 = vmatprep.mubr.f32.mxu1 %v995_v40  ;;  %v1071_v39 = vrot.slane %v248_v27, %v11752_v19  ;;  %v1078_v40 = vrot.slane %v1064_v34, %v11752_v19  ;;  %v1132_v27 = vcombine.high %v252_v20, %v252_v20  ;;  %v253_v34 = vld [vmem:[%s11720_s29 + $0x80] sm:$0xff] }
  0x7f   : > { %3092 = vmatpush1.xpose.msra.mxu0 %v325_v42  ;;  %3162 = vmatpush1.xpose.msra.mxu1 %v327_v43  ;;  %v601_v42 = vld [vmem:[%s11726_s9 + $0x960] sm:$0x3]  ;;  %v603_v43 = vld [vmem:[%s11726_s9 + $0x970] sm:$0x3] }
  0x80   : > { %3229 = vmatprep.subr.mxu0 %v586_v44  ;;  %3299 = vmatprep.subr.mxu1 %v588_v45  ;;  %v346_v44 = vld [vmem:[%s11726_s9 + $0x168] sm:$0xff]  ;;  %v348_v45 = vld [vmem:[%s11726_s9 + $0x178] sm:$0xff] }
  0x82   : > { %3126 = vmatmul.mubr.f32.vlgmr.msra.gmra.mxu0 %v986_v32  ;;  %3196 = vmatmul.mubr.f32.vlgmr.msra.gmra.mxu1 %v993_v33  ;;  %v1062_v32 = vcombine.high %v1054_v25, %v1054_v25  ;;  %v1063_v33 = vcombine.high %v1061_v26, %v1061_v26 }
  0x83   : > { %3230 = vmatpush1.xpose.msra.mxu0 %v585_v49  ;;  %3300 = vmatpush1.xpose.msra.mxu1 %v587_v50  ;;  %v345_v49 = vld [vmem:[%s11726_s9 + $0x160] sm:$0xff]  ;;  %v347_v50 = vld [vmem:[%s11726_s9 + $0x170] sm:$0xff] }
  0x84   : > { %3231 = vmatprep.subr.mxu0 %v330_v51  ;;  %3301 = vmatprep.subr.mxu1 %v332_v52  ;;  %v606_v51 = vld [vmem:[%s11726_s9 + $0x988] sm:$0x3]  ;;  %v608_v52 = vld [vmem:[%s11726_s9 + $0x998] sm:$0x3] }
  0x85   : > { %3265 = vmatprep.mubr.f32.mxu0 %v1011_v53  ;;  %3335 = vmatprep.mubr.f32.mxu1 %v1012_v54  ;;  %v1088_v53 = vrot.slane %v249_v41, %v11752_v19  ;;  %v1095_v54 = vrot.slane %v1081_v48, %v11752_v19  ;;  %v1149_v41 = vcombine.high %v253_v34, %v253_v34  ;;  %v254_v48 = vld [vmem:[%s11720_s29 + $0x88] sm:$0xff] }
  0x87   : > { %3232 = vmatpush1.xpose.msra.mxu0 %v329_v56  ;;  %3302 = vmatpush1.xpose.msra.mxu1 %v331_v57  ;;  %v605_v56 = vld [vmem:[%s11726_s9 + $0x980] sm:$0x3]  ;;  %v607_v57 = vld [vmem:[%s11726_s9 + $0x990] sm:$0x3] }
  0x88   : > { %3369 = vmatprep.subr.mxu0 %v590_v58  ;;  %3439 = vmatprep.subr.mxu1 %v592_v59  ;;  %v350_v58 = vld [vmem:[%s11726_s9 + $0x188] sm:$0xff]  ;;  %v352_v59 = vld [vmem:[%s11726_s9 + $0x198] sm:$0xff] }
  0x8a   : > { %3266 = vmatmul.mubr.f32.vlgmr.msra.gmra.mxu0 %v1003_v46  ;;  %3336 = vmatmul.mubr.f32.vlgmr.msra.gmra.mxu1 %v1010_v47  ;;  %v1079_v46 = vcombine.high %v1071_v39, %v1071_v39  ;;  %v1080_v47 = vcombine.high %v1078_v40, %v1078_v40 }
  0x8b   : > { %3370 = vmatpush1.xpose.msra.mxu0 %v589_v63  ;;  %3440 = vmatpush1.xpose.msra.mxu1 %v591_v0  ;;  %v349_v63 = vld [vmem:[%s11726_s9 + $0x180] sm:$0xff]  ;;  %v351_v0 = vld [vmem:[%s11726_s9 + $0x190] sm:$0xff] }
  0x8c   : > { %3371 = vmatprep.subr.mxu0 %v334_v1  ;;  %3441 = vmatprep.subr.mxu1 %v336_v2  ;;  %v610_v1 = vld [vmem:[%s11726_s9 + $0x9a8] sm:$0x3]  ;;  %v612_v2 = vld [vmem:[%s11726_s9 + $0x9b8] sm:$0x3] }
  0x8d   : > { %3405 = vmatprep.mubr.f32.mxu0 %v1028_v3  ;;  %3475 = vmatprep.mubr.f32.mxu1 %v1029_v4  ;;  %v1105_v3 = vrot.slane %v250_v55, %v11752_v19  ;;  %v1112_v4 = vrot.slane %v1098_v62, %v11752_v19  ;;  %v1166_v55 = vcombine.high %v254_v48, %v254_v48  ;;  %v255_v62 = vld [vmem:[%s11720_s29 + $0x90] sm:$0xff] }
  0x8f   : > { %3372 = vmatpush1.xpose.msra.mxu0 %v333_v6  ;;  %3442 = vmatpush1.xpose.msra.mxu1 %v335_v7  ;;  %v609_v6 = vld [vmem:[%s11726_s9 + $0x9a0] sm:$0x3]  ;;  %v611_v7 = vld [vmem:[%s11726_s9 + $0x9b0] sm:$0x3] }
  0x90   : > { %3509 = vmatprep.subr.mxu0 %v594_v8  ;;  %3579 = vmatprep.subr.mxu1 %v596_v9  ;;  %v354_v8 = vld [vmem:[%s11726_s9 + $0x1a8] sm:$0xff]  ;;  %v356_v9 = vld [vmem:[%s11726_s9 + $0x1b8] sm:$0xff] }
  0x92   : > { %3406 = vmatmul.mubr.f32.vlgmr.msra.gmra.mxu0 %v1020_v60  ;;  %3476 = vmatmul.mubr.f32.vlgmr.msra.gmra.mxu1 %v1027_v61  ;;  %v1096_v60 = vcombine.high %v1088_v53, %v1088_v53  ;;  %v1097_v61 = vcombine.high %v1095_v54, %v1095_v54 }
  0x93   : > { %3510 = vmatpush1.xpose.msra.mxu0 %v593_v13  ;;  %3580 = vmatpush1.xpose.msra.mxu1 %v595_v14  ;;  %v353_v13 = vld [vmem:[%s11726_s9 + $0x1a0] sm:$0xff]  ;;  %v355_v14 = vld [vmem:[%s11726_s9 + $0x1b0] sm:$0xff] }
  0x94   : > { %3511 = vmatprep.subr.mxu0 %v338_v15  ;;  %3581 = vmatprep.subr.mxu1 %v340_v16  ;;  %v614_v15 = vld [vmem:[%s11726_s9 + $0x9c8] sm:$0x3]  ;;  %v616_v16 = vld [vmem:[%s11726_s9 + $0x9d8] sm:$0x3] }
  0x95   : > { %3545 = vmatprep.mubr.f32.mxu0 %v1045_v17  ;;  %3615 = vmatprep.mubr.f32.mxu1 %v1046_v18  ;;  %v1122_v17 = vrot.slane %v251_v5, %v11752_v19  ;;  %v1129_v18 = vrot.slane %v1115_v12, %v11752_v19  ;;  %v1183_v5 = vcombine.high %v255_v62, %v255_v62  ;;  %v256_v12 = vld [vmem:[%s11720_s29 + $0x98] sm:$0xff] }
  0x97   : > { %3512 = vmatpush1.xpose.msra.mxu0 %v337_v21  ;;  %3582 = vmatpush1.xpose.msra.mxu1 %v339_v22  ;;  %v613_v21 = vld [vmem:[%s11726_s9 + $0x9c0] sm:$0x3]  ;;  %v615_v22 = vld [vmem:[%s11726_s9 + $0x9d0] sm:$0x3] }
  0x98   : > { %3649 = vmatprep.subr.mxu0 %v598_v23  ;;  %3719 = vmatprep.subr.mxu1 %v600_v24  ;;  %v358_v23 = vld [vmem:[%s11726_s9 + $0x1c8] sm:$0xff]  ;;  %v360_v24 = vld [vmem:[%s11726_s9 + $0x1d8] sm:$0xff] }
  0x9a   : > { %3546 = vmatmul.mubr.f32.vlgmr.msra.gmra.mxu0 %v1037_v10  ;;  %3616 = vmatmul.mubr.f32.vlgmr.msra.gmra.mxu1 %v1044_v11  ;;  %v1113_v10 = vcombine.high %v1105_v3, %v1105_v3  ;;  %v1114_v11 = vcombine.high %v1112_v4, %v1112_v4 }
  0x9b   : > { %3650 = vmatpush1.xpose.msra.mxu0 %v597_v28  ;;  %3720 = vmatpush1.xpose.msra.mxu1 %v599_v29  ;;  %v357_v28 = vld [vmem:[%s11726_s9 + $0x1c0] sm:$0xff]  ;;  %v359_v29 = vld [vmem:[%s11726_s9 + $0x1d0] sm:$0xff] }
  0x9c   : > { %3651 = vmatprep.subr.mxu0 %v342_v30  ;;  %3721 = vmatprep.subr.mxu1 %v344_v31  ;;  %v618_v30 = vld [vmem:[%s11726_s9 + $0x9e8] sm:$0x3]  ;;  %v620_v31 = vld [vmem:[%s11726_s9 + $0x9f8] sm:$0x3] }
  0x9d   : > { %3685 = vmatprep.mubr.f32.mxu0 %v1062_v32  ;;  %3755 = vmatprep.mubr.f32.mxu1 %v1063_v33  ;;  %v1139_v32 = vrot.slane %v252_v20, %v11752_v19  ;;  %v1146_v33 = vrot.slane %v1132_v27, %v11752_v19  ;;  %v1200_v20 = vcombine.high %v256_v12, %v256_v12  ;;  %v257_v27 = vld [vmem:[%s11720_s29 + $0xa0] sm:$0xff] }
  0x9f   : > { %3652 = vmatpush1.xpose.msra.mxu0 %v341_v35  ;;  %3722 = vmatpush1.xpose.msra.mxu1 %v343_v36  ;;  %v617_v35 = vld [vmem:[%s11726_s9 + $0x9e0] sm:$0x3]  ;;  %v619_v36 = vld [vmem:[%s11726_s9 + $0x9f0] sm:$0x3] }
  0xa0   : > { %3789 = vmatprep.subr.mxu0 %v602_v37  ;;  %3859 = vmatprep.subr.mxu1 %v604_v38  ;;  %v362_v37 = vld [vmem:[%s11726_s9 + $0x1e8] sm:$0xff]  ;;  %v364_v38 = vld [vmem:[%s11726_s9 + $0x1f8] sm:$0xff] }
  0xa2   : > { %3686 = vmatmul.mubr.f32.vlgmr.msra.gmra.mxu0 %v1054_v25  ;;  %3756 = vmatmul.mubr.f32.vlgmr.msra.gmra.mxu1 %v1061_v26  ;;  %v1130_v25 = vcombine.high %v1122_v17, %v1122_v17  ;;  %v1131_v26 = vcombine.high %v1129_v18, %v1129_v18 }
  0xa3   : > { %3790 = vmatpush1.xpose.msra.mxu0 %v601_v42  ;;  %3860 = vmatpush1.xpose.msra.mxu1 %v603_v43  ;;  %v361_v42 = vld [vmem:[%s11726_s9 + $0x1e0] sm:$0xff]  ;;  %v363_v43 = vld [vmem:[%s11726_s9 + $0x1f0] sm:$0xff] }
  0xa4   : > { %3791 = vmatprep.subr.mxu0 %v346_v44  ;;  %3861 = vmatprep.subr.mxu1 %v348_v45  ;;  %v622_v44 = vld [vmem:[%s11726_s9 + $0xa08] sm:$0x3]  ;;  %v624_v45 = vld [vmem:[%s11726_s9 + $0xa18] sm:$0x3] }
  0xa5   : > { %3825 = vmatprep.mubr.f32.mxu0 %v1079_v46  ;;  %3895 = vmatprep.mubr.f32.mxu1 %v1080_v47  ;;  %v1156_v46 = vrot.slane %v253_v34, %v11752_v19  ;;  %v1163_v47 = vrot.slane %v1149_v41, %v11752_v19  ;;  %v1217_v34 = vcombine.high %v257_v27, %v257_v27  ;;  %v258_v41 = vld [vmem:[%s11720_s29 + $0xa8] sm:$0xff] }
  0xa7   : > { %3792 = vmatpush1.xpose.msra.mxu0 %v345_v49  ;;  %3862 = vmatpush1.xpose.msra.mxu1 %v347_v50  ;;  %v621_v49 = vld [vmem:[%s11726_s9 + $0xa00] sm:$0x3]  ;;  %v623_v50 = vld [vmem:[%s11726_s9 + $0xa10] sm:$0x3] }
  0xa8   : > { %3929 = vmatprep.subr.mxu0 %v606_v51  ;;  %3999 = vmatprep.subr.mxu1 %v608_v52  ;;  %v366_v51 = vld [vmem:[%s11726_s9 + $0x208] sm:$0xff]  ;;  %v368_v52 = vld [vmem:[%s11726_s9 + $0x218] sm:$0xff] }
  0xaa   : > { %3826 = vmatmul.mubr.f32.vlgmr.msra.gmra.mxu0 %v1071_v39  ;;  %3896 = vmatmul.mubr.f32.vlgmr.msra.gmra.mxu1 %v1078_v40  ;;  %v1147_v39 = vcombine.high %v1139_v32, %v1139_v32  ;;  %v1148_v40 = vcombine.high %v1146_v33, %v1146_v33 }
  0xab   : > { %3930 = vmatpush1.xpose.msra.mxu0 %v605_v56  ;;  %4000 = vmatpush1.xpose.msra.mxu1 %v607_v57  ;;  %v365_v56 = vld [vmem:[%s11726_s9 + $0x200] sm:$0xff]  ;;  %v367_v57 = vld [vmem:[%s11726_s9 + $0x210] sm:$0xff] }
  0xac   : > { %3931 = vmatprep.subr.mxu0 %v350_v58  ;;  %4001 = vmatprep.subr.mxu1 %v352_v59  ;;  %v626_v58 = vld [vmem:[%s11726_s9 + $0xa28] sm:$0x3]  ;;  %v628_v59 = vld [vmem:[%s11726_s9 + $0xa38] sm:$0x3] }
  0xad   : > { %3965 = vmatprep.mubr.f32.mxu0 %v1096_v60  ;;  %4035 = vmatprep.mubr.f32.mxu1 %v1097_v61  ;;  %v1173_v60 = vrot.slane %v254_v48, %v11752_v19  ;;  %v1180_v61 = vrot.slane %v1166_v55, %v11752_v19  ;;  %v1234_v48 = vcombine.high %v258_v41, %v258_v41  ;;  %v259_v55 = vld [vmem:[%s11720_s29 + $0xb0] sm:$0xff] }
  0xaf   : > { %3932 = vmatpush1.xpose.msra.mxu0 %v349_v63  ;;  %4002 = vmatpush1.xpose.msra.mxu1 %v351_v0  ;;  %v625_v63 = vld [vmem:[%s11726_s9 + $0xa20] sm:$0x3]  ;;  %v627_v0 = vld [vmem:[%s11726_s9 + $0xa30] sm:$0x3] }
  0xb0   : > { %4069 = vmatprep.subr.mxu0 %v610_v1  ;;  %4139 = vmatprep.subr.mxu1 %v612_v2  ;;  %v370_v1 = vld [vmem:[%s11726_s9 + $0x228] sm:$0xff]  ;;  %v372_v2 = vld [vmem:[%s11726_s9 + $0x238] sm:$0xff] }
  0xb2   : > { %3966 = vmatmul.mubr.f32.vlgmr.msra.gmra.mxu0 %v1088_v53  ;;  %4036 = vmatmul.mubr.f32.vlgmr.msra.gmra.mxu1 %v1095_v54  ;;  %v1164_v53 = vcombine.high %v1156_v46, %v1156_v46  ;;  %v1165_v54 = vcombine.high %v1163_v47, %v1163_v47 }
  0xb3   : > { %4070 = vmatpush1.xpose.msra.mxu0 %v609_v6  ;;  %4140 = vmatpush1.xpose.msra.mxu1 %v611_v7  ;;  %v369_v6 = vld [vmem:[%s11726_s9 + $0x220] sm:$0xff]  ;;  %v371_v7 = vld [vmem:[%s11726_s9 + $0x230] sm:$0xff] }
  0xb4   : > { %4071 = vmatprep.subr.mxu0 %v354_v8  ;;  %4141 = vmatprep.subr.mxu1 %v356_v9  ;;  %v630_v8 = vld [vmem:[%s11726_s9 + $0xa48] sm:$0x3]  ;;  %v632_v9 = vld [vmem:[%s11726_s9 + $0xa58] sm:$0x3] }
  0xb5   : > { %4105 = vmatprep.mubr.f32.mxu0 %v1113_v10  ;;  %4175 = vmatprep.mubr.f32.mxu1 %v1114_v11  ;;  %v1190_v10 = vrot.slane %v255_v62, %v11752_v19  ;;  %v1197_v11 = vrot.slane %v1183_v5, %v11752_v19  ;;  %v1251_v62 = vcombine.high %v259_v55, %v259_v55  ;;  %v260_v5 = vld [vmem:[%s11720_s29 + $0xb8] sm:$0xff] }
  0xb7   : > { %4072 = vmatpush1.xpose.msra.mxu0 %v353_v13  ;;  %4142 = vmatpush1.xpose.msra.mxu1 %v355_v14  ;;  %v629_v13 = vld [vmem:[%s11726_s9 + $0xa40] sm:$0x3]  ;;  %v631_v14 = vld [vmem:[%s11726_s9 + $0xa50] sm:$0x3] }
  0xb8   : > { %4209 = vmatprep.subr.mxu0 %v614_v15  ;;  %4279 = vmatprep.subr.mxu1 %v616_v16  ;;  %v374_v15 = vld [vmem:[%s11726_s9 + $0x248] sm:$0xff]  ;;  %v376_v16 = vld [vmem:[%s11726_s9 + $0x258] sm:$0xff] }
  0xba   : > { %4106 = vmatmul.mubr.f32.vlgmr.msra.gmra.mxu0 %v1105_v3  ;;  %4176 = vmatmul.mubr.f32.vlgmr.msra.gmra.mxu1 %v1112_v4  ;;  %v1181_v3 = vcombine.high %v1173_v60, %v1173_v60  ;;  %v1182_v4 = vcombine.high %v1180_v61, %v1180_v61 }
  0xbb   : > { %4210 = vmatpush1.xpose.msra.mxu0 %v613_v21  ;;  %4280 = vmatpush1.xpose.msra.mxu1 %v615_v22  ;;  %v373_v21 = vld [vmem:[%s11726_s9 + $0x240] sm:$0xff]  ;;  %v375_v22 = vld [vmem:[%s11726_s9 + $0x250] sm:$0xff] }
  0xbc   : > { %4211 = vmatprep.subr.mxu0 %v358_v23  ;;  %4281 = vmatprep.subr.mxu1 %v360_v24  ;;  %v634_v23 = vld [vmem:[%s11726_s9 + $0xa68] sm:$0x3]  ;;  %v636_v24 = vld [vmem:[%s11726_s9 + $0xa78] sm:$0x3] }
  0xbd   : > { %4245 = vmatprep.mubr.f32.mxu0 %v1130_v25  ;;  %4315 = vmatprep.mubr.f32.mxu1 %v1131_v26  ;;  %v1207_v25 = vrot.slane %v256_v12, %v11752_v19  ;;  %v1214_v26 = vrot.slane %v1200_v20, %v11752_v19  ;;  %v1268_v12 = vcombine.high %v260_v5, %v260_v5  ;;  %v261_v20 = vld [vmem:[%s11720_s29 + $0xc0] sm:$0xff] }
  0xbf   : > { %4212 = vmatpush1.xpose.msra.mxu0 %v357_v28  ;;  %4282 = vmatpush1.xpose.msra.mxu1 %v359_v29  ;;  %v633_v28 = vld [vmem:[%s11726_s9 + $0xa60] sm:$0x3]  ;;  %v635_v29 = vld [vmem:[%s11726_s9 + $0xa70] sm:$0x3] }
  0xc0   : > { %4349 = vmatprep.subr.mxu0 %v618_v30  ;;  %4419 = vmatprep.subr.mxu1 %v620_v31  ;;  %v378_v30 = vld [vmem:[%s11726_s9 + $0x268] sm:$0xff]  ;;  %v380_v31 = vld [vmem:[%s11726_s9 + $0x278] sm:$0xff] }
  0xc2   : > { %4246 = vmatmul.mubr.f32.vlgmr.msra.gmra.mxu0 %v1122_v17  ;;  %4316 = vmatmul.mubr.f32.vlgmr.msra.gmra.mxu1 %v1129_v18  ;;  %v1198_v17 = vcombine.high %v1190_v10, %v1190_v10  ;;  %v1199_v18 = vcombine.high %v1197_v11, %v1197_v11 }
  0xc3   : > { %4350 = vmatpush1.xpose.msra.mxu0 %v617_v35  ;;  %4420 = vmatpush1.xpose.msra.mxu1 %v619_v36  ;;  %v377_v35 = vld [vmem:[%s11726_s9 + $0x260] sm:$0xff]  ;;  %v379_v36 = vld [vmem:[%s11726_s9 + $0x270] sm:$0xff] }
  0xc4   : > { %4351 = vmatprep.subr.mxu0 %v362_v37  ;;  %4421 = vmatprep.subr.mxu1 %v364_v38  ;;  %v638_v37 = vld [vmem:[%s11726_s9 + $0xa88] sm:$0x3]  ;;  %v640_v38 = vld [vmem:[%s11726_s9 + $0xa98] sm:$0x3] }
  0xc5   : > { %4385 = vmatprep.mubr.f32.mxu0 %v1147_v39  ;;  %4455 = vmatprep.mubr.f32.mxu1 %v1148_v40  ;;  %v1224_v39 = vrot.slane %v257_v27, %v11752_v19  ;;  %v1231_v40 = vrot.slane %v1217_v34, %v11752_v19  ;;  %v1285_v27 = vcombine.high %v261_v20, %v261_v20  ;;  %v262_v34 = vld [vmem:[%s11720_s29 + $0xc8] sm:$0xff] }
  0xc7   : > { %4352 = vmatpush1.xpose.msra.mxu0 %v361_v42  ;;  %4422 = vmatpush1.xpose.msra.mxu1 %v363_v43  ;;  %v637_v42 = vld [vmem:[%s11726_s9 + $0xa80] sm:$0x3]  ;;  %v639_v43 = vld [vmem:[%s11726_s9 + $0xa90] sm:$0x3] }
  0xc8   : > { %4489 = vmatprep.subr.mxu0 %v622_v44  ;;  %4559 = vmatprep.subr.mxu1 %v624_v45  ;;  %v382_v44 = vld [vmem:[%s11726_s9 + $0x288] sm:$0xff]  ;;  %v384_v45 = vld [vmem:[%s11726_s9 + $0x298] sm:$0xff] }
  0xca   : > { %4386 = vmatmul.mubr.f32.vlgmr.msra.gmra.mxu0 %v1139_v32  ;;  %4456 = vmatmul.mubr.f32.vlgmr.msra.gmra.mxu1 %v1146_v33  ;;  %v1215_v32 = vcombine.high %v1207_v25, %v1207_v25  ;;  %v1216_v33 = vcombine.high %v1214_v26, %v1214_v26 }
  0xcb   : > { %4490 = vmatpush1.xpose.msra.mxu0 %v621_v49  ;;  %4560 = vmatpush1.xpose.msra.mxu1 %v623_v50  ;;  %v381_v49 = vld [vmem:[%s11726_s9 + $0x280] sm:$0xff]  ;;  %v383_v50 = vld [vmem:[%s11726_s9 + $0x290] sm:$0xff] }
  0xcc   : > { %4491 = vmatprep.subr.mxu0 %v366_v51  ;;  %4561 = vmatprep.subr.mxu1 %v368_v52  ;;  %v642_v51 = vld [vmem:[%s11726_s9 + $0xaa8] sm:$0x3]  ;;  %v644_v52 = vld [vmem:[%s11726_s9 + $0xab8] sm:$0x3] }
  0xcd   : > { %4525 = vmatprep.mubr.f32.mxu0 %v1164_v53  ;;  %4595 = vmatprep.mubr.f32.mxu1 %v1165_v54  ;;  %v1241_v53 = vrot.slane %v258_v41, %v11752_v19  ;;  %v1248_v54 = vrot.slane %v1234_v48, %v11752_v19  ;;  %v1302_v41 = vcombine.high %v262_v34, %v262_v34  ;;  %v263_v48 = vld [vmem:[%s11720_s29 + $0xd0] sm:$0xff] }
  0xcf   : > { %4492 = vmatpush1.xpose.msra.mxu0 %v365_v56  ;;  %4562 = vmatpush1.xpose.msra.mxu1 %v367_v57  ;;  %v641_v56 = vld [vmem:[%s11726_s9 + $0xaa0] sm:$0x3]  ;;  %v643_v57 = vld [vmem:[%s11726_s9 + $0xab0] sm:$0x3] }
  0xd0   : > { %4629 = vmatprep.subr.mxu0 %v626_v58  ;;  %4699 = vmatprep.subr.mxu1 %v628_v59  ;;  %v386_v58 = vld [vmem:[%s11726_s9 + $0x2a8] sm:$0xff]  ;;  %v388_v59 = vld [vmem:[%s11726_s9 + $0x2b8] sm:$0xff] }
  0xd2   : > { %4526 = vmatmul.mubr.f32.vlgmr.msra.gmra.mxu0 %v1156_v46  ;;  %4596 = vmatmul.mubr.f32.vlgmr.msra.gmra.mxu1 %v1163_v47  ;;  %v1232_v46 = vcombine.high %v1224_v39, %v1224_v39  ;;  %v1233_v47 = vcombine.high %v1231_v40, %v1231_v40 }
  0xd3   : > { %4630 = vmatpush1.xpose.msra.mxu0 %v625_v63  ;;  %4700 = vmatpush1.xpose.msra.mxu1 %v627_v0  ;;  %v385_v63 = vld [vmem:[%s11726_s9 + $0x2a0] sm:$0xff]  ;;  %v387_v0 = vld [vmem:[%s11726_s9 + $0x2b0] sm:$0xff] }
  0xd4   : > { %4631 = vmatprep.subr.mxu0 %v370_v1  ;;  %4701 = vmatprep.subr.mxu1 %v372_v2  ;;  %v646_v1 = vld [vmem:[%s11726_s9 + $0xac8] sm:$0x3]  ;;  %v648_v2 = vld [vmem:[%s11726_s9 + $0xad8] sm:$0x3] }
  0xd5   : > { %4665 = vmatprep.mubr.f32.mxu0 %v1181_v3  ;;  %4735 = vmatprep.mubr.f32.mxu1 %v1182_v4  ;;  %v1258_v3 = vrot.slane %v259_v55, %v11752_v19  ;;  %v1265_v4 = vrot.slane %v1251_v62, %v11752_v19  ;;  %v1319_v55 = vcombine.high %v263_v48, %v263_v48  ;;  %v403_v62 = vld [vmem:[%s11726_s9 + $0x330] sm:$0xff] }
  0xd7   : > { %4632 = vmatpush1.xpose.msra.mxu0 %v369_v6  ;;  %4702 = vmatpush1.xpose.msra.mxu1 %v371_v7  ;;  %v645_v6 = vld [vmem:[%s11726_s9 + $0xac0] sm:$0x3]  ;;  %v647_v7 = vld [vmem:[%s11726_s9 + $0xad0] sm:$0x3] }
  0xd8   : > { %4769 = vmatprep.subr.mxu0 %v630_v8  ;;  %4839 = vmatprep.subr.mxu1 %v632_v9  ;;  %v390_v8 = vld [vmem:[%s11726_s9 + $0x2c8] sm:$0xff]  ;;  %v392_v9 = vld [vmem:[%s11726_s9 + $0x2d8] sm:$0xff] }
  0xda   : > { %4666 = vmatmul.mubr.f32.vlgmr.msra.gmra.mxu0 %v1173_v60  ;;  %4736 = vmatmul.mubr.f32.vlgmr.msra.gmra.mxu1 %v1180_v61  ;;  %v1249_v60 = vcombine.high %v1241_v53, %v1241_v53  ;;  %v1250_v61 = vcombine.high %v1248_v54, %v1248_v54 }
  0xdb   : > { %4770 = vmatpush1.xpose.msra.mxu0 %v629_v13  ;;  %4840 = vmatpush1.xpose.msra.mxu1 %v631_v14  ;;  %v389_v13 = vld [vmem:[%s11726_s9 + $0x2c0] sm:$0xff]  ;;  %v391_v14 = vld [vmem:[%s11726_s9 + $0x2d0] sm:$0xff] }
  0xdc   : > { %4771 = vmatprep.subr.mxu0 %v374_v15  ;;  %4841 = vmatprep.subr.mxu1 %v376_v16  ;;  %v650_v15 = vld [vmem:[%s11726_s9 + $0xae8] sm:$0x3]  ;;  %v652_v16 = vld [vmem:[%s11726_s9 + $0xaf8] sm:$0x3] }
  0xdd   : > { %4805 = vmatprep.mubr.f32.mxu0 %v1198_v17  ;;  %4875 = vmatprep.mubr.f32.mxu1 %v1199_v18  ;;  %v1275_v17 = vrot.slane %v260_v5, %v11752_v19  ;;  %v1282_v18 = vrot.slane %v1268_v12, %v11752_v19  ;;  %v663_v5 = vld [vmem:[%s11726_s9 + $0xb50] sm:$0x3] }
  0xdf   : > { %4772 = vmatpush1.xpose.msra.mxu0 %v373_v21  ;;  %4842 = vmatpush1.xpose.msra.mxu1 %v375_v22  ;;  %v649_v21 = vld [vmem:[%s11726_s9 + $0xae0] sm:$0x3]  ;;  %v651_v22 = vld [vmem:[%s11726_s9 + $0xaf0] sm:$0x3] }
  0xe0   : > { %4909 = vmatprep.subr.mxu0 %v634_v23  ;;  %4979 = vmatprep.subr.mxu1 %v636_v24  ;;  %v394_v23 = vld [vmem:[%s11726_s9 + $0x2e8] sm:$0xff]  ;;  %v396_v24 = vld [vmem:[%s11726_s9 + $0x2f8] sm:$0xff] }
  0xe2   : > { %4806 = vmatmul.mubr.f32.vlgmr.msra.gmra.mxu0 %v1190_v10  ;;  %4876 = vmatmul.mubr.f32.vlgmr.msra.gmra.mxu1 %v1197_v11  ;;  %v1266_v10 = vcombine.high %v1258_v3, %v1258_v3  ;;  %v1267_v11 = vcombine.high %v1265_v4, %v1265_v4 }
  0xe3   : > { %4910 = vmatpush1.xpose.msra.mxu0 %v633_v28  ;;  %4980 = vmatpush1.xpose.msra.mxu1 %v635_v29  ;;  %v393_v28 = vld [vmem:[%s11726_s9 + $0x2e0] sm:$0xff]  ;;  %v395_v29 = vld [vmem:[%s11726_s9 + $0x2f0] sm:$0xff] }
  0xe4   : > { %4911 = vmatprep.subr.mxu0 %v378_v30  ;;  %4981 = vmatprep.subr.mxu1 %v380_v31  ;;  %v654_v30 = vld [vmem:[%s11726_s9 + $0xb08] sm:$0x3]  ;;  %v656_v31 = vld [vmem:[%s11726_s9 + $0xb18] sm:$0x3] }
  0xe5   : > { %4945 = vmatprep.mubr.f32.mxu0 %v1215_v32  ;;  %5015 = vmatprep.mubr.f32.mxu1 %v1216_v33  ;;  %v1292_v32 = vrot.slane %v261_v20, %v11752_v19  ;;  %v1299_v33 = vrot.slane %v1285_v27, %v11752_v19  ;;  %v666_v20 = vld [vmem:[%s11726_s9 + $0xb68] sm:$0x3] }
  0xe6   : > { %v410_v27 = vld [vmem:[%s11726_s9 + $0x368] sm:$0xff] }
  0xe7   : > { %4912 = vmatpush1.xpose.msra.mxu0 %v377_v35  ;;  %4982 = vmatpush1.xpose.msra.mxu1 %v379_v36  ;;  %v653_v35 = vld [vmem:[%s11726_s9 + $0xb00] sm:$0x3]  ;;  %v655_v36 = vld [vmem:[%s11726_s9 + $0xb10] sm:$0x3] }
  0xe8   : > { %5049 = vmatprep.subr.mxu0 %v638_v37  ;;  %5119 = vmatprep.subr.mxu1 %v640_v38  ;;  %v398_v37 = vld [vmem:[%s11726_s9 + $0x308] sm:$0xff]  ;;  %v400_v38 = vld [vmem:[%s11726_s9 + $0x318] sm:$0xff] }
  0xea   : > { %4946 = vmatmul.mubr.f32.vlgmr.msra.gmra.mxu0 %v1207_v25  ;;  %5016 = vmatmul.mubr.f32.vlgmr.msra.gmra.mxu1 %v1214_v26  ;;  %v1283_v25 = vcombine.high %v1275_v17, %v1275_v17  ;;  %v1284_v26 = vcombine.high %v1282_v18, %v1282_v18 }
  0xeb   : > { %5050 = vmatpush1.xpose.msra.mxu0 %v637_v42  ;;  %5120 = vmatpush1.xpose.msra.mxu1 %v639_v43  ;;  %v397_v42 = vld [vmem:[%s11726_s9 + $0x300] sm:$0xff]  ;;  %v399_v43 = vld [vmem:[%s11726_s9 + $0x310] sm:$0xff] }
  0xec   : > { %5051 = vmatprep.subr.mxu0 %v382_v44  ;;  %5121 = vmatprep.subr.mxu1 %v384_v45  ;;  %v658_v44 = vld [vmem:[%s11726_s9 + $0xb28] sm:$0x3]  ;;  %v660_v45 = vld [vmem:[%s11726_s9 + $0xb38] sm:$0x3] }
  0xed   : > { %5085 = vmatprep.mubr.f32.mxu0 %v1232_v46  ;;  %5155 = vmatprep.mubr.f32.mxu1 %v1233_v47  ;;  %v1309_v46 = vrot.slane %v262_v34, %v11752_v19  ;;  %v1316_v47 = vrot.slane %v1302_v41, %v11752_v19  ;;  %v672_v41 = vld [vmem:[%s11726_s9 + $0xb98] sm:$0x3] }
  0xef   : > { %5052 = vmatpush1.xpose.msra.mxu0 %v381_v49  ;;  %5122 = vmatpush1.xpose.msra.mxu1 %v383_v50  ;;  %v657_v49 = vld [vmem:[%s11726_s9 + $0xb20] sm:$0x3]  ;;  %v659_v50 = vld [vmem:[%s11726_s9 + $0xb30] sm:$0x3] }
  0xf0   : > { %5189 = vmatprep.subr.mxu0 %v642_v51  ;;  %5259 = vmatprep.subr.mxu1 %v644_v52  ;;  %v402_v51 = vld [vmem:[%s11726_s9 + $0x328] sm:$0xff]  ;;  %v404_v52 = vld [vmem:[%s11726_s9 + $0x338] sm:$0xff] }
  0xf2   : > { %5086 = vmatmul.mubr.f32.vlgmr.msra.gmra.mxu0 %v1224_v39  ;;  %5156 = vmatmul.mubr.f32.vlgmr.msra.gmra.mxu1 %v1231_v40  ;;  %v1300_v39 = vcombine.high %v1292_v32, %v1292_v32  ;;  %v1301_v40 = vcombine.high %v1299_v33, %v1299_v33 }
  0xf3   : > { %5190 = vmatpush1.xpose.msra.mxu0 %v641_v56  ;;  %5260 = vmatpush1.xpose.msra.mxu1 %v643_v57 }
  0xf4   : > { %5191 = vmatprep.subr.mxu0 %v386_v58  ;;  %5261 = vmatprep.subr.mxu1 %v388_v59 }
  0xf5   : > { %5225 = vmatprep.mubr.f32.mxu0 %v1249_v60  ;;  %5295 = vmatprep.mubr.f32.mxu1 %v1250_v61  ;;  %v401_v61 = vld [vmem:[%s11726_s9 + $0x320] sm:$0xff] }
  0xf7   : > { %5192 = vmatpush1.xpose.msra.mxu0 %v385_v63  ;;  %5262 = vmatpush1.xpose.msra.mxu1 %v387_v0  ;;  %v662_v63 = vld [vmem:[%s11726_s9 + $0xb48] sm:$0x3]  ;;  %v664_v0 = vld [vmem:[%s11726_s9 + $0xb58] sm:$0x3] }
  0xf8   : > { %5329 = vmatprep.subr.mxu0 %v646_v1  ;;  %5399 = vmatprep.subr.mxu1 %v648_v2  ;;  %v1326_v1 = vrot.slane %v263_v48, %v11752_v19  ;;  %v1333_v2 = vrot.slane %v1319_v55, %v11752_v19  ;;  %v416_v48 = vld [vmem:[%s11726_s9 + $0x398] sm:$0xff] }
  0xfa   : > { %5226 = vmatmul.mubr.f32.vlgmr.msra.gmra.mxu0 %v1241_v53  ;;  %5296 = vmatmul.mubr.f32.vlgmr.msra.gmra.mxu1 %v1248_v54  ;;  %v1317_v53 = vcombine.high %v1309_v46, %v1309_v46  ;;  %v1318_v54 = vcombine.high %v1316_v47, %v1316_v47 }
  0xfb   : > { %5330 = vmatpush1.xpose.msra.mxu0 %v645_v6  ;;  %5400 = vmatpush1.xpose.msra.mxu1 %v647_v7  ;;  %v406_v6 = vld [vmem:[%s11726_s9 + $0x348] sm:$0xff]  ;;  %v408_v7 = vld [vmem:[%s11726_s9 + $0x358] sm:$0xff] }
  0xfc   : > { %5331 = vmatprep.subr.mxu0 %v390_v8  ;;  %5401 = vmatprep.subr.mxu1 %v392_v9  ;;  %v1334_v8 = vcombine.high %v1326_v1, %v1326_v1  ;;  %v1335_v9 = vcombine.high %v1333_v2, %v1333_v2 }
  0xfd   : > { %5365 = vmatprep.mubr.f32.mxu0 %v1266_v10  ;;  %5435 = vmatprep.mubr.f32.mxu1 %v1267_v11 }
  0xff   : > { %5332 = vmatpush1.xpose.msra.mxu0 %v389_v13  ;;  %5402 = vmatpush1.xpose.msra.mxu1 %v391_v14 }
 0x100   : > { %5469 = vmatprep.subr.mxu0 %v650_v15  ;;  %5539 = vmatprep.subr.mxu1 %v652_v16  ;;  %v405_v16 = vld [vmem:[%s11726_s9 + $0x340] sm:$0xff] }
 0x102   : > { %5366 = vmatmul.mubr.f32.vlgmr.msra.gmra.mxu0 %v1258_v3  ;;  %5436 = vmatmul.mubr.f32.vlgmr.msra.gmra.mxu1 %v1265_v4  ;;  %v264_v3 = vld [vmem:[%s11720_s29 + $0xd8] sm:$0xff]  ;;  %v661_v4 = vld [vmem:[%s11726_s9 + $0xb40] sm:$0x3] }
 0x103   : > { %5470 = vmatpush1.xpose.msra.mxu0 %v649_v21  ;;  %5540 = vmatpush1.xpose.msra.mxu1 %v651_v22  ;;  %v1336_v10 = vcombine.high %v264_v3, %v264_v3  ;;  %v668_v21 = vld [vmem:[%s11726_s9 + $0xb78] sm:$0x3]  ;;  %v1343_v22 = vrot.slane %v264_v3, %v11752_v19  ;;  %v418_v3 = vld [vmem:[%s11726_s9 + $0x3a8] sm:$0xff] }
 0x104   : > { %5471 = vmatprep.subr.mxu0 %v394_v23  ;;  %5541 = vmatprep.subr.mxu1 %v396_v24  ;;  %v265_v24 = vld [vmem:[%s11720_s29 + $0xe0] sm:$0xff] }
 0x105   : > { %5505 = vmatprep.mubr.f32.mxu0 %v1283_v25  ;;  %5575 = vmatprep.mubr.f32.mxu1 %v1284_v26  ;;  %v1350_v23 = vrot.slane %v1336_v10, %v11752_v19  ;;  %v665_v25 = vld [vmem:[%s11726_s9 + $0xb60] sm:$0x3]  ;;  %v667_v26 = vld [vmem:[%s11726_s9 + $0xb70] sm:$0x3] }
 0x107   : > { %5472 = vmatpush1.xpose.msra.mxu0 %v393_v28  ;;  %5542 = vmatpush1.xpose.msra.mxu1 %v395_v29  ;;  %v412_v28 = vld [vmem:[%s11726_s9 + $0x378] sm:$0xff]  ;;  %v1351_v29 = vcombine.high %v1343_v22, %v1343_v22 }
 0x108   : > { %5609 = vmatprep.subr.mxu0 %v654_v30  ;;  %5679 = vmatprep.subr.mxu1 %v656_v31  ;;  %v1352_v30 = vcombine.high %v1350_v23, %v1350_v23  ;;  %v1353_v31 = vcombine.high %v265_v24, %v265_v24 }
 0x10a   : > { %5506 = vmatmul.mubr.f32.vlgmr.msra.gmra.mxu0 %v1275_v17  ;;  %5576 = vmatmul.mubr.f32.vlgmr.msra.gmra.mxu1 %v1282_v18  ;;  %v407_v17 = vld [vmem:[%s11726_s9 + $0x350] sm:$0xff] }
 0x10b   : > { %5610 = vmatpush1.xpose.msra.mxu0 %v653_v35  ;;  %5680 = vmatpush1.xpose.msra.mxu1 %v655_v36 }
 0x10c   : > { %5611 = vmatprep.subr.mxu0 %v398_v37  ;;  %5681 = vmatprep.subr.mxu1 %v400_v38  ;;  %v409_v37 = vld [vmem:[%s11726_s9 + $0x360] sm:$0xff]  ;;  %v411_v38 = vld [vmem:[%s11726_s9 + $0x370] sm:$0xff] }
 0x10d   : > { %5645 = vmatprep.mubr.f32.mxu0 %v1300_v39  ;;  %5715 = vmatprep.mubr.f32.mxu1 %v1301_v40  ;;  %v670_v40 = vld [vmem:[%s11726_s9 + $0xb88] sm:$0x3] }
 0x10f   : > { %5612 = vmatpush1.xpose.msra.mxu0 %v397_v42  ;;  %5682 = vmatpush1.xpose.msra.mxu1 %v399_v43  ;;  %v1360_v42 = vrot.slane %v265_v24, %v11752_v19  ;;  %v1367_v43 = vrot.slane %v1353_v31, %v11752_v19  ;;  %v422_v24 = vld [vmem:[%s11726_s9 + $0x3c8] sm:$0xff] }
 0x110   : > { %5749 = vmatprep.subr.mxu0 %v658_v44  ;;  %5819 = vmatprep.subr.mxu1 %v660_v45  ;;  %v266_v44 = vld [vmem:[%s11720_s29 + $0xe8] sm:$0xff]  ;;  %v669_v45 = vld [vmem:[%s11726_s9 + $0xb80] sm:$0x3] }
 0x112   : > { %5646 = vmatmul.mubr.f32.vlgmr.msra.gmra.mxu0 %v1292_v32  ;;  %v2287_v56 = vpop.f32.mrf.mxu0  ;;  %v2357_v57 = vpop.f32.mrf.mxu1  ;;  %5716 = vmatmul.mubr.f32.vlgmr.msra.gmra.mxu1 %v1299_v33 }
 0x113   : > { %v2358_v58 = vadd.f32 %v2357_v57, %v2287_v56  ;;  %5750 = vmatpush1.xpose.msra.mxu0 %v657_v49  ;;  %5820 = vmatpush1.xpose.msra.mxu1 %v659_v50  ;;  %v1368_v49 = vcombine.high %v1360_v42, %v1360_v42  ;;  %v1369_v50 = vcombine.high %v1367_v43, %v1367_v43  ;;  %v413_v57 = vld [vmem:[%s11726_s9 + $0x380] sm:$0xff] }
 0x114   : > { %v2289_v59 = vpop.f32.mrf.mxu0  ;;  %v2359_v60 = vpop.f32.mrf.mxu1  ;;  %5751 = vmatprep.subr.mxu0 %v402_v51  ;;  %5821 = vmatprep.subr.mxu1 %v404_v52  ;;  %v1370_v51 = vcombine.high %v266_v44, %v266_v44 }
 0x115   : > { %5785 = vmatprep.mubr.f32.mxu0 %v1317_v53  ;;  %5855 = vmatprep.mubr.f32.mxu1 %v1318_v54  ;;  %v674_v60 = vld [vmem:[%s11726_s9 + $0xba8] sm:$0x3] }
 0x117   : > { %5752 = vmatpush1.xpose.msra.mxu0 %v401_v61  ;;  %5822 = vmatpush1.xpose.msra.mxu1 %v403_v62  ;;  %v676_v61 = vld [vmem:[%s11726_s9 + $0xbb8] sm:$0x3]  ;;  %v1377_v62 = vrot.slane %v266_v44, %v11752_v19  ;;  %v426_v44 = vld [vmem:[%s11726_s9 + $0x3e8] sm:$0xff] }
 0x118   : > { %5889 = vmatprep.subr.mxu0 %v662_v63  ;;  %5959 = vmatprep.subr.mxu1 %v664_v0  ;;  %v1384_v63 = vrot.slane %v1370_v51, %v11752_v19  ;;  %v267_v0 = vld [vmem:[%s11720_s29 + $0xf0] sm:$0xff] }
 0x11a   : > { %v2427_v11 = vpop.f32.mrf.mxu0  ;;  %5786 = vmatmul.mubr.f32.vlgmr.msra.gmra.mxu0 %v1309_v46  ;;  %v2497_v12 = vpop.f32.mrf.mxu1  ;;  %5856 = vmatmul.mubr.f32.vlgmr.msra.gmra.mxu1 %v1316_v47  ;;  %v671_v46 = vld [vmem:[%s11726_s9 + $0xb90] sm:$0x3]  ;;  %v414_v47 = vld [vmem:[%s11726_s9 + $0x388] sm:$0xff] }
 0x11b   : > { %v2428_v13 = vadd.f32 %v2427_v11, %v2358_v58  ;;  %5890 = vmatpush1.xpose.msra.mxu0 %v661_v4  ;;  %5960 = vmatpush1.xpose.msra.mxu1 %v663_v5  ;;  %v415_v58 = vld [vmem:[%s11726_s9 + $0x390] sm:$0xff]  ;;  %v420_v4 = vld [vmem:[%s11726_s9 + $0x3b8] sm:$0xff]  ;;  %v1385_v5 = vcombine.high %v1377_v62, %v1377_v62 }
 0x11c   : > { %v2429_v14 = vpop.f32.mrf.mxu0  ;;  %v2499_v15 = vpop.f32.mrf.mxu1  ;;  %5891 = vmatprep.subr.mxu0 %v406_v6  ;;  %5961 = vmatprep.subr.mxu1 %v408_v7  ;;  %v1386_v6 = vcombine.high %v1384_v63, %v1384_v63  ;;  %v1387_v7 = vcombine.high %v267_v0, %v267_v0 }
 0x11d   : > { %v2498_v18 = vadd.f32 %v2497_v12, %v2428_v13  ;;  %5925 = vmatprep.mubr.f32.mxu0 %v1334_v8  ;;  %5995 = vmatprep.mubr.f32.mxu1 %v1335_v9  ;;  %v417_v13 = vld [vmem:[%s11726_s9 + $0x3a0] sm:$0xff]  ;;  %v419_v14 = vld [vmem:[%s11726_s9 + $0x3b0] sm:$0xff] }
 0x11f   : > { %5892 = vmatpush1.xpose.msra.mxu0 %v405_v16  ;;  %5962 = vmatpush1.xpose.msra.mxu1 %v407_v17  ;;  %v678_v16 = vld [vmem:[%s11726_s9 + $0xbc8] sm:$0x3]  ;;  %v680_v17 = vld [vmem:[%s11726_s9 + $0xbd8] sm:$0x3] }
 0x120   : > { %6029 = vmatprep.subr.mxu0 %v666_v20  ;;  %6099 = vmatprep.subr.mxu1 %v668_v21  ;;  %v1401_v20 = vrot.slane %v1387_v7, %v11752_v19  ;;  %v268_v21 = vld [vmem:[%s11720_s29 + $0xf8] sm:$0xff] }
 0x122   : > { %v2567_v32 = vpop.f32.mrf.mxu0  ;;  %5926 = vmatmul.mubr.f32.vlgmr.msra.gmra.mxu0 %v1326_v1  ;;  %v2637_v33 = vpop.f32.mrf.mxu1  ;;  %5996 = vmatmul.mubr.f32.vlgmr.msra.gmra.mxu1 %v1333_v2  ;;  %v673_v1 = vld [vmem:[%s11726_s9 + $0xba0] sm:$0x3]  ;;  %v675_v2 = vld [vmem:[%s11726_s9 + $0xbb0] sm:$0x3] }
 0x123   : > { %v2568_v34 = vadd.f32 %v2567_v32, %v2498_v18  ;;  %6030 = vmatpush1.xpose.msra.mxu0 %v665_v25  ;;  %6100 = vmatpush1.xpose.msra.mxu1 %v667_v26  ;;  %v1394_v18 = vrot.slane %v267_v0, %v11752_v19  ;;  %v424_v25 = vld [vmem:[%s11726_s9 + $0x3d8] sm:$0xff]  ;;  %v430_v0 = vld [vmem:[%s11726_s9 + $0x408] sm:$0xff] }
 0x124   : > { %v2569_v35 = vpop.f32.mrf.mxu0  ;;  %v2639_v36 = vpop.f32.mrf.mxu1  ;;  %6031 = vmatprep.subr.mxu0 %v410_v27  ;;  %6101 = vmatprep.subr.mxu1 %v412_v28  ;;  %v1403_v27 = vcombine.high %v1401_v20, %v1401_v20  ;;  %v1404_v28 = vcombine.high %v268_v21, %v268_v21 }
 0x125   : > { %v2638_v39 = vadd.f32 %v2637_v33, %v2568_v34  ;;  %6065 = vmatprep.mubr.f32.mxu0 %v1351_v29  ;;  %6135 = vmatprep.mubr.f32.mxu1 %v1352_v30  ;;  %v1402_v26 = vcombine.high %v1394_v18, %v1394_v18  ;;  %v421_v34 = vld [vmem:[%s11726_s9 + $0x3c0] sm:$0xff]  ;;  %v423_v35 = vld [vmem:[%s11726_s9 + $0x3d0] sm:$0xff] }
 0x127   : > { %6032 = vmatpush1.xpose.msra.mxu0 %v409_v37  ;;  %6102 = vmatpush1.xpose.msra.mxu1 %v411_v38  ;;  %v682_v37 = vld [vmem:[%s11726_s9 + $0xbe8] sm:$0x3]  ;;  %v684_v38 = vld [vmem:[%s11726_s9 + $0xbf8] sm:$0x3] }
 0x128   : > { %6169 = vmatprep.subr.mxu0 %v670_v40  ;;  %6239 = vmatprep.subr.mxu1 %v672_v41  ;;  %v1418_v40 = vrot.slane %v1404_v28, %v11752_v19  ;;  %v269_v41 = vld [vmem:[%s11720_s29 + $0x100] sm:$0xff] }
 0x12a   : > { %v2707_v52 = vpop.f32.mrf.mxu0  ;;  %6066 = vmatmul.mubr.f32.vlgmr.msra.gmra.mxu0 %v1343_v22  ;;  %v2777_v53 = vpop.f32.mrf.mxu1  ;;  %6136 = vmatmul.mubr.f32.vlgmr.msra.gmra.mxu1 %v1350_v23  ;;  %v677_v22 = vld [vmem:[%s11726_s9 + $0xbc0] sm:$0x3]  ;;  %v679_v23 = vld [vmem:[%s11726_s9 + $0xbd0] sm:$0x3] }
 0x12b   : > { %v2708_v54 = vadd.f32 %v2707_v52, %v2638_v39  ;;  %6170 = vmatpush1.xpose.msra.mxu0 %v669_v45  ;;  %6240 = vmatpush1.xpose.msra.mxu1 %v671_v46  ;;  %v1411_v39 = vrot.slane %v268_v21, %v11752_v19  ;;  %v428_v45 = vld [vmem:[%s11726_s9 + $0x3f8] sm:$0xff]  ;;  %v434_v21 = vld [vmem:[%s11726_s9 + $0x428] sm:$0xff] }
 0x12c   : > { %v2709_v55 = vpop.f32.mrf.mxu0  ;;  %v2779_v56 = vpop.f32.mrf.mxu1  ;;  %6171 = vmatprep.subr.mxu0 %v414_v47  ;;  %6241 = vmatprep.subr.mxu1 %v416_v48  ;;  %v1420_v47 = vcombine.high %v1418_v40, %v1418_v40  ;;  %v1421_v48 = vcombine.high %v269_v41, %v269_v41 }
 0x12d   : > { %v2778_v59 = vadd.f32 %v2777_v53, %v2708_v54  ;;  %6205 = vmatprep.mubr.f32.mxu0 %v1368_v49  ;;  %6275 = vmatprep.mubr.f32.mxu1 %v1369_v50  ;;  %v1419_v46 = vcombine.high %v1411_v39, %v1411_v39  ;;  %v425_v54 = vld [vmem:[%s11726_s9 + $0x3e0] sm:$0xff]  ;;  %v427_v55 = vld [vmem:[%s11726_s9 + $0x3f0] sm:$0xff] }
 0x12f   : > { %6172 = vmatpush1.xpose.msra.mxu0 %v413_v57  ;;  %6242 = vmatpush1.xpose.msra.mxu1 %v415_v58  ;;  %v686_v57 = vld [vmem:[%s11726_s9 + $0xc08] sm:$0x3]  ;;  %v688_v58 = vld [vmem:[%s11726_s9 + $0xc18] sm:$0x3] }
 0x130   : > { %6309 = vmatprep.subr.mxu0 %v674_v60  ;;  %6379 = vmatprep.subr.mxu1 %v676_v61  ;;  %v1435_v60 = vrot.slane %v1421_v48, %v11752_v19  ;;  %v270_v61 = vld [vmem:[%s11720_s29 + $0x108] sm:$0xff] }
 0x132   : > { %v2847_v8 = vpop.f32.mrf.mxu0  ;;  %6206 = vmatmul.mubr.f32.vlgmr.msra.gmra.mxu0 %v1360_v42  ;;  %v2917_v9 = vpop.f32.mrf.mxu1  ;;  %6276 = vmatmul.mubr.f32.vlgmr.msra.gmra.mxu1 %v1367_v43  ;;  %v681_v42 = vld [vmem:[%s11726_s9 + $0xbe0] sm:$0x3]  ;;  %v683_v43 = vld [vmem:[%s11726_s9 + $0xbf0] sm:$0x3] }
 0x133   : > { %v2848_v10 = vadd.f32 %v2847_v8, %v2778_v59  ;;  %6310 = vmatpush1.xpose.msra.mxu0 %v673_v1  ;;  %6380 = vmatpush1.xpose.msra.mxu1 %v675_v2  ;;  %v1428_v59 = vrot.slane %v269_v41, %v11752_v19  ;;  %v432_v1 = vld [vmem:[%s11726_s9 + $0x418] sm:$0xff]  ;;  %v438_v41 = vld [vmem:[%s11726_s9 + $0x448] sm:$0xff] }
 0x134   : > { %v2849_v11 = vpop.f32.mrf.mxu0  ;;  %v2919_v12 = vpop.f32.mrf.mxu1  ;;  %6311 = vmatprep.subr.mxu0 %v418_v3  ;;  %6381 = vmatprep.subr.mxu1 %v420_v4  ;;  %v1437_v3 = vcombine.high %v1435_v60, %v1435_v60  ;;  %v1438_v4 = vcombine.high %v270_v61, %v270_v61 }
 0x135   : > { %v2918_v15 = vadd.f32 %v2917_v9, %v2848_v10  ;;  %6345 = vmatprep.mubr.f32.mxu0 %v1385_v5  ;;  %6415 = vmatprep.mubr.f32.mxu1 %v1386_v6  ;;  %v1436_v2 = vcombine.high %v1428_v59, %v1428_v59  ;;  %v429_v10 = vld [vmem:[%s11726_s9 + $0x400] sm:$0xff]  ;;  %v431_v11 = vld [vmem:[%s11726_s9 + $0x410] sm:$0xff] }
 0x137   : > { %6312 = vmatpush1.xpose.msra.mxu0 %v417_v13  ;;  %6382 = vmatpush1.xpose.msra.mxu1 %v419_v14  ;;  %v690_v13 = vld [vmem:[%s11726_s9 + $0xc28] sm:$0x3]  ;;  %v692_v14 = vld [vmem:[%s11726_s9 + $0xc38] sm:$0x3] }
 0x138   : > { %6449 = vmatprep.subr.mxu0 %v678_v16  ;;  %6519 = vmatprep.subr.mxu1 %v680_v17  ;;  %v1452_v16 = vrot.slane %v1438_v4, %v11752_v19  ;;  %v271_v17 = vld [vmem:[%s11720_s29 + $0x110] sm:$0xff] }
 0x13a   : > { %v2987_v29 = vpop.f32.mrf.mxu0  ;;  %6346 = vmatmul.mubr.f32.vlgmr.msra.gmra.mxu0 %v1377_v62  ;;  %v3057_v30 = vpop.f32.mrf.mxu1  ;;  %6416 = vmatmul.mubr.f32.vlgmr.msra.gmra.mxu1 %v1384_v63  ;;  %v685_v62 = vld [vmem:[%s11726_s9 + $0xc00] sm:$0x3]  ;;  %v687_v63 = vld [vmem:[%s11726_s9 + $0xc10] sm:$0x3] }
 0x13b   : > { %v2988_v31 = vadd.f32 %v2987_v29, %v2918_v15  ;;  %6450 = vmatpush1.xpose.msra.mxu0 %v677_v22  ;;  %6520 = vmatpush1.xpose.msra.mxu1 %v679_v23  ;;  %v1445_v15 = vrot.slane %v270_v61, %v11752_v19  ;;  %v436_v22 = vld [vmem:[%s11726_s9 + $0x438] sm:$0xff]  ;;  %v442_v61 = vld [vmem:[%s11726_s9 + $0x468] sm:$0xff] }
 0x13c   : > { %v2989_v32 = vpop.f32.mrf.mxu0  ;;  %v3059_v33 = vpop.f32.mrf.mxu1  ;;  %6451 = vmatprep.subr.mxu0 %v422_v24  ;;  %6521 = vmatprep.subr.mxu1 %v424_v25  ;;  %v1454_v24 = vcombine.high %v1452_v16, %v1452_v16  ;;  %v1455_v25 = vcombine.high %v271_v17, %v271_v17 }
 0x13d   : > { %v3058_v36 = vadd.f32 %v3057_v30, %v2988_v31  ;;  %6485 = vmatprep.mubr.f32.mxu0 %v1402_v26  ;;  %6555 = vmatprep.mubr.f32.mxu1 %v1403_v27  ;;  %v1453_v23 = vcombine.high %v1445_v15, %v1445_v15  ;;  %v433_v31 = vld [vmem:[%s11726_s9 + $0x420] sm:$0xff]  ;;  %v435_v32 = vld [vmem:[%s11726_s9 + $0x430] sm:$0xff] }
 0x13f   : > { %6452 = vmatpush1.xpose.msra.mxu0 %v421_v34  ;;  %6522 = vmatpush1.xpose.msra.mxu1 %v423_v35  ;;  %v694_v34 = vld [vmem:[%s11726_s9 + $0xc48] sm:$0x3]  ;;  %v696_v35 = vld [vmem:[%s11726_s9 + $0xc58] sm:$0x3] }
 0x140   : > { %6589 = vmatprep.subr.mxu0 %v682_v37  ;;  %6659 = vmatprep.subr.mxu1 %v684_v38  ;;  %v1469_v37 = vrot.slane %v1455_v25, %v11752_v19  ;;  %v272_v38 = vld [vmem:[%s11720_s29 + $0x118] sm:$0xff] }
 0x142   : > { %v3127_v49 = vpop.f32.mrf.mxu0  ;;  %6486 = vmatmul.mubr.f32.vlgmr.msra.gmra.mxu0 %v1394_v18  ;;  %v3197_v50 = vpop.f32.mrf.mxu1  ;;  %6556 = vmatmul.mubr.f32.vlgmr.msra.gmra.mxu1 %v1401_v20  ;;  %v689_v18 = vld [vmem:[%s11726_s9 + $0xc20] sm:$0x3]  ;;  %v691_v20 = vld [vmem:[%s11726_s9 + $0xc30] sm:$0x3] }
 0x143   : > { %v3128_v51 = vadd.f32 %v3127_v49, %v3058_v36  ;;  %6590 = vmatpush1.xpose.msra.mxu0 %v681_v42  ;;  %6660 = vmatpush1.xpose.msra.mxu1 %v683_v43  ;;  %v1462_v36 = vrot.slane %v271_v17, %v11752_v19  ;;  %v440_v42 = vld [vmem:[%s11726_s9 + $0x458] sm:$0xff]  ;;  %v446_v17 = vld [vmem:[%s11726_s9 + $0x488] sm:$0xff] }
 0x144   : > { %v3129_v52 = vpop.f32.mrf.mxu0  ;;  %v3199_v53 = vpop.f32.mrf.mxu1  ;;  %6591 = vmatprep.subr.mxu0 %v426_v44  ;;  %6661 = vmatprep.subr.mxu1 %v428_v45  ;;  %v1471_v44 = vcombine.high %v1469_v37, %v1469_v37  ;;  %v1472_v45 = vcombine.high %v272_v38, %v272_v38 }
 0x145   : > { %v3198_v56 = vadd.f32 %v3197_v50, %v3128_v51  ;;  %6625 = vmatprep.mubr.f32.mxu0 %v1419_v46  ;;  %6695 = vmatprep.mubr.f32.mxu1 %v1420_v47  ;;  %v1470_v43 = vcombine.high %v1462_v36, %v1462_v36  ;;  %v437_v51 = vld [vmem:[%s11726_s9 + $0x440] sm:$0xff]  ;;  %v439_v52 = vld [vmem:[%s11726_s9 + $0x450] sm:$0xff] }
 0x147   : > { %6592 = vmatpush1.xpose.msra.mxu0 %v425_v54  ;;  %6662 = vmatpush1.xpose.msra.mxu1 %v427_v55  ;;  %v698_v54 = vld [vmem:[%s11726_s9 + $0xc68] sm:$0x3]  ;;  %v700_v55 = vld [vmem:[%s11726_s9 + $0xc78] sm:$0x3] }
 0x148   : > { %6729 = vmatprep.subr.mxu0 %v686_v57  ;;  %6799 = vmatprep.subr.mxu1 %v688_v58  ;;  %v1486_v57 = vrot.slane %v1472_v45, %v11752_v19  ;;  %v273_v58 = vld [vmem:[%s11720_s29 + $0x120] sm:$0xff] }
 0x14a   : > { %v3267_v5 = vpop.f32.mrf.mxu0  ;;  %6626 = vmatmul.mubr.f32.vlgmr.msra.gmra.mxu0 %v1411_v39  ;;  %v3337_v6 = vpop.f32.mrf.mxu1  ;;  %6696 = vmatmul.mubr.f32.vlgmr.msra.gmra.mxu1 %v1418_v40  ;;  %v693_v39 = vld [vmem:[%s11726_s9 + $0xc40] sm:$0x3]  ;;  %v695_v40 = vld [vmem:[%s11726_s9 + $0xc50] sm:$0x3] }
 0x14b   : > { %v3268_v7 = vadd.f32 %v3267_v5, %v3198_v56  ;;  %6730 = vmatpush1.xpose.msra.mxu0 %v685_v62  ;;  %6800 = vmatpush1.xpose.msra.mxu1 %v687_v63  ;;  %v1479_v56 = vrot.slane %v272_v38, %v11752_v19  ;;  %v444_v62 = vld [vmem:[%s11726_s9 + $0x478] sm:$0xff]  ;;  %v450_v38 = vld [vmem:[%s11726_s9 + $0x4a8] sm:$0xff] }
 0x14c   : > { %v3269_v8 = vpop.f32.mrf.mxu0  ;;  %v3339_v9 = vpop.f32.mrf.mxu1  ;;  %6731 = vmatprep.subr.mxu0 %v430_v0  ;;  %6801 = vmatprep.subr.mxu1 %v432_v1  ;;  %v1488_v0 = vcombine.high %v1486_v57, %v1486_v57  ;;  %v1489_v1 = vcombine.high %v273_v58, %v273_v58 }
 0x14d   : > { %v3338_v12 = vadd.f32 %v3337_v6, %v3268_v7  ;;  %6765 = vmatprep.mubr.f32.mxu0 %v1436_v2  ;;  %6835 = vmatprep.mubr.f32.mxu1 %v1437_v3  ;;  %v1487_v63 = vcombine.high %v1479_v56, %v1479_v56  ;;  %v441_v7 = vld [vmem:[%s11726_s9 + $0x460] sm:$0xff]  ;;  %v443_v8 = vld [vmem:[%s11726_s9 + $0x470] sm:$0xff] }
 0x14f   : > { %6732 = vmatpush1.xpose.msra.mxu0 %v429_v10  ;;  %6802 = vmatpush1.xpose.msra.mxu1 %v431_v11  ;;  %v702_v10 = vld [vmem:[%s11726_s9 + $0xc88] sm:$0x3]  ;;  %v704_v11 = vld [vmem:[%s11726_s9 + $0xc98] sm:$0x3] }
 0x150   : > { %6869 = vmatprep.subr.mxu0 %v690_v13  ;;  %6939 = vmatprep.subr.mxu1 %v692_v14  ;;  %v1503_v13 = vrot.slane %v1489_v1, %v11752_v19  ;;  %v274_v14 = vld [vmem:[%s11720_s29 + $0x128] sm:$0xff] }
 0x152   : > { %v3407_v26 = vpop.f32.mrf.mxu0  ;;  %6766 = vmatmul.mubr.f32.vlgmr.msra.gmra.mxu0 %v1428_v59  ;;  %v3477_v27 = vpop.f32.mrf.mxu1  ;;  %6836 = vmatmul.mubr.f32.vlgmr.msra.gmra.mxu1 %v1435_v60  ;;  %v697_v59 = vld [vmem:[%s11726_s9 + $0xc60] sm:$0x3]  ;;  %v699_v60 = vld [vmem:[%s11726_s9 + $0xc70] sm:$0x3] }
 0x153   : > { %v3408_v28 = vadd.f32 %v3407_v26, %v3338_v12  ;;  %6870 = vmatpush1.xpose.msra.mxu0 %v689_v18  ;;  %6940 = vmatpush1.xpose.msra.mxu1 %v691_v20  ;;  %v1496_v12 = vrot.slane %v273_v58, %v11752_v19  ;;  %v448_v18 = vld [vmem:[%s11726_s9 + $0x498] sm:$0xff]  ;;  %v454_v58 = vld [vmem:[%s11726_s9 + $0x4c8] sm:$0xff] }
 0x154   : > { %v3409_v29 = vpop.f32.mrf.mxu0  ;;  %v3479_v30 = vpop.f32.mrf.mxu1  ;;  %6871 = vmatprep.subr.mxu0 %v434_v21  ;;  %6941 = vmatprep.subr.mxu1 %v436_v22  ;;  %v1505_v21 = vcombine.high %v1503_v13, %v1503_v13  ;;  %v1506_v22 = vcombine.high %v274_v14, %v274_v14 }
 0x155   : > { %v3478_v33 = vadd.f32 %v3477_v27, %v3408_v28  ;;  %6905 = vmatprep.mubr.f32.mxu0 %v1453_v23  ;;  %6975 = vmatprep.mubr.f32.mxu1 %v1454_v24  ;;  %v1504_v20 = vcombine.high %v1496_v12, %v1496_v12  ;;  %v445_v28 = vld [vmem:[%s11726_s9 + $0x480] sm:$0xff]  ;;  %v447_v29 = vld [vmem:[%s11726_s9 + $0x490] sm:$0xff] }
 0x157   : > { %6872 = vmatpush1.xpose.msra.mxu0 %v433_v31  ;;  %6942 = vmatpush1.xpose.msra.mxu1 %v435_v32  ;;  %v706_v31 = vld [vmem:[%s11726_s9 + $0xca8] sm:$0x3]  ;;  %v708_v32 = vld [vmem:[%s11726_s9 + $0xcb8] sm:$0x3] }
 0x158   : > { %7009 = vmatprep.subr.mxu0 %v694_v34  ;;  %7079 = vmatprep.subr.mxu1 %v696_v35  ;;  %v1520_v34 = vrot.slane %v1506_v22, %v11752_v19  ;;  %v275_v35 = vld [vmem:[%s11720_s29 + $0x130] sm:$0xff] }
 0x15a   : > { %v3547_v46 = vpop.f32.mrf.mxu0  ;;  %6906 = vmatmul.mubr.f32.vlgmr.msra.gmra.mxu0 %v1445_v15  ;;  %v3617_v47 = vpop.f32.mrf.mxu1  ;;  %6976 = vmatmul.mubr.f32.vlgmr.msra.gmra.mxu1 %v1452_v16  ;;  %v701_v15 = vld [vmem:[%s11726_s9 + $0xc80] sm:$0x3]  ;;  %v703_v16 = vld [vmem:[%s11726_s9 + $0xc90] sm:$0x3] }
 0x15b   : > { %v3548_v48 = vadd.f32 %v3547_v46, %v3478_v33  ;;  %7010 = vmatpush1.xpose.msra.mxu0 %v693_v39  ;;  %7080 = vmatpush1.xpose.msra.mxu1 %v695_v40  ;;  %v1513_v33 = vrot.slane %v274_v14, %v11752_v19  ;;  %v452_v39 = vld [vmem:[%s11726_s9 + $0x4b8] sm:$0xff]  ;;  %v458_v14 = vld [vmem:[%s11726_s9 + $0x4e8] sm:$0xff] }
 0x15c   : > { %v3549_v49 = vpop.f32.mrf.mxu0  ;;  %v3619_v50 = vpop.f32.mrf.mxu1  ;;  %7011 = vmatprep.subr.mxu0 %v438_v41  ;;  %7081 = vmatprep.subr.mxu1 %v440_v42  ;;  %v1522_v41 = vcombine.high %v1520_v34, %v1520_v34  ;;  %v1523_v42 = vcombine.high %v275_v35, %v275_v35 }
 0x15d   : > { %v3618_v53 = vadd.f32 %v3617_v47, %v3548_v48  ;;  %7045 = vmatprep.mubr.f32.mxu0 %v1470_v43  ;;  %7115 = vmatprep.mubr.f32.mxu1 %v1471_v44  ;;  %v1521_v40 = vcombine.high %v1513_v33, %v1513_v33  ;;  %v449_v48 = vld [vmem:[%s11726_s9 + $0x4a0] sm:$0xff]  ;;  %v451_v49 = vld [vmem:[%s11726_s9 + $0x4b0] sm:$0xff] }
 0x15f   : > { %7012 = vmatpush1.xpose.msra.mxu0 %v437_v51  ;;  %7082 = vmatpush1.xpose.msra.mxu1 %v439_v52  ;;  %v710_v51 = vld [vmem:[%s11726_s9 + $0xcc8] sm:$0x3]  ;;  %v712_v52 = vld [vmem:[%s11726_s9 + $0xcd8] sm:$0x3] }
 0x160   : > { %7149 = vmatprep.subr.mxu0 %v698_v54  ;;  %7219 = vmatprep.subr.mxu1 %v700_v55  ;;  %v1537_v54 = vrot.slane %v1523_v42, %v11752_v19  ;;  %v276_v55 = vld [vmem:[%s11720_s29 + $0x138] sm:$0xff] }
 0x162   : > { %v3687_v2 = vpop.f32.mrf.mxu0  ;;  %7046 = vmatmul.mubr.f32.vlgmr.msra.gmra.mxu0 %v1462_v36  ;;  %v3757_v3 = vpop.f32.mrf.mxu1  ;;  %7116 = vmatmul.mubr.f32.vlgmr.msra.gmra.mxu1 %v1469_v37  ;;  %v705_v36 = vld [vmem:[%s11726_s9 + $0xca0] sm:$0x3]  ;;  %v707_v37 = vld [vmem:[%s11726_s9 + $0xcb0] sm:$0x3] }
 0x163   : > { %v3688_v4 = vadd.f32 %v3687_v2, %v3618_v53  ;;  %7150 = vmatpush1.xpose.msra.mxu0 %v697_v59  ;;  %7220 = vmatpush1.xpose.msra.mxu1 %v699_v60  ;;  %v1530_v53 = vrot.slane %v275_v35, %v11752_v19  ;;  %v456_v59 = vld [vmem:[%s11726_s9 + $0x4d8] sm:$0xff]  ;;  %v462_v35 = vld [vmem:[%s11726_s9 + $0x508] sm:$0xff] }
 0x164   : > { %v3689_v5 = vpop.f32.mrf.mxu0  ;;  %v3759_v6 = vpop.f32.mrf.mxu1  ;;  %7151 = vmatprep.subr.mxu0 %v442_v61  ;;  %7221 = vmatprep.subr.mxu1 %v444_v62  ;;  %v1539_v61 = vcombine.high %v1537_v54, %v1537_v54  ;;  %v1540_v62 = vcombine.high %v276_v55, %v276_v55 }
 0x165   : > { %v3758_v9 = vadd.f32 %v3757_v3, %v3688_v4  ;;  %7185 = vmatprep.mubr.f32.mxu0 %v1487_v63  ;;  %7255 = vmatprep.mubr.f32.mxu1 %v1488_v0  ;;  %v1538_v60 = vcombine.high %v1530_v53, %v1530_v53  ;;  %v453_v4 = vld [vmem:[%s11726_s9 + $0x4c0] sm:$0xff]  ;;  %v455_v5 = vld [vmem:[%s11726_s9 + $0x4d0] sm:$0xff] }
 0x167   : > { %7152 = vmatpush1.xpose.msra.mxu0 %v441_v7  ;;  %7222 = vmatpush1.xpose.msra.mxu1 %v443_v8  ;;  %v714_v7 = vld [vmem:[%s11726_s9 + $0xce8] sm:$0x3]  ;;  %v716_v8 = vld [vmem:[%s11726_s9 + $0xcf8] sm:$0x3] }
 0x168   : > { %7289 = vmatprep.subr.mxu0 %v702_v10  ;;  %7359 = vmatprep.subr.mxu1 %v704_v11  ;;  %v1554_v10 = vrot.slane %v1540_v62, %v11752_v19  ;;  %v277_v11 = vld [vmem:[%s11720_s29 + $0x140] sm:$0xff] }
 0x16a   : > { %v3827_v23 = vpop.f32.mrf.mxu0  ;;  %7186 = vmatmul.mubr.f32.vlgmr.msra.gmra.mxu0 %v1479_v56  ;;  %v3897_v24 = vpop.f32.mrf.mxu1  ;;  %7256 = vmatmul.mubr.f32.vlgmr.msra.gmra.mxu1 %v1486_v57  ;;  %v709_v56 = vld [vmem:[%s11726_s9 + $0xcc0] sm:$0x3]  ;;  %v711_v57 = vld [vmem:[%s11726_s9 + $0xcd0] sm:$0x3] }
 0x16b   : > { %v3828_v25 = vadd.f32 %v3827_v23, %v3758_v9  ;;  %7290 = vmatpush1.xpose.msra.mxu0 %v701_v15  ;;  %7360 = vmatpush1.xpose.msra.mxu1 %v703_v16  ;;  %v1547_v9 = vrot.slane %v276_v55, %v11752_v19  ;;  %v460_v15 = vld [vmem:[%s11726_s9 + $0x4f8] sm:$0xff]  ;;  %v466_v55 = vld [vmem:[%s11726_s9 + $0x528] sm:$0xff] }
 0x16c   : > { %v3829_v26 = vpop.f32.mrf.mxu0  ;;  %v3899_v27 = vpop.f32.mrf.mxu1  ;;  %7291 = vmatprep.subr.mxu0 %v446_v17  ;;  %7361 = vmatprep.subr.mxu1 %v448_v18  ;;  %v1556_v17 = vcombine.high %v1554_v10, %v1554_v10  ;;  %v1557_v18 = vcombine.high %v277_v11, %v277_v11 }
 0x16d   : > { %v3898_v30 = vadd.f32 %v3897_v24, %v3828_v25  ;;  %7325 = vmatprep.mubr.f32.mxu0 %v1504_v20  ;;  %7395 = vmatprep.mubr.f32.mxu1 %v1505_v21  ;;  %v1555_v16 = vcombine.high %v1547_v9, %v1547_v9  ;;  %v457_v25 = vld [vmem:[%s11726_s9 + $0x4e0] sm:$0xff]  ;;  %v459_v26 = vld [vmem:[%s11726_s9 + $0x4f0] sm:$0xff] }
 0x16f   : > { %7292 = vmatpush1.xpose.msra.mxu0 %v445_v28  ;;  %7362 = vmatpush1.xpose.msra.mxu1 %v447_v29  ;;  %v718_v28 = vld [vmem:[%s11726_s9 + $0xd08] sm:$0x3]  ;;  %v720_v29 = vld [vmem:[%s11726_s9 + $0xd18] sm:$0x3] }
 0x170   : > { %7429 = vmatprep.subr.mxu0 %v706_v31  ;;  %7499 = vmatprep.subr.mxu1 %v708_v32  ;;  %v1571_v31 = vrot.slane %v1557_v18, %v11752_v19  ;;  %v278_v32 = vld [vmem:[%s11720_s29 + $0x148] sm:$0xff] }
 0x172   : > { %v3967_v43 = vpop.f32.mrf.mxu0  ;;  %7326 = vmatmul.mubr.f32.vlgmr.msra.gmra.mxu0 %v1496_v12  ;;  %v4037_v44 = vpop.f32.mrf.mxu1  ;;  %7396 = vmatmul.mubr.f32.vlgmr.msra.gmra.mxu1 %v1503_v13  ;;  %v713_v12 = vld [vmem:[%s11726_s9 + $0xce0] sm:$0x3]  ;;  %v715_v13 = vld [vmem:[%s11726_s9 + $0xcf0] sm:$0x3] }
 0x173   : > { %v3968_v45 = vadd.f32 %v3967_v43, %v3898_v30  ;;  %7430 = vmatpush1.xpose.msra.mxu0 %v705_v36  ;;  %7500 = vmatpush1.xpose.msra.mxu1 %v707_v37  ;;  %v1564_v30 = vrot.slane %v277_v11, %v11752_v19  ;;  %v464_v36 = vld [vmem:[%s11726_s9 + $0x518] sm:$0xff]  ;;  %v470_v11 = vld [vmem:[%s11726_s9 + $0x548] sm:$0xff] }
 0x174   : > { %v3969_v46 = vpop.f32.mrf.mxu0  ;;  %v4039_v47 = vpop.f32.mrf.mxu1  ;;  %7431 = vmatprep.subr.mxu0 %v450_v38  ;;  %7501 = vmatprep.subr.mxu1 %v452_v39  ;;  %v1573_v38 = vcombine.high %v1571_v31, %v1571_v31  ;;  %v1574_v39 = vcombine.high %v278_v32, %v278_v32 }
 0x175   : > { %v4038_v50 = vadd.f32 %v4037_v44, %v3968_v45  ;;  %7465 = vmatprep.mubr.f32.mxu0 %v1521_v40  ;;  %7535 = vmatprep.mubr.f32.mxu1 %v1522_v41  ;;  %v1572_v37 = vcombine.high %v1564_v30, %v1564_v30  ;;  %v461_v45 = vld [vmem:[%s11726_s9 + $0x500] sm:$0xff]  ;;  %v463_v46 = vld [vmem:[%s11726_s9 + $0x510] sm:$0xff] }
 0x177   : > { %7432 = vmatpush1.xpose.msra.mxu0 %v449_v48  ;;  %7502 = vmatpush1.xpose.msra.mxu1 %v451_v49  ;;  %v722_v48 = vld [vmem:[%s11726_s9 + $0xd28] sm:$0x3]  ;;  %v724_v49 = vld [vmem:[%s11726_s9 + $0xd38] sm:$0x3] }
 0x178   : > { %7569 = vmatprep.subr.mxu0 %v710_v51  ;;  %7639 = vmatprep.subr.mxu1 %v712_v52  ;;  %v1588_v51 = vrot.slane %v1574_v39, %v11752_v19  ;;  %v279_v52 = vld [vmem:[%s11720_s29 + $0x150] sm:$0xff] }
 0x17a   : > { %v4107_v63 = vpop.f32.mrf.mxu0  ;;  %7466 = vmatmul.mubr.f32.vlgmr.msra.gmra.mxu0 %v1513_v33  ;;  %v4177_v0 = vpop.f32.mrf.mxu1  ;;  %7536 = vmatmul.mubr.f32.vlgmr.msra.gmra.mxu1 %v1520_v34  ;;  %v717_v33 = vld [vmem:[%s11726_s9 + $0xd00] sm:$0x3]  ;;  %v719_v34 = vld [vmem:[%s11726_s9 + $0xd10] sm:$0x3] }
 0x17b   : > { %v4108_v1 = vadd.f32 %v4107_v63, %v4038_v50  ;;  %7570 = vmatpush1.xpose.msra.mxu0 %v709_v56  ;;  %7640 = vmatpush1.xpose.msra.mxu1 %v711_v57  ;;  %v1581_v50 = vrot.slane %v278_v32, %v11752_v19  ;;  %v468_v56 = vld [vmem:[%s11726_s9 + $0x538] sm:$0xff]  ;;  %v474_v32 = vld [vmem:[%s11726_s9 + $0x568] sm:$0xff] }
 0x17c   : > { %v4109_v2 = vpop.f32.mrf.mxu0  ;;  %v4179_v3 = vpop.f32.mrf.mxu1  ;;  %7571 = vmatprep.subr.mxu0 %v454_v58  ;;  %7641 = vmatprep.subr.mxu1 %v456_v59  ;;  %v1590_v58 = vcombine.high %v1588_v51, %v1588_v51  ;;  %v1591_v59 = vcombine.high %v279_v52, %v279_v52 }
 0x17d   : > { %v4178_v6 = vadd.f32 %v4177_v0, %v4108_v1  ;;  %7605 = vmatprep.mubr.f32.mxu0 %v1538_v60  ;;  %7675 = vmatprep.mubr.f32.mxu1 %v1539_v61  ;;  %v1589_v57 = vcombine.high %v1581_v50, %v1581_v50  ;;  %v465_v1 = vld [vmem:[%s11726_s9 + $0x520] sm:$0xff]  ;;  %v467_v2 = vld [vmem:[%s11726_s9 + $0x530] sm:$0xff] }
 0x17f   : > { %7572 = vmatpush1.xpose.msra.mxu0 %v453_v4  ;;  %7642 = vmatpush1.xpose.msra.mxu1 %v455_v5  ;;  %v726_v4 = vld [vmem:[%s11726_s9 + $0xd48] sm:$0x3]  ;;  %v728_v5 = vld [vmem:[%s11726_s9 + $0xd58] sm:$0x3] }
 0x180   : > { %7709 = vmatprep.subr.mxu0 %v714_v7  ;;  %7779 = vmatprep.subr.mxu1 %v716_v8  ;;  %v1605_v7 = vrot.slane %v1591_v59, %v11752_v19  ;;  %v280_v8 = vld [vmem:[%s11720_s29 + $0x158] sm:$0xff] }
 0x182   : > { %v4247_v20 = vpop.f32.mrf.mxu0  ;;  %7606 = vmatmul.mubr.f32.vlgmr.msra.gmra.mxu0 %v1530_v53  ;;  %v4317_v21 = vpop.f32.mrf.mxu1  ;;  %7676 = vmatmul.mubr.f32.vlgmr.msra.gmra.mxu1 %v1537_v54  ;;  %v721_v53 = vld [vmem:[%s11726_s9 + $0xd20] sm:$0x3]  ;;  %v723_v54 = vld [vmem:[%s11726_s9 + $0xd30] sm:$0x3] }
 0x183   : > { %v4248_v22 = vadd.f32 %v4247_v20, %v4178_v6  ;;  %7710 = vmatpush1.xpose.msra.mxu0 %v713_v12  ;;  %7780 = vmatpush1.xpose.msra.mxu1 %v715_v13  ;;  %v1598_v6 = vrot.slane %v279_v52, %v11752_v19  ;;  %v472_v12 = vld [vmem:[%s11726_s9 + $0x558] sm:$0xff]  ;;  %v478_v52 = vld [vmem:[%s11726_s9 + $0x588] sm:$0xff] }
 0x184   : > { %v4249_v23 = vpop.f32.mrf.mxu0  ;;  %v4319_v24 = vpop.f32.mrf.mxu1  ;;  %7711 = vmatprep.subr.mxu0 %v458_v14  ;;  %7781 = vmatprep.subr.mxu1 %v460_v15  ;;  %v1607_v14 = vcombine.high %v1605_v7, %v1605_v7  ;;  %v1608_v15 = vcombine.high %v280_v8, %v280_v8 }
 0x185   : > { %v4318_v27 = vadd.f32 %v4317_v21, %v4248_v22  ;;  %7745 = vmatprep.mubr.f32.mxu0 %v1555_v16  ;;  %7815 = vmatprep.mubr.f32.mxu1 %v1556_v17  ;;  %v1606_v13 = vcombine.high %v1598_v6, %v1598_v6  ;;  %v469_v22 = vld [vmem:[%s11726_s9 + $0x540] sm:$0xff]  ;;  %v471_v23 = vld [vmem:[%s11726_s9 + $0x550] sm:$0xff] }
 0x187   : > { %7712 = vmatpush1.xpose.msra.mxu0 %v457_v25  ;;  %7782 = vmatpush1.xpose.msra.mxu1 %v459_v26  ;;  %v730_v25 = vld [vmem:[%s11726_s9 + $0xd68] sm:$0x3]  ;;  %v732_v26 = vld [vmem:[%s11726_s9 + $0xd78] sm:$0x3] }
 0x188   : > { %7849 = vmatprep.subr.mxu0 %v718_v28  ;;  %7919 = vmatprep.subr.mxu1 %v720_v29  ;;  %v1622_v28 = vrot.slane %v1608_v15, %v11752_v19  ;;  %v281_v29 = vld [vmem:[%s11720_s29 + $0x160] sm:$0xff] }
 0x18a   : > { %v4387_v40 = vpop.f32.mrf.mxu0  ;;  %7746 = vmatmul.mubr.f32.vlgmr.msra.gmra.mxu0 %v1547_v9  ;;  %v4457_v41 = vpop.f32.mrf.mxu1  ;;  %7816 = vmatmul.mubr.f32.vlgmr.msra.gmra.mxu1 %v1554_v10  ;;  %v725_v9 = vld [vmem:[%s11726_s9 + $0xd40] sm:$0x3]  ;;  %v727_v10 = vld [vmem:[%s11726_s9 + $0xd50] sm:$0x3] }
 0x18b   : > { %v4388_v42 = vadd.f32 %v4387_v40, %v4318_v27  ;;  %7850 = vmatpush1.xpose.msra.mxu0 %v717_v33  ;;  %7920 = vmatpush1.xpose.msra.mxu1 %v719_v34  ;;  %v1615_v27 = vrot.slane %v280_v8, %v11752_v19  ;;  %v476_v33 = vld [vmem:[%s11726_s9 + $0x578] sm:$0xff]  ;;  %v482_v8 = vld [vmem:[%s11726_s9 + $0x5a8] sm:$0xff] }
 0x18c   : > { %v4389_v43 = vpop.f32.mrf.mxu0  ;;  %v4459_v44 = vpop.f32.mrf.mxu1  ;;  %7851 = vmatprep.subr.mxu0 %v462_v35  ;;  %7921 = vmatprep.subr.mxu1 %v464_v36  ;;  %v1624_v35 = vcombine.high %v1622_v28, %v1622_v28  ;;  %v1625_v36 = vcombine.high %v281_v29, %v281_v29 }
 0x18d   : > { %v4458_v47 = vadd.f32 %v4457_v41, %v4388_v42  ;;  %7885 = vmatprep.mubr.f32.mxu0 %v1572_v37  ;;  %7955 = vmatprep.mubr.f32.mxu1 %v1573_v38  ;;  %v1623_v34 = vcombine.high %v1615_v27, %v1615_v27  ;;  %v473_v42 = vld [vmem:[%s11726_s9 + $0x560] sm:$0xff]  ;;  %v475_v43 = vld [vmem:[%s11726_s9 + $0x570] sm:$0xff] }
 0x18f   : > { %7852 = vmatpush1.xpose.msra.mxu0 %v461_v45  ;;  %7922 = vmatpush1.xpose.msra.mxu1 %v463_v46  ;;  %v734_v45 = vld [vmem:[%s11726_s9 + $0xd88] sm:$0x3]  ;;  %v736_v46 = vld [vmem:[%s11726_s9 + $0xd98] sm:$0x3] }
 0x190   : > { %7989 = vmatprep.subr.mxu0 %v722_v48  ;;  %8059 = vmatprep.subr.mxu1 %v724_v49  ;;  %v1639_v48 = vrot.slane %v1625_v36, %v11752_v19  ;;  %v282_v49 = vld [vmem:[%s11720_s29 + $0x168] sm:$0xff] }
 0x192   : > { %v4527_v60 = vpop.f32.mrf.mxu0  ;;  %7886 = vmatmul.mubr.f32.vlgmr.msra.gmra.mxu0 %v1564_v30  ;;  %v4597_v61 = vpop.f32.mrf.mxu1  ;;  %7956 = vmatmul.mubr.f32.vlgmr.msra.gmra.mxu1 %v1571_v31  ;;  %v729_v30 = vld [vmem:[%s11726_s9 + $0xd60] sm:$0x3]  ;;  %v731_v31 = vld [vmem:[%s11726_s9 + $0xd70] sm:$0x3] }
 0x193   : > { %v4528_v62 = vadd.f32 %v4527_v60, %v4458_v47  ;;  %7990 = vmatpush1.xpose.msra.mxu0 %v721_v53  ;;  %8060 = vmatpush1.xpose.msra.mxu1 %v723_v54  ;;  %v1632_v47 = vrot.slane %v281_v29, %v11752_v19  ;;  %v480_v53 = vld [vmem:[%s11726_s9 + $0x598] sm:$0xff]  ;;  %v486_v29 = vld [vmem:[%s11726_s9 + $0x5c8] sm:$0xff] }
 0x194   : > { %v4529_v63 = vpop.f32.mrf.mxu0  ;;  %v4599_v0 = vpop.f32.mrf.mxu1  ;;  %7991 = vmatprep.subr.mxu0 %v466_v55  ;;  %8061 = vmatprep.subr.mxu1 %v468_v56  ;;  %v1641_v55 = vcombine.high %v1639_v48, %v1639_v48  ;;  %v1642_v56 = vcombine.high %v282_v49, %v282_v49 }
 0x195   : > { %v4598_v3 = vadd.f32 %v4597_v61, %v4528_v62  ;;  %8025 = vmatprep.mubr.f32.mxu0 %v1589_v57  ;;  %8095 = vmatprep.mubr.f32.mxu1 %v1590_v58  ;;  %v1640_v54 = vcombine.high %v1632_v47, %v1632_v47  ;;  %v477_v62 = vld [vmem:[%s11726_s9 + $0x580] sm:$0xff]  ;;  %v479_v63 = vld [vmem:[%s11726_s9 + $0x590] sm:$0xff] }
 0x197   : > { %7992 = vmatpush1.xpose.msra.mxu0 %v465_v1  ;;  %8062 = vmatpush1.xpose.msra.mxu1 %v467_v2  ;;  %v738_v1 = vld [vmem:[%s11726_s9 + $0xda8] sm:$0x3]  ;;  %v740_v2 = vld [vmem:[%s11726_s9 + $0xdb8] sm:$0x3] }
 0x198   : > { %8129 = vmatprep.subr.mxu0 %v726_v4  ;;  %8199 = vmatprep.subr.mxu1 %v728_v5  ;;  %v1656_v4 = vrot.slane %v1642_v56, %v11752_v19  ;;  %v283_v5 = vld [vmem:[%s11720_s29 + $0x170] sm:$0xff] }
 0x19a   : > { %v4667_v16 = vpop.f32.mrf.mxu0  ;;  %8026 = vmatmul.mubr.f32.vlgmr.msra.gmra.mxu0 %v1581_v50  ;;  %v4737_v17 = vpop.f32.mrf.mxu1  ;;  %8096 = vmatmul.mubr.f32.vlgmr.msra.gmra.mxu1 %v1588_v51  ;;  %v733_v50 = vld [vmem:[%s11726_s9 + $0xd80] sm:$0x3]  ;;  %v735_v51 = vld [vmem:[%s11726_s9 + $0xd90] sm:$0x3] }
 0x19b   : > { %v4668_v18 = vadd.f32 %v4667_v16, %v4598_v3  ;;  %8130 = vmatpush1.xpose.msra.mxu0 %v725_v9  ;;  %8200 = vmatpush1.xpose.msra.mxu1 %v727_v10  ;;  %v1649_v3 = vrot.slane %v282_v49, %v11752_v19  ;;  %v484_v9 = vld [vmem:[%s11726_s9 + $0x5b8] sm:$0xff]  ;;  %v490_v49 = vld [vmem:[%s11726_s9 + $0x5e8] sm:$0xff] }
 0x19c   : > { %v4669_v20 = vpop.f32.mrf.mxu0  ;;  %v4739_v21 = vpop.f32.mrf.mxu1  ;;  %8131 = vmatprep.subr.mxu0 %v470_v11  ;;  %8201 = vmatprep.subr.mxu1 %v472_v12  ;;  %v1658_v11 = vcombine.high %v1656_v4, %v1656_v4  ;;  %v1659_v12 = vcombine.high %v283_v5, %v283_v5 }
 0x19d   : > { %v4738_v24 = vadd.f32 %v4737_v17, %v4668_v18  ;;  %8165 = vmatprep.mubr.f32.mxu0 %v1606_v13  ;;  %8235 = vmatprep.mubr.f32.mxu1 %v1607_v14  ;;  %v1657_v10 = vcombine.high %v1649_v3, %v1649_v3  ;;  %v481_v18 = vld [vmem:[%s11726_s9 + $0x5a0] sm:$0xff]  ;;  %v483_v20 = vld [vmem:[%s11726_s9 + $0x5b0] sm:$0xff] }
 0x19f   : > { %8132 = vmatpush1.xpose.msra.mxu0 %v469_v22  ;;  %8202 = vmatpush1.xpose.msra.mxu1 %v471_v23  ;;  %v742_v22 = vld [vmem:[%s11726_s9 + $0xdc8] sm:$0x3]  ;;  %v744_v23 = vld [vmem:[%s11726_s9 + $0xdd8] sm:$0x3] }
 0x1a0   : > { %8269 = vmatprep.subr.mxu0 %v730_v25  ;;  %8339 = vmatprep.subr.mxu1 %v732_v26  ;;  %v1673_v25 = vrot.slane %v1659_v12, %v11752_v19  ;;  %v284_v26 = vld [vmem:[%s11720_s29 + $0x178] sm:$0xff] }
 0x1a2   : > { %v4807_v37 = vpop.f32.mrf.mxu0  ;;  %8166 = vmatmul.mubr.f32.vlgmr.msra.gmra.mxu0 %v1598_v6  ;;  %v4877_v38 = vpop.f32.mrf.mxu1  ;;  %8236 = vmatmul.mubr.f32.vlgmr.msra.gmra.mxu1 %v1605_v7  ;;  %v737_v6 = vld [vmem:[%s11726_s9 + $0xda0] sm:$0x3]  ;;  %v739_v7 = vld [vmem:[%s11726_s9 + $0xdb0] sm:$0x3] }
 0x1a3   : > { %v4808_v39 = vadd.f32 %v4807_v37, %v4738_v24  ;;  %8270 = vmatpush1.xpose.msra.mxu0 %v729_v30  ;;  %8340 = vmatpush1.xpose.msra.mxu1 %v731_v31  ;;  %v1666_v24 = vrot.slane %v283_v5, %v11752_v19  ;;  %v488_v30 = vld [vmem:[%s11726_s9 + $0x5d8] sm:$0xff]  ;;  %v494_v5 = vld [vmem:[%s11726_s9 + $0x608] sm:$0xff] }
 0x1a4   : > { %v4809_v40 = vpop.f32.mrf.mxu0  ;;  %v4879_v41 = vpop.f32.mrf.mxu1  ;;  %8271 = vmatprep.subr.mxu0 %v474_v32  ;;  %8341 = vmatprep.subr.mxu1 %v476_v33  ;;  %v1675_v32 = vcombine.high %v1673_v25, %v1673_v25  ;;  %v1676_v33 = vcombine.high %v284_v26, %v284_v26 }
 0x1a5   : > { %v4878_v44 = vadd.f32 %v4877_v38, %v4808_v39  ;;  %8305 = vmatprep.mubr.f32.mxu0 %v1623_v34  ;;  %8375 = vmatprep.mubr.f32.mxu1 %v1624_v35  ;;  %v1674_v31 = vcombine.high %v1666_v24, %v1666_v24  ;;  %v485_v39 = vld [vmem:[%s11726_s9 + $0x5c0] sm:$0xff]  ;;  %v487_v40 = vld [vmem:[%s11726_s9 + $0x5d0] sm:$0xff] }
 0x1a7   : > { %8272 = vmatpush1.xpose.msra.mxu0 %v473_v42  ;;  %8342 = vmatpush1.xpose.msra.mxu1 %v475_v43  ;;  %v746_v42 = vld [vmem:[%s11726_s9 + $0xde8] sm:$0x3]  ;;  %v748_v43 = vld [vmem:[%s11726_s9 + $0xdf8] sm:$0x3] }
 0x1a8   : > { %8409 = vmatprep.subr.mxu0 %v734_v45  ;;  %8479 = vmatprep.subr.mxu1 %v736_v46  ;;  %v1690_v45 = vrot.slane %v1676_v33, %v11752_v19  ;;  %v285_v46 = vld [vmem:[%s11720_s29 + $0x180] sm:$0xff] }
 0x1aa   : > { %v4947_v57 = vpop.f32.mrf.mxu0  ;;  %8306 = vmatmul.mubr.f32.vlgmr.msra.gmra.mxu0 %v1615_v27  ;;  %v5017_v58 = vpop.f32.mrf.mxu1  ;;  %8376 = vmatmul.mubr.f32.vlgmr.msra.gmra.mxu1 %v1622_v28  ;;  %v741_v27 = vld [vmem:[%s11726_s9 + $0xdc0] sm:$0x3]  ;;  %v743_v28 = vld [vmem:[%s11726_s9 + $0xdd0] sm:$0x3] }
 0x1ab   : > { %v4948_v59 = vadd.f32 %v4947_v57, %v4878_v44  ;;  %8410 = vmatpush1.xpose.msra.mxu0 %v733_v50  ;;  %8480 = vmatpush1.xpose.msra.mxu1 %v735_v51  ;;  %v1683_v44 = vrot.slane %v284_v26, %v11752_v19  ;;  %v492_v50 = vld [vmem:[%s11726_s9 + $0x5f8] sm:$0xff]  ;;  %v498_v26 = vld [vmem:[%s11726_s9 + $0x628] sm:$0xff] }
 0x1ac   : > { %v4949_v60 = vpop.f32.mrf.mxu0  ;;  %v5019_v61 = vpop.f32.mrf.mxu1  ;;  %8411 = vmatprep.subr.mxu0 %v478_v52  ;;  %8481 = vmatprep.subr.mxu1 %v480_v53  ;;  %v1692_v52 = vcombine.high %v1690_v45, %v1690_v45  ;;  %v1693_v53 = vcombine.high %v285_v46, %v285_v46 }
 0x1ad   : > { %v5018_v0 = vadd.f32 %v5017_v58, %v4948_v59  ;;  %8445 = vmatprep.mubr.f32.mxu0 %v1640_v54  ;;  %8515 = vmatprep.mubr.f32.mxu1 %v1641_v55  ;;  %v1691_v51 = vcombine.high %v1683_v44, %v1683_v44  ;;  %v489_v59 = vld [vmem:[%s11726_s9 + $0x5e0] sm:$0xff]  ;;  %v491_v60 = vld [vmem:[%s11726_s9 + $0x5f0] sm:$0xff] }
 0x1af   : > { %8412 = vmatpush1.xpose.msra.mxu0 %v477_v62  ;;  %8482 = vmatpush1.xpose.msra.mxu1 %v479_v63  ;;  %v750_v62 = vld [vmem:[%s11726_s9 + $0xe08] sm:$0x3]  ;;  %v752_v63 = vld [vmem:[%s11726_s9 + $0xe18] sm:$0x3] }
 0x1b0   : > { %8549 = vmatprep.subr.mxu0 %v738_v1  ;;  %8619 = vmatprep.subr.mxu1 %v740_v2  ;;  %v1707_v1 = vrot.slane %v1693_v53, %v11752_v19  ;;  %v286_v2 = vld [vmem:[%s11720_s29 + $0x188] sm:$0xff] }
 0x1b2   : > { %v5087_v13 = vpop.f32.mrf.mxu0  ;;  %8446 = vmatmul.mubr.f32.vlgmr.msra.gmra.mxu0 %v1632_v47  ;;  %v5157_v14 = vpop.f32.mrf.mxu1  ;;  %8516 = vmatmul.mubr.f32.vlgmr.msra.gmra.mxu1 %v1639_v48  ;;  %v745_v47 = vld [vmem:[%s11726_s9 + $0xde0] sm:$0x3]  ;;  %v747_v48 = vld [vmem:[%s11726_s9 + $0xdf0] sm:$0x3] }
 0x1b3   : > { %v5088_v15 = vadd.f32 %v5087_v13, %v5018_v0  ;;  %8550 = vmatpush1.xpose.msra.mxu0 %v737_v6  ;;  %8620 = vmatpush1.xpose.msra.mxu1 %v739_v7  ;;  %v1700_v0 = vrot.slane %v285_v46, %v11752_v19  ;;  %v496_v6 = vld [vmem:[%s11726_s9 + $0x618] sm:$0xff]  ;;  %v502_v46 = vld [vmem:[%s11726_s9 + $0x648] sm:$0xff] }
 0x1b4   : > { %v5089_v16 = vpop.f32.mrf.mxu0  ;;  %v5159_v17 = vpop.f32.mrf.mxu1  ;;  %8551 = vmatprep.subr.mxu0 %v482_v8  ;;  %8621 = vmatprep.subr.mxu1 %v484_v9  ;;  %v1709_v8 = vcombine.high %v1707_v1, %v1707_v1  ;;  %v1710_v9 = vcombine.high %v286_v2, %v286_v2 }
 0x1b5   : > { %v5158_v21 = vadd.f32 %v5157_v14, %v5088_v15  ;;  %8585 = vmatprep.mubr.f32.mxu0 %v1657_v10  ;;  %8655 = vmatprep.mubr.f32.mxu1 %v1658_v11  ;;  %v1708_v7 = vcombine.high %v1700_v0, %v1700_v0  ;;  %v493_v15 = vld [vmem:[%s11726_s9 + $0x600] sm:$0xff]  ;;  %v495_v16 = vld [vmem:[%s11726_s9 + $0x610] sm:$0xff] }
 0x1b7   : > { %8552 = vmatpush1.xpose.msra.mxu0 %v481_v18  ;;  %8622 = vmatpush1.xpose.msra.mxu1 %v483_v20  ;;  %v754_v18 = vld [vmem:[%s11726_s9 + $0xe28] sm:$0x3]  ;;  %v756_v20 = vld [vmem:[%s11726_s9 + $0xe38] sm:$0x3] }
 0x1b8   : > { %8689 = vmatprep.subr.mxu0 %v742_v22  ;;  %8759 = vmatprep.subr.mxu1 %v744_v23  ;;  %v1724_v22 = vrot.slane %v1710_v9, %v11752_v19  ;;  %v287_v23 = vld [vmem:[%s11720_s29 + $0x190] sm:$0xff] }
 0x1ba   : > { %v5227_v34 = vpop.f32.mrf.mxu0  ;;  %8586 = vmatmul.mubr.f32.vlgmr.msra.gmra.mxu0 %v1649_v3  ;;  %v5297_v35 = vpop.f32.mrf.mxu1  ;;  %8656 = vmatmul.mubr.f32.vlgmr.msra.gmra.mxu1 %v1656_v4  ;;  %v749_v3 = vld [vmem:[%s11726_s9 + $0xe00] sm:$0x3]  ;;  %v751_v4 = vld [vmem:[%s11726_s9 + $0xe10] sm:$0x3] }
 0x1bb   : > { %v5228_v36 = vadd.f32 %v5227_v34, %v5158_v21  ;;  %8690 = vmatpush1.xpose.msra.mxu0 %v741_v27  ;;  %8760 = vmatpush1.xpose.msra.mxu1 %v743_v28  ;;  %v1717_v21 = vrot.slane %v286_v2, %v11752_v19  ;;  %v500_v27 = vld [vmem:[%s11726_s9 + $0x638] sm:$0xff]  ;;  %v506_v2 = vld [vmem:[%s11726_s9 + $0x668] sm:$0xff] }
 0x1bc   : > { %v5229_v37 = vpop.f32.mrf.mxu0  ;;  %v5299_v38 = vpop.f32.mrf.mxu1  ;;  %8691 = vmatprep.subr.mxu0 %v486_v29  ;;  %8761 = vmatprep.subr.mxu1 %v488_v30  ;;  %v1726_v29 = vcombine.high %v1724_v22, %v1724_v22  ;;  %v1727_v30 = vcombine.high %v287_v23, %v287_v23 }
 0x1bd   : > { %v5298_v41 = vadd.f32 %v5297_v35, %v5228_v36  ;;  %8725 = vmatprep.mubr.f32.mxu0 %v1674_v31  ;;  %8795 = vmatprep.mubr.f32.mxu1 %v1675_v32  ;;  %v1725_v28 = vcombine.high %v1717_v21, %v1717_v21  ;;  %v497_v36 = vld [vmem:[%s11726_s9 + $0x620] sm:$0xff]  ;;  %v499_v37 = vld [vmem:[%s11726_s9 + $0x630] sm:$0xff] }
 0x1bf   : > { %8692 = vmatpush1.xpose.msra.mxu0 %v485_v39  ;;  %8762 = vmatpush1.xpose.msra.mxu1 %v487_v40  ;;  %v758_v39 = vld [vmem:[%s11726_s9 + $0xe48] sm:$0x3]  ;;  %v760_v40 = vld [vmem:[%s11726_s9 + $0xe58] sm:$0x3] }
 0x1c0   : > { %8829 = vmatprep.subr.mxu0 %v746_v42  ;;  %8899 = vmatprep.subr.mxu1 %v748_v43  ;;  %v1741_v42 = vrot.slane %v1727_v30, %v11752_v19  ;;  %v288_v43 = vld [vmem:[%s11720_s29 + $0x198] sm:$0xff] }
 0x1c2   : > { %v5367_v54 = vpop.f32.mrf.mxu0  ;;  %8726 = vmatmul.mubr.f32.vlgmr.msra.gmra.mxu0 %v1666_v24  ;;  %v5437_v55 = vpop.f32.mrf.mxu1  ;;  %8796 = vmatmul.mubr.f32.vlgmr.msra.gmra.mxu1 %v1673_v25  ;;  %v753_v24 = vld [vmem:[%s11726_s9 + $0xe20] sm:$0x3]  ;;  %v755_v25 = vld [vmem:[%s11726_s9 + $0xe30] sm:$0x3] }
 0x1c3   : > { %v5368_v56 = vadd.f32 %v5367_v54, %v5298_v41  ;;  %8830 = vmatpush1.xpose.msra.mxu0 %v745_v47  ;;  %8900 = vmatpush1.xpose.msra.mxu1 %v747_v48  ;;  %v1734_v41 = vrot.slane %v287_v23, %v11752_v19  ;;  %v504_v47 = vld [vmem:[%s11726_s9 + $0x658] sm:$0xff]  ;;  %v510_v23 = vld [vmem:[%s11726_s9 + $0x688] sm:$0xff] }
 0x1c4   : > { %v5369_v57 = vpop.f32.mrf.mxu0  ;;  %v5439_v58 = vpop.f32.mrf.mxu1  ;;  %8831 = vmatprep.subr.mxu0 %v490_v49  ;;  %8901 = vmatprep.subr.mxu1 %v492_v50  ;;  %v1743_v49 = vcombine.high %v1741_v42, %v1741_v42  ;;  %v1744_v50 = vcombine.high %v288_v43, %v288_v43 }
 0x1c5   : > { %v5438_v61 = vadd.f32 %v5437_v55, %v5368_v56  ;;  %8865 = vmatprep.mubr.f32.mxu0 %v1691_v51  ;;  %8935 = vmatprep.mubr.f32.mxu1 %v1692_v52  ;;  %v1742_v48 = vcombine.high %v1734_v41, %v1734_v41  ;;  %v501_v56 = vld [vmem:[%s11726_s9 + $0x640] sm:$0xff]  ;;  %v503_v57 = vld [vmem:[%s11726_s9 + $0x650] sm:$0xff] }
 0x1c7   : > { %8832 = vmatpush1.xpose.msra.mxu0 %v489_v59  ;;  %8902 = vmatpush1.xpose.msra.mxu1 %v491_v60  ;;  %v762_v59 = vld [vmem:[%s11726_s9 + $0xe68] sm:$0x3]  ;;  %v764_v60 = vld [vmem:[%s11726_s9 + $0xe78] sm:$0x3] }
 0x1c8   : > { %8969 = vmatprep.subr.mxu0 %v750_v62  ;;  %9039 = vmatprep.subr.mxu1 %v752_v63  ;;  %v1758_v62 = vrot.slane %v1744_v50, %v11752_v19  ;;  %v289_v63 = vld [vmem:[%s11720_s29 + $0x1a0] sm:$0xff] }
 0x1ca   : > { %v5507_v10 = vpop.f32.mrf.mxu0  ;;  %8866 = vmatmul.mubr.f32.vlgmr.msra.gmra.mxu0 %v1683_v44  ;;  %v5577_v11 = vpop.f32.mrf.mxu1  ;;  %8936 = vmatmul.mubr.f32.vlgmr.msra.gmra.mxu1 %v1690_v45  ;;  %v757_v44 = vld [vmem:[%s11726_s9 + $0xe40] sm:$0x3]  ;;  %v759_v45 = vld [vmem:[%s11726_s9 + $0xe50] sm:$0x3] }
 0x1cb   : > { %v5508_v12 = vadd.f32 %v5507_v10, %v5438_v61  ;;  %8970 = vmatpush1.xpose.msra.mxu0 %v749_v3  ;;  %9040 = vmatpush1.xpose.msra.mxu1 %v751_v4  ;;  %v1751_v61 = vrot.slane %v288_v43, %v11752_v19  ;;  %v508_v3 = vld [vmem:[%s11726_s9 + $0x678] sm:$0xff]  ;;  %v514_v43 = vld [vmem:[%s11726_s9 + $0x6a8] sm:$0xff] }
 0x1cc   : > { %v5509_v13 = vpop.f32.mrf.mxu0  ;;  %v5579_v14 = vpop.f32.mrf.mxu1  ;;  %8971 = vmatprep.subr.mxu0 %v494_v5  ;;  %9041 = vmatprep.subr.mxu1 %v496_v6  ;;  %v1760_v5 = vcombine.high %v1758_v62, %v1758_v62  ;;  %v1761_v6 = vcombine.high %v289_v63, %v289_v63 }
 0x1cd   : > { %v5578_v17 = vadd.f32 %v5577_v11, %v5508_v12  ;;  %9005 = vmatprep.mubr.f32.mxu0 %v1708_v7  ;;  %9075 = vmatprep.mubr.f32.mxu1 %v1709_v8  ;;  %v1759_v4 = vcombine.high %v1751_v61, %v1751_v61  ;;  %v505_v12 = vld [vmem:[%s11726_s9 + $0x660] sm:$0xff]  ;;  %v507_v13 = vld [vmem:[%s11726_s9 + $0x670] sm:$0xff] }
 0x1cf   : > { %8972 = vmatpush1.xpose.msra.mxu0 %v493_v15  ;;  %9042 = vmatpush1.xpose.msra.mxu1 %v495_v16  ;;  %v766_v15 = vld [vmem:[%s11726_s9 + $0xe88] sm:$0x3]  ;;  %v768_v16 = vld [vmem:[%s11726_s9 + $0xe98] sm:$0x3] }
 0x1d0   : > { %9109 = vmatprep.subr.mxu0 %v754_v18  ;;  %9179 = vmatprep.subr.mxu1 %v756_v20  ;;  %v1775_v18 = vrot.slane %v1761_v6, %v11752_v19  ;;  %v290_v20 = vld [vmem:[%s11720_s29 + $0x1a8] sm:$0xff] }
 0x1d2   : > { %v5647_v31 = vpop.f32.mrf.mxu0  ;;  %9006 = vmatmul.mubr.f32.vlgmr.msra.gmra.mxu0 %v1700_v0  ;;  %v5717_v32 = vpop.f32.mrf.mxu1  ;;  %9076 = vmatmul.mubr.f32.vlgmr.msra.gmra.mxu1 %v1707_v1  ;;  %v761_v0 = vld [vmem:[%s11726_s9 + $0xe60] sm:$0x3]  ;;  %v763_v1 = vld [vmem:[%s11726_s9 + $0xe70] sm:$0x3] }
 0x1d3   : > { %v5648_v33 = vadd.f32 %v5647_v31, %v5578_v17  ;;  %9110 = vmatpush1.xpose.msra.mxu0 %v753_v24  ;;  %9180 = vmatpush1.xpose.msra.mxu1 %v755_v25  ;;  %v1768_v17 = vrot.slane %v289_v63, %v11752_v19  ;;  %v512_v24 = vld [vmem:[%s11726_s9 + $0x698] sm:$0xff]  ;;  %v518_v63 = vld [vmem:[%s11726_s9 + $0x6c8] sm:$0xff] }
 0x1d4   : > { %v5649_v34 = vpop.f32.mrf.mxu0  ;;  %v5719_v35 = vpop.f32.mrf.mxu1  ;;  %9111 = vmatprep.subr.mxu0 %v498_v26  ;;  %9181 = vmatprep.subr.mxu1 %v500_v27  ;;  %v1777_v26 = vcombine.high %v1775_v18, %v1775_v18  ;;  %v1778_v27 = vcombine.high %v290_v20, %v290_v20 }
 0x1d5   : > { %v5718_v38 = vadd.f32 %v5717_v32, %v5648_v33  ;;  %9145 = vmatprep.mubr.f32.mxu0 %v1725_v28  ;;  %9215 = vmatprep.mubr.f32.mxu1 %v1726_v29  ;;  %v1776_v25 = vcombine.high %v1768_v17, %v1768_v17  ;;  %v509_v33 = vld [vmem:[%s11726_s9 + $0x680] sm:$0xff]  ;;  %v511_v34 = vld [vmem:[%s11726_s9 + $0x690] sm:$0xff] }
 0x1d7   : > { %9112 = vmatpush1.xpose.msra.mxu0 %v497_v36  ;;  %9182 = vmatpush1.xpose.msra.mxu1 %v499_v37  ;;  %v770_v36 = vld [vmem:[%s11726_s9 + $0xea8] sm:$0x3]  ;;  %v772_v37 = vld [vmem:[%s11726_s9 + $0xeb8] sm:$0x3] }
 0x1d8   : > { %9249 = vmatprep.subr.mxu0 %v758_v39  ;;  %9319 = vmatprep.subr.mxu1 %v760_v40  ;;  %v1792_v39 = vrot.slane %v1778_v27, %v11752_v19  ;;  %v291_v40 = vld [vmem:[%s11720_s29 + $0x1b0] sm:$0xff] }
 0x1da   : > { %v5787_v51 = vpop.f32.mrf.mxu0  ;;  %9146 = vmatmul.mubr.f32.vlgmr.msra.gmra.mxu0 %v1717_v21  ;;  %v5857_v52 = vpop.f32.mrf.mxu1  ;;  %9216 = vmatmul.mubr.f32.vlgmr.msra.gmra.mxu1 %v1724_v22  ;;  %v765_v21 = vld [vmem:[%s11726_s9 + $0xe80] sm:$0x3]  ;;  %v767_v22 = vld [vmem:[%s11726_s9 + $0xe90] sm:$0x3] }
 0x1db   : > { %v5788_v53 = vadd.f32 %v5787_v51, %v5718_v38  ;;  %9250 = vmatpush1.xpose.msra.mxu0 %v757_v44  ;;  %9320 = vmatpush1.xpose.msra.mxu1 %v759_v45  ;;  %v1785_v38 = vrot.slane %v290_v20, %v11752_v19  ;;  %v516_v44 = vld [vmem:[%s11726_s9 + $0x6b8] sm:$0xff]  ;;  %v522_v20 = vld [vmem:[%s11726_s9 + $0x6e8] sm:$0xff] }
 0x1dc   : > { %v5789_v54 = vpop.f32.mrf.mxu0  ;;  %v5859_v55 = vpop.f32.mrf.mxu1  ;;  %9251 = vmatprep.subr.mxu0 %v502_v46  ;;  %9321 = vmatprep.subr.mxu1 %v504_v47  ;;  %v1794_v46 = vcombine.high %v1792_v39, %v1792_v39  ;;  %v1795_v47 = vcombine.high %v291_v40, %v291_v40 }
 0x1dd   : > { %v5858_v58 = vadd.f32 %v5857_v52, %v5788_v53  ;;  %9285 = vmatprep.mubr.f32.mxu0 %v1742_v48  ;;  %9355 = vmatprep.mubr.f32.mxu1 %v1743_v49  ;;  %v1793_v45 = vcombine.high %v1785_v38, %v1785_v38  ;;  %v513_v53 = vld [vmem:[%s11726_s9 + $0x6a0] sm:$0xff]  ;;  %v515_v54 = vld [vmem:[%s11726_s9 + $0x6b0] sm:$0xff] }
 0x1df   : > { %9252 = vmatpush1.xpose.msra.mxu0 %v501_v56  ;;  %9322 = vmatpush1.xpose.msra.mxu1 %v503_v57  ;;  %v774_v56 = vld [vmem:[%s11726_s9 + $0xec8] sm:$0x3]  ;;  %v776_v57 = vld [vmem:[%s11726_s9 + $0xed8] sm:$0x3] }
 0x1e0   : > { %9389 = vmatprep.subr.mxu0 %v762_v59  ;;  %9459 = vmatprep.subr.mxu1 %v764_v60  ;;  %v1809_v59 = vrot.slane %v1795_v47, %v11752_v19  ;;  %v292_v60 = vld [vmem:[%s11720_s29 + $0x1b8] sm:$0xff] }
 0x1e2   : > { %v5927_v7 = vpop.f32.mrf.mxu0  ;;  %9286 = vmatmul.mubr.f32.vlgmr.msra.gmra.mxu0 %v1734_v41  ;;  %v5997_v8 = vpop.f32.mrf.mxu1  ;;  %9356 = vmatmul.mubr.f32.vlgmr.msra.gmra.mxu1 %v1741_v42  ;;  %v769_v41 = vld [vmem:[%s11726_s9 + $0xea0] sm:$0x3]  ;;  %v771_v42 = vld [vmem:[%s11726_s9 + $0xeb0] sm:$0x3] }
 0x1e3   : > { %v5928_v9 = vadd.f32 %v5927_v7, %v5858_v58  ;;  %9390 = vmatpush1.xpose.msra.mxu0 %v761_v0  ;;  %9460 = vmatpush1.xpose.msra.mxu1 %v763_v1  ;;  %v1802_v58 = vrot.slane %v291_v40, %v11752_v19  ;;  %v520_v0 = vld [vmem:[%s11726_s9 + $0x6d8] sm:$0xff]  ;;  %v526_v40 = vld [vmem:[%s11726_s9 + $0x708] sm:$0xff] }
 0x1e4   : > { %v5929_v10 = vpop.f32.mrf.mxu0  ;;  %v5999_v11 = vpop.f32.mrf.mxu1  ;;  %9391 = vmatprep.subr.mxu0 %v506_v2  ;;  %9461 = vmatprep.subr.mxu1 %v508_v3  ;;  %v1811_v2 = vcombine.high %v1809_v59, %v1809_v59  ;;  %v1812_v3 = vcombine.high %v292_v60, %v292_v60 }
 0x1e5   : > { %v5998_v14 = vadd.f32 %v5997_v8, %v5928_v9  ;;  %9425 = vmatprep.mubr.f32.mxu0 %v1759_v4  ;;  %9495 = vmatprep.mubr.f32.mxu1 %v1760_v5  ;;  %v1810_v1 = vcombine.high %v1802_v58, %v1802_v58  ;;  %v517_v9 = vld [vmem:[%s11726_s9 + $0x6c0] sm:$0xff]  ;;  %v519_v10 = vld [vmem:[%s11726_s9 + $0x6d0] sm:$0xff] }
 0x1e7   : > { %9392 = vmatpush1.xpose.msra.mxu0 %v505_v12  ;;  %9462 = vmatpush1.xpose.msra.mxu1 %v507_v13  ;;  %v778_v12 = vld [vmem:[%s11726_s9 + $0xee8] sm:$0x3]  ;;  %v780_v13 = vld [vmem:[%s11726_s9 + $0xef8] sm:$0x3] }
 0x1e8   : > { %9529 = vmatprep.subr.mxu0 %v766_v15  ;;  %9599 = vmatprep.subr.mxu1 %v768_v16  ;;  %v1826_v15 = vrot.slane %v1812_v3, %v11752_v19  ;;  %v293_v16 = vld [vmem:[%s11720_s29 + $0x1c0] sm:$0xff] }
 0x1ea   : > { %v6067_v28 = vpop.f32.mrf.mxu0  ;;  %9426 = vmatmul.mubr.f32.vlgmr.msra.gmra.mxu0 %v1751_v61  ;;  %v6137_v29 = vpop.f32.mrf.mxu1  ;;  %9496 = vmatmul.mubr.f32.vlgmr.msra.gmra.mxu1 %v1758_v62  ;;  %v773_v61 = vld [vmem:[%s11726_s9 + $0xec0] sm:$0x3]  ;;  %v775_v62 = vld [vmem:[%s11726_s9 + $0xed0] sm:$0x3] }
 0x1eb   : > { %v6068_v30 = vadd.f32 %v6067_v28, %v5998_v14  ;;  %9530 = vmatpush1.xpose.msra.mxu0 %v765_v21  ;;  %9600 = vmatpush1.xpose.msra.mxu1 %v767_v22  ;;  %v1819_v14 = vrot.slane %v292_v60, %v11752_v19  ;;  %v524_v21 = vld [vmem:[%s11726_s9 + $0x6f8] sm:$0xff]  ;;  %v530_v60 = vld [vmem:[%s11726_s9 + $0x728] sm:$0xff] }
 0x1ec   : > { %v6069_v31 = vpop.f32.mrf.mxu0  ;;  %v6139_v32 = vpop.f32.mrf.mxu1  ;;  %9531 = vmatprep.subr.mxu0 %v510_v23  ;;  %9601 = vmatprep.subr.mxu1 %v512_v24  ;;  %v1828_v23 = vcombine.high %v1826_v15, %v1826_v15  ;;  %v1829_v24 = vcombine.high %v293_v16, %v293_v16 }
 0x1ed   : > { %v6138_v35 = vadd.f32 %v6137_v29, %v6068_v30  ;;  %9565 = vmatprep.mubr.f32.mxu0 %v1776_v25  ;;  %9635 = vmatprep.mubr.f32.mxu1 %v1777_v26  ;;  %v1827_v22 = vcombine.high %v1819_v14, %v1819_v14  ;;  %v521_v30 = vld [vmem:[%s11726_s9 + $0x6e0] sm:$0xff]  ;;  %v523_v31 = vld [vmem:[%s11726_s9 + $0x6f0] sm:$0xff] }
 0x1ef   : > { %9532 = vmatpush1.xpose.msra.mxu0 %v509_v33  ;;  %9602 = vmatpush1.xpose.msra.mxu1 %v511_v34  ;;  %v782_v33 = vld [vmem:[%s11726_s9 + $0xf08] sm:$0x3]  ;;  %v784_v34 = vld [vmem:[%s11726_s9 + $0xf18] sm:$0x3] }
 0x1f0   : > { %9669 = vmatprep.subr.mxu0 %v770_v36  ;;  %9739 = vmatprep.subr.mxu1 %v772_v37  ;;  %v1843_v36 = vrot.slane %v1829_v24, %v11752_v19  ;;  %v294_v37 = vld [vmem:[%s11720_s29 + $0x1c8] sm:$0xff] }
 0x1f2   : > { %v6207_v48 = vpop.f32.mrf.mxu0  ;;  %9566 = vmatmul.mubr.f32.vlgmr.msra.gmra.mxu0 %v1768_v17  ;;  %v6277_v49 = vpop.f32.mrf.mxu1  ;;  %9636 = vmatmul.mubr.f32.vlgmr.msra.gmra.mxu1 %v1775_v18  ;;  %v777_v17 = vld [vmem:[%s11726_s9 + $0xee0] sm:$0x3]  ;;  %v779_v18 = vld [vmem:[%s11726_s9 + $0xef0] sm:$0x3] }
 0x1f3   : > { %v6208_v50 = vadd.f32 %v6207_v48, %v6138_v35  ;;  %9670 = vmatpush1.xpose.msra.mxu0 %v769_v41  ;;  %9740 = vmatpush1.xpose.msra.mxu1 %v771_v42  ;;  %v1836_v35 = vrot.slane %v293_v16, %v11752_v19  ;;  %v528_v41 = vld [vmem:[%s11726_s9 + $0x718] sm:$0xff]  ;;  %v534_v16 = vld [vmem:[%s11726_s9 + $0x748] sm:$0xff] }
 0x1f4   : > { %v6209_v51 = vpop.f32.mrf.mxu0  ;;  %v6279_v52 = vpop.f32.mrf.mxu1  ;;  %9671 = vmatprep.subr.mxu0 %v514_v43  ;;  %9741 = vmatprep.subr.mxu1 %v516_v44  ;;  %v1845_v43 = vcombine.high %v1843_v36, %v1843_v36  ;;  %v1846_v44 = vcombine.high %v294_v37, %v294_v37 }
 0x1f5   : > { %v6278_v55 = vadd.f32 %v6277_v49, %v6208_v50  ;;  %9705 = vmatprep.mubr.f32.mxu0 %v1793_v45  ;;  %9775 = vmatprep.mubr.f32.mxu1 %v1794_v46  ;;  %v1844_v42 = vcombine.high %v1836_v35, %v1836_v35  ;;  %v525_v50 = vld [vmem:[%s11726_s9 + $0x700] sm:$0xff]  ;;  %v527_v51 = vld [vmem:[%s11726_s9 + $0x710] sm:$0xff] }
 0x1f7   : > { %9672 = vmatpush1.xpose.msra.mxu0 %v513_v53  ;;  %9742 = vmatpush1.xpose.msra.mxu1 %v515_v54  ;;  %v786_v53 = vld [vmem:[%s11726_s9 + $0xf28] sm:$0x3]  ;;  %v788_v54 = vld [vmem:[%s11726_s9 + $0xf38] sm:$0x3] }
 0x1f8   : > { %9809 = vmatprep.subr.mxu0 %v774_v56  ;;  %9879 = vmatprep.subr.mxu1 %v776_v57  ;;  %v1860_v56 = vrot.slane %v1846_v44, %v11752_v19  ;;  %v295_v57 = vld [vmem:[%s11720_s29 + $0x1d0] sm:$0xff] }
 0x1fa   : > { %v6347_v4 = vpop.f32.mrf.mxu0  ;;  %9706 = vmatmul.mubr.f32.vlgmr.msra.gmra.mxu0 %v1785_v38  ;;  %v6417_v5 = vpop.f32.mrf.mxu1  ;;  %9776 = vmatmul.mubr.f32.vlgmr.msra.gmra.mxu1 %v1792_v39  ;;  %v781_v38 = vld [vmem:[%s11726_s9 + $0xf00] sm:$0x3]  ;;  %v783_v39 = vld [vmem:[%s11726_s9 + $0xf10] sm:$0x3] }
 0x1fb   : > { %v6348_v6 = vadd.f32 %v6347_v4, %v6278_v55  ;;  %9810 = vmatpush1.xpose.msra.mxu0 %v773_v61  ;;  %9880 = vmatpush1.xpose.msra.mxu1 %v775_v62  ;;  %v1853_v55 = vrot.slane %v294_v37, %v11752_v19  ;;  %v532_v61 = vld [vmem:[%s11726_s9 + $0x738] sm:$0xff]  ;;  %v538_v37 = vld [vmem:[%s11726_s9 + $0x768] sm:$0xff] }
 0x1fc   : > { %v6349_v7 = vpop.f32.mrf.mxu0  ;;  %v6419_v8 = vpop.f32.mrf.mxu1  ;;  %9811 = vmatprep.subr.mxu0 %v518_v63  ;;  %9881 = vmatprep.subr.mxu1 %v520_v0  ;;  %v1862_v63 = vcombine.high %v1860_v56, %v1860_v56  ;;  %v1863_v0 = vcombine.high %v295_v57, %v295_v57 }
 0x1fd   : > { %v6418_v11 = vadd.f32 %v6417_v5, %v6348_v6  ;;  %9845 = vmatprep.mubr.f32.mxu0 %v1810_v1  ;;  %9915 = vmatprep.mubr.f32.mxu1 %v1811_v2  ;;  %v1861_v62 = vcombine.high %v1853_v55, %v1853_v55  ;;  %v529_v6 = vld [vmem:[%s11726_s9 + $0x720] sm:$0xff]  ;;  %v531_v7 = vld [vmem:[%s11726_s9 + $0x730] sm:$0xff] }
 0x1ff   : > { %9812 = vmatpush1.xpose.msra.mxu0 %v517_v9  ;;  %9882 = vmatpush1.xpose.msra.mxu1 %v519_v10  ;;  %v790_v9 = vld [vmem:[%s11726_s9 + $0xf48] sm:$0x3]  ;;  %v792_v10 = vld [vmem:[%s11726_s9 + $0xf58] sm:$0x3] }
 0x200   : > { %9949 = vmatprep.subr.mxu0 %v778_v12  ;;  %10019 = vmatprep.subr.mxu1 %v780_v13  ;;  %v1877_v12 = vrot.slane %v1863_v0, %v11752_v19  ;;  %v296_v13 = vld [vmem:[%s11720_s29 + $0x1d8] sm:$0xff] }
 0x202   : > { %v6487_v25 = vpop.f32.mrf.mxu0  ;;  %9846 = vmatmul.mubr.f32.vlgmr.msra.gmra.mxu0 %v1802_v58  ;;  %v6557_v26 = vpop.f32.mrf.mxu1  ;;  %9916 = vmatmul.mubr.f32.vlgmr.msra.gmra.mxu1 %v1809_v59  ;;  %v785_v58 = vld [vmem:[%s11726_s9 + $0xf20] sm:$0x3]  ;;  %v787_v59 = vld [vmem:[%s11726_s9 + $0xf30] sm:$0x3] }
 0x203   : > { %v6488_v27 = vadd.f32 %v6487_v25, %v6418_v11  ;;  %9950 = vmatpush1.xpose.msra.mxu0 %v777_v17  ;;  %10020 = vmatpush1.xpose.msra.mxu1 %v779_v18  ;;  %v1870_v11 = vrot.slane %v295_v57, %v11752_v19  ;;  %v536_v17 = vld [vmem:[%s11726_s9 + $0x758] sm:$0xff]  ;;  %v542_v57 = vld [vmem:[%s11726_s9 + $0x788] sm:$0xff] }
 0x204   : > { %v6489_v28 = vpop.f32.mrf.mxu0  ;;  %v6559_v29 = vpop.f32.mrf.mxu1  ;;  %9951 = vmatprep.subr.mxu0 %v522_v20  ;;  %10021 = vmatprep.subr.mxu1 %v524_v21  ;;  %v1879_v20 = vcombine.high %v1877_v12, %v1877_v12  ;;  %v1880_v21 = vcombine.high %v296_v13, %v296_v13 }
 0x205   : > { %v6558_v32 = vadd.f32 %v6557_v26, %v6488_v27  ;;  %9985 = vmatprep.mubr.f32.mxu0 %v1827_v22  ;;  %10055 = vmatprep.mubr.f32.mxu1 %v1828_v23  ;;  %v1878_v18 = vcombine.high %v1870_v11, %v1870_v11  ;;  %v533_v27 = vld [vmem:[%s11726_s9 + $0x740] sm:$0xff]  ;;  %v535_v28 = vld [vmem:[%s11726_s9 + $0x750] sm:$0xff] }
 0x207   : > { %9952 = vmatpush1.xpose.msra.mxu0 %v521_v30  ;;  %10022 = vmatpush1.xpose.msra.mxu1 %v523_v31  ;;  %v794_v30 = vld [vmem:[%s11726_s9 + $0xf68] sm:$0x3]  ;;  %v796_v31 = vld [vmem:[%s11726_s9 + $0xf78] sm:$0x3] }
 0x208   : > { %10089 = vmatprep.subr.mxu0 %v782_v33  ;;  %10159 = vmatprep.subr.mxu1 %v784_v34  ;;  %v1894_v33 = vrot.slane %v1880_v21, %v11752_v19  ;;  %v297_v34 = vld [vmem:[%s11720_s29 + $0x1e0] sm:$0xff] }
 0x20a   : > { %v6627_v45 = vpop.f32.mrf.mxu0  ;;  %9986 = vmatmul.mubr.f32.vlgmr.msra.gmra.mxu0 %v1819_v14  ;;  %v6697_v46 = vpop.f32.mrf.mxu1  ;;  %10056 = vmatmul.mubr.f32.vlgmr.msra.gmra.mxu1 %v1826_v15  ;;  %v789_v14 = vld [vmem:[%s11726_s9 + $0xf40] sm:$0x3]  ;;  %v791_v15 = vld [vmem:[%s11726_s9 + $0xf50] sm:$0x3] }
 0x20b   : > { %v6628_v47 = vadd.f32 %v6627_v45, %v6558_v32  ;;  %10090 = vmatpush1.xpose.msra.mxu0 %v781_v38  ;;  %10160 = vmatpush1.xpose.msra.mxu1 %v783_v39  ;;  %v1887_v32 = vrot.slane %v296_v13, %v11752_v19  ;;  %v540_v38 = vld [vmem:[%s11726_s9 + $0x778] sm:$0xff]  ;;  %v546_v13 = vld [vmem:[%s11726_s9 + $0x7a8] sm:$0xff] }
 0x20c   : > { %v6629_v48 = vpop.f32.mrf.mxu0  ;;  %v6699_v49 = vpop.f32.mrf.mxu1  ;;  %10091 = vmatprep.subr.mxu0 %v526_v40  ;;  %10161 = vmatprep.subr.mxu1 %v528_v41  ;;  %v1896_v40 = vcombine.high %v1894_v33, %v1894_v33  ;;  %v1897_v41 = vcombine.high %v297_v34, %v297_v34 }
 0x20d   : > { %v6698_v52 = vadd.f32 %v6697_v46, %v6628_v47  ;;  %10125 = vmatprep.mubr.f32.mxu0 %v1844_v42  ;;  %10195 = vmatprep.mubr.f32.mxu1 %v1845_v43  ;;  %v1895_v39 = vcombine.high %v1887_v32, %v1887_v32  ;;  %v537_v47 = vld [vmem:[%s11726_s9 + $0x760] sm:$0xff]  ;;  %v539_v48 = vld [vmem:[%s11726_s9 + $0x770] sm:$0xff] }
 0x20f   : > { %10092 = vmatpush1.xpose.msra.mxu0 %v525_v50  ;;  %10162 = vmatpush1.xpose.msra.mxu1 %v527_v51  ;;  %v798_v50 = vld [vmem:[%s11726_s9 + $0xf88] sm:$0x3]  ;;  %v800_v51 = vld [vmem:[%s11726_s9 + $0xf98] sm:$0x3] }
 0x210   : > { %10229 = vmatprep.subr.mxu0 %v786_v53  ;;  %10299 = vmatprep.subr.mxu1 %v788_v54  ;;  %v1911_v53 = vrot.slane %v1897_v41, %v11752_v19  ;;  %v298_v54 = vld [vmem:[%s11720_s29 + $0x1e8] sm:$0xff] }
 0x212   : > { %v6767_v1 = vpop.f32.mrf.mxu0  ;;  %10126 = vmatmul.mubr.f32.vlgmr.msra.gmra.mxu0 %v1836_v35  ;;  %v6837_v2 = vpop.f32.mrf.mxu1  ;;  %10196 = vmatmul.mubr.f32.vlgmr.msra.gmra.mxu1 %v1843_v36  ;;  %v793_v35 = vld [vmem:[%s11726_s9 + $0xf60] sm:$0x3]  ;;  %v795_v36 = vld [vmem:[%s11726_s9 + $0xf70] sm:$0x3] }
 0x213   : > { %v6768_v3 = vadd.f32 %v6767_v1, %v6698_v52  ;;  %10230 = vmatpush1.xpose.msra.mxu0 %v785_v58  ;;  %10300 = vmatpush1.xpose.msra.mxu1 %v787_v59  ;;  %v1904_v52 = vrot.slane %v297_v34, %v11752_v19  ;;  %v544_v58 = vld [vmem:[%s11726_s9 + $0x798] sm:$0xff]  ;;  %v550_v34 = vld [vmem:[%s11726_s9 + $0x7c8] sm:$0xff] }
 0x214   : > { %v6769_v4 = vpop.f32.mrf.mxu0  ;;  %v6839_v5 = vpop.f32.mrf.mxu1  ;;  %10231 = vmatprep.subr.mxu0 %v530_v60  ;;  %10301 = vmatprep.subr.mxu1 %v532_v61  ;;  %v1913_v60 = vcombine.high %v1911_v53, %v1911_v53  ;;  %v1914_v61 = vcombine.high %v298_v54, %v298_v54 }
 0x215   : > { %v6838_v8 = vadd.f32 %v6837_v2, %v6768_v3  ;;  %10265 = vmatprep.mubr.f32.mxu0 %v1861_v62  ;;  %10335 = vmatprep.mubr.f32.mxu1 %v1862_v63  ;;  %v1912_v59 = vcombine.high %v1904_v52, %v1904_v52  ;;  %v541_v3 = vld [vmem:[%s11726_s9 + $0x780] sm:$0xff]  ;;  %v543_v4 = vld [vmem:[%s11726_s9 + $0x790] sm:$0xff] }
 0x217   : > { %10232 = vmatpush1.xpose.msra.mxu0 %v529_v6  ;;  %10302 = vmatpush1.xpose.msra.mxu1 %v531_v7  ;;  %v802_v6 = vld [vmem:[%s11726_s9 + $0xfa8] sm:$0x3]  ;;  %v804_v7 = vld [vmem:[%s11726_s9 + $0xfb8] sm:$0x3] }
 0x218   : > { %10369 = vmatprep.subr.mxu0 %v790_v9  ;;  %10439 = vmatprep.subr.mxu1 %v792_v10  ;;  %v1928_v9 = vrot.slane %v1914_v61, %v11752_v19  ;;  %v299_v10 = vld [vmem:[%s11720_s29 + $0x1f0] sm:$0xff]  ;;  %v553_v61 = vld [vmem:[%s11726_s9 + $0x7e0] sm:$0xff] }
 0x21a   : > { %v6907_v22 = vpop.f32.mrf.mxu0  ;;  %10266 = vmatmul.mubr.f32.vlgmr.msra.gmra.mxu0 %v1853_v55  ;;  %v6977_v23 = vpop.f32.mrf.mxu1  ;;  %10336 = vmatmul.mubr.f32.vlgmr.msra.gmra.mxu1 %v1860_v56  ;;  %v797_v55 = vld [vmem:[%s11726_s9 + $0xf80] sm:$0x3]  ;;  %v799_v56 = vld [vmem:[%s11726_s9 + $0xf90] sm:$0x3] }
 0x21b   : > { %v6908_v24 = vadd.f32 %v6907_v22, %v6838_v8  ;;  %10370 = vmatpush1.xpose.msra.mxu0 %v789_v14  ;;  %10440 = vmatpush1.xpose.msra.mxu1 %v791_v15  ;;  %v1921_v8 = vrot.slane %v298_v54, %v11752_v19  ;;  %v548_v14 = vld [vmem:[%s11726_s9 + $0x7b8] sm:$0xff] }
 0x21c   : > { %v6909_v25 = vpop.f32.mrf.mxu0  ;;  %v6979_v26 = vpop.f32.mrf.mxu1  ;;  %10371 = vmatprep.subr.mxu0 %v534_v16  ;;  %10441 = vmatprep.subr.mxu1 %v536_v17  ;;  %v1930_v16 = vcombine.high %v1928_v9, %v1928_v9  ;;  %v1931_v17 = vcombine.high %v299_v10, %v299_v10  ;;  %v556_v54 = vld [vmem:[%s11726_s9 + $0x7f8] sm:$0xff] }
 0x21d   : > { %v6978_v29 = vadd.f32 %v6977_v23, %v6908_v24  ;;  %10405 = vmatprep.mubr.f32.mxu0 %v1878_v18  ;;  %10475 = vmatprep.mubr.f32.mxu1 %v1879_v20  ;;  %v1929_v15 = vcombine.high %v1921_v8, %v1921_v8  ;;  %v545_v24 = vld [vmem:[%s11726_s9 + $0x7a0] sm:$0xff]  ;;  %v547_v25 = vld [vmem:[%s11726_s9 + $0x7b0] sm:$0xff] }
 0x21f   : > { %10372 = vmatpush1.xpose.msra.mxu0 %v533_v27  ;;  %10442 = vmatpush1.xpose.msra.mxu1 %v535_v28  ;;  %v806_v27 = vld [vmem:[%s11726_s9 + $0xfc8] sm:$0x3]  ;;  %v808_v28 = vld [vmem:[%s11726_s9 + $0xfd8] sm:$0x3] }
 0x220   : > { %10509 = vmatprep.subr.mxu0 %v794_v30  ;;  %10579 = vmatprep.subr.mxu1 %v796_v31  ;;  %v1945_v30 = vrot.slane %v1931_v17, %v11752_v19  ;;  %v300_v31 = vld [vmem:[%s11720_s29 + $0x1f8] sm:$0xff] }
 0x222   : > { %v7047_v42 = vpop.f32.mrf.mxu0  ;;  %10406 = vmatmul.mubr.f32.vlgmr.msra.gmra.mxu0 %v1870_v11  ;;  %v7117_v43 = vpop.f32.mrf.mxu1  ;;  %10476 = vmatmul.mubr.f32.vlgmr.msra.gmra.mxu1 %v1877_v12  ;;  %v801_v11 = vld [vmem:[%s11726_s9 + $0xfa0] sm:$0x3]  ;;  %v803_v12 = vld [vmem:[%s11726_s9 + $0xfb0] sm:$0x3] }
 0x223   : > { %v7048_v44 = vadd.f32 %v7047_v42, %v6978_v29  ;;  %10510 = vmatpush1.xpose.msra.mxu0 %v793_v35  ;;  %10580 = vmatpush1.xpose.msra.mxu1 %v795_v36  ;;  %v1938_v29 = vrot.slane %v299_v10, %v11752_v19  ;;  %v552_v35 = vld [vmem:[%s11726_s9 + $0x7d8] sm:$0xff] }
 0x224   : > { %v7049_v45 = vpop.f32.mrf.mxu0  ;;  %v7119_v46 = vpop.f32.mrf.mxu1  ;;  %10511 = vmatprep.subr.mxu0 %v538_v37  ;;  %10581 = vmatprep.subr.mxu1 %v540_v38  ;;  %v1947_v37 = vcombine.high %v1945_v30, %v1945_v30  ;;  %v1948_v38 = vcombine.high %v300_v31, %v300_v31 }
 0x225   : > { %v7118_v49 = vadd.f32 %v7117_v43, %v7048_v44  ;;  %10545 = vmatprep.mubr.f32.mxu0 %v1895_v39  ;;  %10615 = vmatprep.mubr.f32.mxu1 %v1896_v40  ;;  %v1946_v36 = vcombine.high %v1938_v29, %v1938_v29  ;;  %v549_v44 = vld [vmem:[%s11726_s9 + $0x7c0] sm:$0xff]  ;;  %v551_v45 = vld [vmem:[%s11726_s9 + $0x7d0] sm:$0xff] }
 0x227   : > { %10512 = vmatpush1.xpose.msra.mxu0 %v537_v47  ;;  %10582 = vmatpush1.xpose.msra.mxu1 %v539_v48  ;;  %v810_v47 = vld [vmem:[%s11726_s9 + $0xfe8] sm:$0x3]  ;;  %v812_v48 = vld [vmem:[%s11726_s9 + $0xff8] sm:$0x3] }
 0x228   : > { %10649 = vmatprep.subr.mxu0 %v798_v50  ;;  %10719 = vmatprep.subr.mxu1 %v800_v51  ;;  %v1962_v50 = vrot.slane %v1948_v38, %v11752_v19  ;;  %v809_v51 = vld [vmem:[%s11726_s9 + $0xfe0] sm:$0x3] }
 0x22a   : > { %v7187_v62 = vpop.f32.mrf.mxu0  ;;  %10546 = vmatmul.mubr.f32.vlgmr.msra.gmra.mxu0 %v1887_v32  ;;  %v7257_v63 = vpop.f32.mrf.mxu1  ;;  %10616 = vmatmul.mubr.f32.vlgmr.msra.gmra.mxu1 %v1894_v33  ;;  %v805_v32 = vld [vmem:[%s11726_s9 + $0xfc0] sm:$0x3]  ;;  %v807_v33 = vld [vmem:[%s11726_s9 + $0xfd0] sm:$0x3] }
 0x22b   : > { %v7188_v0 = vadd.f32 %v7187_v62, %v7118_v49  ;;  %10650 = vmatpush1.xpose.msra.mxu0 %v797_v55  ;;  %10720 = vmatpush1.xpose.msra.mxu1 %v799_v56  ;;  %v1955_v49 = vrot.slane %v300_v31, %v11752_v19  ;;  %v1964_v56 = vcombine.high %v1962_v50, %v1962_v50  ;;  %v555_v62 = vld [vmem:[%s11726_s9 + $0x7f0] sm:$0xff] }
 0x22c   : > { %v7189_v1 = vpop.f32.mrf.mxu0  ;;  %v7259_v2 = vpop.f32.mrf.mxu1  ;;  %10651 = vmatprep.subr.mxu0 %v542_v57  ;;  %10721 = vmatprep.subr.mxu1 %v544_v58 }
 0x22d   : > { %v7258_v5 = vadd.f32 %v7257_v63, %v7188_v0  ;;  %10685 = vmatprep.mubr.f32.mxu0 %v1912_v59  ;;  %10755 = vmatprep.mubr.f32.mxu1 %v1913_v60  ;;  %v1963_v55 = vcombine.high %v1955_v49, %v1955_v49 }
 0x22f   : > { %10652 = vmatpush1.xpose.msra.mxu0 %v541_v3  ;;  %10722 = vmatpush1.xpose.msra.mxu1 %v543_v4 }
 0x230   : > { %10789 = vmatprep.subr.mxu0 %v802_v6  ;;  %10859 = vmatprep.subr.mxu1 %v804_v7 }
 0x232   : > { %v7327_v18 = vpop.f32.mrf.mxu0  ;;  %10686 = vmatmul.mubr.f32.vlgmr.msra.gmra.mxu0 %v1904_v52  ;;  %v7397_v20 = vpop.f32.mrf.mxu1  ;;  %10756 = vmatmul.mubr.f32.vlgmr.msra.gmra.mxu1 %v1911_v53  ;;  %v811_v52 = vld [vmem:[%s11726_s9 + $0xff0] sm:$0x3]  ;;  %v554_v53 = vld [vmem:[%s11726_s9 + $0x7e8] sm:$0xff] }
 0x233   : > { %v7328_v21 = vadd.f32 %v7327_v18, %v7258_v5  ;;  %10790 = vmatpush1.xpose.msra.mxu0 %v801_v11  ;;  %10860 = vmatpush1.xpose.msra.mxu1 %v803_v12 }
 0x234   : > { %v7329_v22 = vpop.f32.mrf.mxu0  ;;  %v7399_v23 = vpop.f32.mrf.mxu1  ;;  %10791 = vmatprep.subr.mxu0 %v546_v13  ;;  %10861 = vmatprep.subr.mxu1 %v548_v14 }
 0x235   : > { %v7398_v26 = vadd.f32 %v7397_v20, %v7328_v21  ;;  %10825 = vmatprep.mubr.f32.mxu0 %v1929_v15  ;;  %10895 = vmatprep.mubr.f32.mxu1 %v1930_v16 }
 0x237   : > { %10792 = vmatpush1.xpose.msra.mxu0 %v545_v24  ;;  %10862 = vmatpush1.xpose.msra.mxu1 %v547_v25 }
 0x238   : > { %10929 = vmatprep.subr.mxu0 %v806_v27  ;;  %10999 = vmatprep.subr.mxu1 %v808_v28 }
 0x23a   : > { %v7467_v39 = vpop.f32.mrf.mxu0  ;;  %10826 = vmatmul.mubr.f32.vlgmr.msra.gmra.mxu0 %v1921_v8  ;;  %v7537_v40 = vpop.f32.mrf.mxu1  ;;  %10896 = vmatmul.mubr.f32.vlgmr.msra.gmra.mxu1 %v1928_v9 }
 0x23b   : > { %v7468_v41 = vadd.f32 %v7467_v39, %v7398_v26  ;;  %10930 = vmatpush1.xpose.msra.mxu0 %v805_v32  ;;  %11000 = vmatpush1.xpose.msra.mxu1 %v807_v33 }
 0x23c   : > { %v7469_v42 = vpop.f32.mrf.mxu0  ;;  %v7539_v43 = vpop.f32.mrf.mxu1  ;;  %10931 = vmatprep.subr.mxu0 %v550_v34  ;;  %11001 = vmatprep.subr.mxu1 %v552_v35 }
 0x23d   : > { %v7538_v46 = vadd.f32 %v7537_v40, %v7468_v41  ;;  %10965 = vmatprep.mubr.f32.mxu0 %v1946_v36  ;;  %11035 = vmatprep.mubr.f32.mxu1 %v1947_v37 }
 0x23f   : > { %10932 = vmatpush1.xpose.msra.mxu0 %v549_v44  ;;  %11002 = vmatpush1.xpose.msra.mxu1 %v551_v45 }
 0x240   : > { %11069 = vmatprep.subr.mxu0 %v810_v47  ;;  %11139 = vmatprep.subr.mxu1 %v812_v48 }
 0x242   : > { %v7607_v57 = vpop.f32.mrf.mxu0  ;;  %10966 = vmatmul.mubr.f32.vlgmr.msra.gmra.mxu0 %v1938_v29  ;;  %v7677_v58 = vpop.f32.mrf.mxu1  ;;  %11036 = vmatmul.mubr.f32.vlgmr.msra.gmra.mxu1 %v1945_v30 }
 0x243   : > { %v7608_v59 = vadd.f32 %v7607_v57, %v7538_v46  ;;  %11070 = vmatpush1.xpose.msra.mxu0 %v809_v51  ;;  %11140 = vmatpush1.xpose.msra.mxu1 %v811_v52 }
 0x244   : > { %v7609_v19 = vpop.f32.mrf.mxu0  ;;  %v7679_v60 = vpop.f32.mrf.mxu1  ;;  %11071 = vmatprep.subr.mxu0 %v554_v53  ;;  %11141 = vmatprep.subr.mxu1 %v556_v54 }
 0x245   : > { %v7678_v63 = vadd.f32 %v7677_v58, %v7608_v59  ;;  %11105 = vmatprep.mubr.f32.mxu0 %v1963_v55  ;;  %11175 = vmatprep.mubr.f32.mxu1 %v1964_v56 }
 0x247   : > { %11072 = vmatpush1.xpose.msra.mxu0 %v553_v61  ;;  %11142 = vmatpush1.xpose.msra.mxu1 %v555_v62 }
 0x24a   : > { %v7747_v0 = vpop.f32.mrf.mxu0  ;;  %11106 = vmatmul.mubr.f32.vlgmr.msra.gmra.mxu0 %v1955_v49  ;;  %11176 = vmatmul.mubr.f32.vlgmr.msra.gmra.mxu1 %v1962_v50  ;;  %v7817_v1 = vpop.f32.mrf.mxu1 }
 0x24b   : > { %v7748_v2 = vadd.f32 %v7747_v0, %v7678_v63 }
 0x24c   : > { %v7749_v3 = vpop.f32.mrf.mxu0  ;;  %v7819_v4 = vpop.f32.mrf.mxu1 }
 0x24d   : > { %v7818_v5 = vadd.f32 %v7817_v1, %v7748_v2 }
 0x252   : > { %v7887_v6 = vpop.f32.mrf.mxu0  ;;  %v7957_v7 = vpop.f32.mrf.mxu1 }
 0x253   : > { %v7888_v8 = vadd.f32 %v7887_v6, %v7818_v5 }
 0x254   : > { %v7889_v9 = vpop.f32.mrf.mxu0  ;;  %v7959_v10 = vpop.f32.mrf.mxu1 }
 0x255   : > { %v7958_v11 = vadd.f32 %v7957_v7, %v7888_v8 }
 0x25a   : > { %v8027_v12 = vpop.f32.mrf.mxu0  ;;  %v8097_v13 = vpop.f32.mrf.mxu1 }
 0x25b   : > { %v8028_v14 = vadd.f32 %v8027_v12, %v7958_v11 }
 0x25c   : > { %v8029_v15 = vpop.f32.mrf.mxu0  ;;  %v8099_v16 = vpop.f32.mrf.mxu1 }
 0x25d   : > { %v8098_v17 = vadd.f32 %v8097_v13, %v8028_v14 }
 0x262   : > { %v8167_v18 = vpop.f32.mrf.mxu0  ;;  %v8237_v20 = vpop.f32.mrf.mxu1 }
 0x263   : > { %v8168_v21 = vadd.f32 %v8167_v18, %v8098_v17 }
 0x264   : > { %v8169_v22 = vpop.f32.mrf.mxu0  ;;  %v8239_v23 = vpop.f32.mrf.mxu1 }
 0x265   : > { %v8238_v24 = vadd.f32 %v8237_v20, %v8168_v21 }
 0x26a   : > { %v8307_v25 = vpop.f32.mrf.mxu0  ;;  %v8377_v26 = vpop.f32.mrf.mxu1 }
 0x26b   : > { %v8308_v27 = vadd.f32 %v8307_v25, %v8238_v24 }
 0x26c   : > { %v8309_v28 = vpop.f32.mrf.mxu0  ;;  %v8379_v29 = vpop.f32.mrf.mxu1 }
 0x26d   : > { %v8378_v30 = vadd.f32 %v8377_v26, %v8308_v27 }
 0x272   : > { %v8447_v31 = vpop.f32.mrf.mxu0  ;;  %v8517_v32 = vpop.f32.mrf.mxu1 }
 0x273   : > { %v8448_v33 = vadd.f32 %v8447_v31, %v8378_v30 }
 0x274   : > { %v8449_v34 = vpop.f32.mrf.mxu0  ;;  %v8519_v35 = vpop.f32.mrf.mxu1 }
 0x275   : > { %v8518_v36 = vadd.f32 %v8517_v32, %v8448_v33 }
 0x27a   : > { %v8587_v37 = vpop.f32.mrf.mxu0  ;;  %v8657_v38 = vpop.f32.mrf.mxu1 }
 0x27b   : > { %v8588_v39 = vadd.f32 %v8587_v37, %v8518_v36 }
 0x27c   : > { %v8589_v40 = vpop.f32.mrf.mxu0  ;;  %v8659_v41 = vpop.f32.mrf.mxu1 }
 0x27d   : > { %v8658_v42 = vadd.f32 %v8657_v38, %v8588_v39 }
 0x282   : > { %v8727_v43 = vpop.f32.mrf.mxu0  ;;  %v8797_v44 = vpop.f32.mrf.mxu1 }
 0x283   : > { %v8728_v45 = vadd.f32 %v8727_v43, %v8658_v42 }
 0x284   : > { %v8729_v46 = vpop.f32.mrf.mxu0  ;;  %v8799_v47 = vpop.f32.mrf.mxu1 }
 0x285   : > { %v8798_v48 = vadd.f32 %v8797_v44, %v8728_v45 }
 0x28a   : > { %v8867_v49 = vpop.f32.mrf.mxu0  ;;  %v8937_v50 = vpop.f32.mrf.mxu1 }
 0x28b   : > { %v8868_v51 = vadd.f32 %v8867_v49, %v8798_v48 }
 0x28c   : > { %v8869_v52 = vpop.f32.mrf.mxu0  ;;  %v8939_v53 = vpop.f32.mrf.mxu1 }
 0x28d   : > { %v8938_v54 = vadd.f32 %v8937_v50, %v8868_v51 }
 0x292   : > { %v9007_v55 = vpop.f32.mrf.mxu0  ;;  %v9077_v56 = vpop.f32.mrf.mxu1 }
 0x293   : > { %v9008_v6 = vadd.f32 %v9007_v55, %v8938_v54 }
 0x294   : > { %v9009_v57 = vpop.f32.mrf.mxu0  ;;  %v9079_v58 = vpop.f32.mrf.mxu1 }
 0x295   : > { %v9078_v11 = vadd.f32 %v9077_v56, %v9008_v6 }
 0x29a   : > { %v9147_v59 = vpop.f32.mrf.mxu0  ;;  %v9217_v19 = vpop.f32.mrf.mxu1 }
 0x29b   : > { %v9148_v12 = vadd.f32 %v9147_v59, %v9078_v11 }
 0x29c   : > { %v9149_v60 = vpop.f32.mrf.mxu0  ;;  %v9219_v61 = vpop.f32.mrf.mxu1 }
 0x29d   : > { %v9218_v15 = vadd.f32 %v9217_v19, %v9148_v12 }
 0x2a2   : > { %v9287_v62 = vpop.f32.mrf.mxu0  ;;  %v9357_v63 = vpop.f32.mrf.mxu1 }
 0x2a3   : > { %v9288_v18 = vadd.f32 %v9287_v62, %v9218_v15 }
 0x2a4   : > { %v9289_v0 = vpop.f32.mrf.mxu0  ;;  %v9359_v1 = vpop.f32.mrf.mxu1 }
 0x2a5   : > { %v9358_v20 = vadd.f32 %v9357_v63, %v9288_v18 }
 0x2aa   : > { %v9427_v2 = vpop.f32.mrf.mxu0  ;;  %v9497_v3 = vpop.f32.mrf.mxu1 }
 0x2ab   : > { %v9428_v23 = vadd.f32 %v9427_v2, %v9358_v20  ;;  %v236_v20 = vld [vmem:[#allocation2] sm:$0x3] }
 0x2ac   : > { %v9429_v4 = vpop.f32.mrf.mxu0  ;;  %v9499_v5 = vpop.f32.mrf.mxu1 }
 0x2ad   : > { %v9498_v26 = vadd.f32 %v9497_v3, %v9428_v23 }
 0x2b2   : > { %v9567_v7 = vpop.f32.mrf.mxu0  ;;  %v9637_v8 = vpop.f32.mrf.mxu1 }
 0x2b3   : > { %v9568_v27 = vadd.f32 %v9567_v7, %v9498_v26 }
 0x2b4   : > { %v9569_v9 = vpop.f32.mrf.mxu0  ;;  %v9639_v10 = vpop.f32.mrf.mxu1 }
 0x2b5   : > { %v9638_v32 = vadd.f32 %v9637_v8, %v9568_v27 }
 0x2ba   : > { %v9707_v13 = vpop.f32.mrf.mxu0  ;;  %v9777_v14 = vpop.f32.mrf.mxu1 }
 0x2bb   : > { %v9708_v33 = vadd.f32 %v9707_v13, %v9638_v32 }
 0x2bc   : > { %v9709_v16 = vpop.f32.mrf.mxu0  ;;  %v9779_v17 = vpop.f32.mrf.mxu1 }
 0x2bd   : > { %v9778_v36 = vadd.f32 %v9777_v14, %v9708_v33 }
 0x2c2   : > { %v9847_v21 = vpop.f32.mrf.mxu0  ;;  %v9917_v22 = vpop.f32.mrf.mxu1 }
 0x2c3   : > { %v9848_v39 = vadd.f32 %v9847_v21, %v9778_v36 }
 0x2c4   : > { %v9849_v24 = vpop.f32.mrf.mxu0  ;;  %v9919_v25 = vpop.f32.mrf.mxu1 }
 0x2c5   : > { %v9918_v40 = vadd.f32 %v9917_v22, %v9848_v39 }
 0x2ca   : > { %v9987_v28 = vpop.f32.mrf.mxu0  ;;  %v10057_v29 = vpop.f32.mrf.mxu1 }
 0x2cb   : > { %v9988_v43 = vadd.f32 %v9987_v28, %v9918_v40 }
 0x2cc   : > { %v9989_v30 = vpop.f32.mrf.mxu0  ;;  %v10059_v31 = vpop.f32.mrf.mxu1 }
 0x2cd   : > { %v10058_v46 = vadd.f32 %v10057_v29, %v9988_v43 }
 0x2d2   : > { %v10127_v34 = vpop.f32.mrf.mxu0  ;;  %v10197_v35 = vpop.f32.mrf.mxu1 }
 0x2d3   : > { %v10128_v47 = vadd.f32 %v10127_v34, %v10058_v46 }
 0x2d4   : > { %v10129_v37 = vpop.f32.mrf.mxu0  ;;  %v10199_v38 = vpop.f32.mrf.mxu1 }
 0x2d5   : > { %v10198_v52 = vadd.f32 %v10197_v35, %v10128_v47 }
 0x2da   : > { %v10267_v41 = vpop.f32.mrf.mxu0  ;;  %v10337_v42 = vpop.f32.mrf.mxu1 }
 0x2db   : > { %v10268_v53 = vadd.f32 %v10267_v41, %v10198_v52 }
 0x2dc   : > { %v10269_v44 = vpop.f32.mrf.mxu0  ;;  %v10339_v45 = vpop.f32.mrf.mxu1 }
 0x2dd   : > { %v10338_v56 = vadd.f32 %v10337_v42, %v10268_v53 }
 0x2e2   : > { %v10407_v48 = vpop.f32.mrf.mxu0  ;;  %v10477_v49 = vpop.f32.mrf.mxu1 }
 0x2e3   : > { %v10408_v59 = vadd.f32 %v10407_v48, %v10338_v56 }
 0x2e4   : > { %v10409_v50 = vpop.f32.mrf.mxu0  ;;  %v10479_v51 = vpop.f32.mrf.mxu1 }
 0x2e5   : > { %v10478_v19 = vadd.f32 %v10477_v49, %v10408_v59 }
 0x2ea   : > { %v10547_v54 = vpop.f32.mrf.mxu0  ;;  %v10617_v55 = vpop.f32.mrf.mxu1 }
 0x2eb   : > { %v10548_v62 = vadd.f32 %v10547_v54, %v10478_v19 }
 0x2ec   : > { %v10549_v57 = vpop.f32.mrf.mxu0  ;;  %v10619_v58 = vpop.f32.mrf.mxu1 }
 0x2ed   : > { %v10618_v1 = vadd.f32 %v10617_v55, %v10548_v62 }
 0x2f2   : > { %v10687_v60 = vpop.f32.mrf.mxu0  ;;  %v10757_v61 = vpop.f32.mrf.mxu1 }
 0x2f3   : > { %v10688_v2 = vadd.f32 %v10687_v60, %v10618_v1 }
 0x2f4   : > { %v10689_v63 = vpop.f32.mrf.mxu0  ;;  %v10759_v0 = vpop.f32.mrf.mxu1 }
 0x2f5   : > { %v10758_v7 = vadd.f32 %v10757_v61, %v10688_v2 }
 0x2fa   : > { %v10827_v3 = vpop.f32.mrf.mxu0  ;;  %v10897_v4 = vpop.f32.mrf.mxu1 }
 0x2fb   : > { %v10828_v8 = vadd.f32 %v10827_v3, %v10758_v7 }
 0x2fc   : > { %v10829_v5 = vpop.f32.mrf.mxu0  ;;  %v10899_v6 = vpop.f32.mrf.mxu1 }
 0x2fd   : > { %v10898_v11 = vadd.f32 %v10897_v4, %v10828_v8 }
 0x302   : > { %v10967_v9 = vpop.f32.mrf.mxu0  ;;  %v11037_v10 = vpop.f32.mrf.mxu1 }
 0x303   : > { %v10968_v14 = vadd.f32 %v10967_v9, %v10898_v11 }
 0x304   : > { %v10969_v12 = vpop.f32.mrf.mxu0  ;;  %v11039_v13 = vpop.f32.mrf.mxu1 }
 0x305   : > { %v11038_v15 = vadd.f32 %v11037_v10, %v10968_v14 }
 0x30a   : > { %v11107_v16 = vpop.f32.mrf.mxu0  ;;  %v11177_v17 = vpop.f32.mrf.mxu1 }
 0x30b   : > { %v11108_v18 = vadd.f32 %v11107_v16, %v11038_v15 }
 0x30c   : > { %v11109_v21 = vpop.f32.mrf.mxu0  ;;  %v11179_v22 = vpop.f32.mrf.mxu1 }
 0x30d   : > { %v11178_v23 = vadd.f32 %v11177_v17, %v11108_v18  ;;  %11187 = sbr.rel (%p11308_p7) target bundleno = 794 (0x31a), region = 44 }
 0x30f   : > { %v11181_v24 = vadd.f32 %v11178_v23, %v236_v20 }
 0x311   : > { %11183 = vst.msk [vmem:[#allocation2] sm:$0x3] %vm11182_vm1, %v11181_v24 }
 0x318   : > { %v11188_v25 = vld [vmem:[#allocation2] sm:$0x3] }
 0x319   : > { %11189 = vst.msk [vmem:[%s11737_s27] sm:$0x3] %vm11182_vm1, %v11188_v25 }
 0x31a PF: > { %s18_s16 = sadd.s32 1, %s11584_s16   ;;  %s12479_s9 = smov %s11560_s10 }
 0x31b   : > { %p15_p4 = scmp.ge.s32.totalorder %s18_s16, 8   ;;  %s12480_s10 = smov %s11564_s11 }
 0x31c   : > { %s12481_s11 = smov %s11681_s5  ;;  %s12482_s12 = smov %s11576_s14 }
 0x31d   : > { %s12483_s13 = smov %s11580_s15  ;;  %s12484_s14 = smov %s12487_s18 }
 0x31e   : > { %s12485_s15 = smov %s12491_s19  ;;  %17 = sbr.rel (!%p15_p4) target bundleno = 7 (0x7), region = 89 }
 0x323   :  { %11209 = vsyncpa [#allocation4], 1 }
 0x324   :  { %11211 = vsyncpa [#allocation4 + $0x1], 1 }
 0x325   :  { %11212 = vsyncpa [#allocation6], 1 }
 0x326   :  { %11214 = vsyncpa [#allocation6 + $0x1], 1 }

</bundles_post_ra>
